<compile_context>
chip_gen: v6e
topology: v6e:2x2x1
jax: 0.10.0
libtpu: 0.0.40
codegen_flags: <defaults>
</compile_context>

<pallas_src>
import math

import jax
import jax.numpy as jnp
from jax.experimental import pallas as pl
from jax.experimental.pallas import tpu as pltpu

# ---------------- model hyper-parameters (small, deterministic) -------------
C = 32            # hidden channels
NH = 4            # attention heads
DH = C // NH      # per-head dim
DFF = 64          # FFN hidden dim
NUM_LAYERS = 2
LN_EPS = 1e-5


# ---------------------------- Pallas kernel ---------------------------------
def _layer_norm(x, g, b):
    mu = jnp.mean(x, axis=-1, keepdims=True)
    var = jnp.mean((x - mu) ** 2, axis=-1, keepdims=True)
    return (x - mu) * jax.lax.rsqrt(var + LN_EPS) * g + b


def fused_encoder_kernel(src_ref, pos_ref, amask_ref,
                         wqk_ref, wv_ref, wo_ref, w1_ref, w2_ref,
                         vc_ref, vf_ref,
                         out_ref, oheads_ref):
    """All layers, whole batch, one kernel invocation.

    src_ref/pos_ref: [N, C] f32  (N = bs*L, batch flattened into rows)
    amask_ref:       [N, N] f32  additive mask (0 allowed / -1e9 blocked):
                     blocks cross-batch attention and padded keys.
    wqk_ref:  [NUM_LAYERS, C, 2C]  bf16   (Wq | Wk stacked on the out dim)
    wv_ref:   [NUM_LAYERS, C, C]   bf16
    wo_ref:   [NUM_LAYERS, C, C]   bf16
    w1_ref:   [NUM_LAYERS, C, DFF] bf16
    w2_ref:   [NUM_LAYERS, DFF, C] bf16
    vc_ref:   [NUM_LAYERS, 9, C]   f32  rows = bq,bk,bv,bo,b2,ln1g,ln1b,ln2g,ln2b
    vf_ref:   [NUM_LAYERS, 1, DFF] f32  (b1)
    oheads_ref: [N, C] f32 VMEM scratch used to concatenate head outputs.
    """
    x = src_ref[...]              # [N, C] f32 activation, stays in VMEM/vregs
    p = pos_ref[...]
    amask = amask_ref[...]        # [N, N]
    scale = 1.0 / math.sqrt(DH)

    for l in range(NUM_LAYERS):                       # static unroll (2 layers)
        wqk = wqk_ref[l]                              # [C, 2C] bf16
        wv = wv_ref[l]
        wo = wo_ref[l]
        w1 = w1_ref[l]
        w2 = w2_ref[l]
        vc = vc_ref[l]                                # [9, C] f32
        b1 = vf_ref[l]                                # [1, DFF] f32
        bq, bk, bv, bo, b2 = vc[0:1], vc[1:2], vc[2:3], vc[3:4], vc[4:5]
        ln1g, ln1b, ln2g, ln2b = vc[5:6], vc[6:7], vc[7:8], vc[8:9]

        # --- fused Q/K projection (query & key see the positional embedding) ---
        qk_in = (x + p).astype(jnp.bfloat16)
        qk = jnp.dot(qk_in, wqk, preferred_element_type=jnp.float32)   # [N, 2C]
        q = qk[:, :C] + bq
        k = qk[:, C:] + bk
        v = jnp.dot(x.astype(jnp.bfloat16), wv,
                    preferred_element_type=jnp.float32) + bv           # [N, C]

        # --- per-head attention; head outputs concatenated via VMEM scratch ---
        for h in range(NH):
            sl = slice(h * DH, (h + 1) * DH)
            qh = q[:, sl].astype(jnp.bfloat16)        # [N, DH]
            kh = k[:, sl].astype(jnp.bfloat16)        # [N, DH]
            vh = v[:, sl].astype(jnp.bfloat16)        # [N, DH]
            # scores: contract the head dim of q and k (no explicit transpose)
            s = jax.lax.dot_general(
                qh, kh, (((1,), (1,)), ((), ())),
                preferred_element_type=jnp.float32) * scale            # [N, N]
            s = s + amask
            s = s - jnp.max(s, axis=-1, keepdims=True)
            e = jnp.exp(s)
            inv = pl.reciprocal(jnp.sum(e, axis=-1, keepdims=True), approx=True)
            a = e * inv
            oh = jnp.dot(a.astype(jnp.bfloat16), vh,
                         preferred_element_type=jnp.float32)           # [N, DH]
            oheads_ref[:, sl] = oh                    # lane-slice write, f32

        # --- single K=C output projection instead of NH small accumulations ---
        attn = jnp.dot(oheads_ref[...].astype(jnp.bfloat16), wo,
                       preferred_element_type=jnp.float32) + bo        # [N, C]

        # --- residual + post-LN, FFN, residual + post-LN (all f32) ---
        y = _layer_norm(x + attn, ln1g, ln1b)
        h1 = jnp.maximum(
            jnp.dot(y.astype(jnp.bfloat16), w1,
                    preferred_element_type=jnp.float32) + b1, 0.0)     # [N, DFF]
        ff = jnp.dot(h1.astype(jnp.bfloat16), w2,
                     preferred_element_type=jnp.float32) + b2
        x = _layer_norm(y + ff, ln2g, ln2b)

    out_ref[...] = x.astype(out_ref.dtype)


def run_fused_encoder(src, pos, padding_mask, packed_params):
    """Flattens the batch, builds the additive mask, runs the fused kernel."""
    bs, L, Cd = src.shape
    N = bs * L
    src2 = src.reshape(N, Cd)
    pos2 = pos.reshape(N, Cd)

    batch_ids = jnp.repeat(jnp.arange(bs), L)                       # [N]
    key_ok = padding_mask.reshape(N)                                # True = valid
    allowed = (batch_ids[:, None] == batch_ids[None, :]) & key_ok[None, :]
    amask = jnp.where(allowed, 0.0, -1e9).astype(jnp.float32)       # [N, N]

    out2 = pl.pallas_call(
        fused_encoder_kernel,
        out_shape=jax.ShapeDtypeStruct((N, Cd), jnp.float32),
        scratch_shapes=[pltpu.VMEM((N, Cd), jnp.float32)],
    )(src2, pos2, amask, *packed_params)
    return out2.reshape(bs, L, Cd)


# ----------------------------- plain-JAX glue --------------------------------
def get_reference_points(spatial_shapes, valid_ratios):
    """Exact port of TransformerEncoder.get_reference_points."""
    reference_points_list = []
    for lvl, (H_, W_) in enumerate(spatial_shapes):
        ref_y, ref_x = jnp.meshgrid(
            jnp.linspace(0.5, H_ - 0.5, H_, dtype=jnp.float32),
            jnp.linspace(0.5, W_ - 0.5, W_, dtype=jnp.float32),
            indexing="ij")
        ref_y = ref_y.reshape(-1)[None] / (valid_ratios[:, None, lvl, 1] * H_)
        ref_x = ref_x.reshape(-1)[None] / (valid_ratios[:, None, lvl, 0] * W_)
        ref = jnp.stack((ref_x, ref_y), -1)
        reference_points_list.append(ref)
    reference_points = jnp.concatenate(reference_points_list, 1)
    reference_points = reference_points[:, :, None] * valid_ratios[:, None]
    return reference_points                        # [bs, L, n_levels, 2]


def init_layer_params(key):
    ks = jax.random.split(key, 12)

    def w(k, fi, fo):
        return jax.random.normal(k, (fi, fo), jnp.float32) * 0.02

    def b(k, n):
        return jax.random.normal(k, (n,), jnp.float32) * 0.01

    return dict(
        wq=w(ks[0], C, C), bq=b(ks[6], C),
        wk=w(ks[1], C, C), bk=b(ks[7], C),
        wv=w(ks[2], C, C), bv=b(ks[8], C),
        wo=w(ks[3], C, C), bo=b(ks[9], C),
        w1=w(ks[4], C, DFF), b1=b(ks[10], DFF),
        w2=w(ks[5], DFF, C), b2=b(ks[11], C),
        ln1g=jnp.ones((C,), jnp.float32), ln1b=jnp.zeros((C,), jnp.float32),
        ln2g=jnp.ones((C,), jnp.float32), ln2b=jnp.zeros((C,), jnp.float32),
    )


def pack_params(layer_params):
    """Stack per-layer params into 7 arrays (weights -> bf16, vectors -> f32)."""
    def stack(name):
        return jnp.stack([p[name] for p in layer_params])

    wqk = jnp.stack([jnp.concatenate([p["wq"], p["wk"]], axis=1)
                     for p in layer_params]).astype(jnp.bfloat16)   # [NL, C, 2C]
    wv = stack("wv").astype(jnp.bfloat16)                           # [NL, C, C]
    wo = stack("wo").astype(jnp.bfloat16)                           # [NL, C, C]
    w1 = stack("w1").astype(jnp.bfloat16)                           # [NL, C, DFF]
    w2 = stack("w2").astype(jnp.bfloat16)                           # [NL, DFF, C]
    vc = jnp.stack([jnp.stack([p["bq"], p["bk"], p["bv"], p["bo"], p["b2"],
                               p["ln1g"], p["ln1b"], p["ln2g"], p["ln2b"]],
                              axis=0)
                    for p in layer_params]).astype(jnp.float32)     # [NL, 9, C]
    vf = jnp.stack([p["b1"][None, :] for p in layer_params]
                   ).astype(jnp.float32)                            # [NL, 1, DFF]
    return (wqk, wv, wo, w1, w2, vc, vf)


def transformer_encoder_forward(src, spatial_shapes, valid_ratios, pos,
                                padding_mask, packed_params):
    """Mirrors TransformerEncoder.forward.

    padding_mask: True for NON-padding elements (per the module docstring).
    """
    reference_points = get_reference_points(spatial_shapes, valid_ratios)
    # TODO(synk): the source never defines `encoder_layer`; the deformable
    # MSDeformAttn variant (grid_sample-style bilinear gather) has no clean
    # Pallas equivalent, so each cloned layer is a standard post-LN MHSA+FFN
    # block. reference_points are computed for semantic parity but unused.
    # Dropout is omitted (inference-mode parity).
    output = run_fused_encoder(src, pos, padding_mask, packed_params)
    return output, reference_points


# ----------------------- pure-JAX f32 reference ------------------------------
def _ln_ref(x, g, b):
    mu = jnp.mean(x, axis=-1, keepdims=True)
    var = jnp.mean((x - mu) ** 2, axis=-1, keepdims=True)
    return (x - mu) * jax.lax.rsqrt(var + LN_EPS) * g + b


def encoder_forward_reference(src, pos, padding_mask, layer_params):
    bs, L, Cd = src.shape
    neg = jnp.where(padding_mask, 0.0, -1e9).astype(jnp.float32)    # [bs, L]
    x = src
    for p in layer_params:
        qk_in = x + pos
        q = qk_in @ p["wq"] + p["bq"]
        k = qk_in @ p["wk"] + p["bk"]
        v = x @ p["wv"] + p["bv"]
        qh = q.reshape(bs, L, NH, DH).transpose(0, 2, 1, 3)
        kh = k.reshape(bs, L, NH, DH).transpose(0, 2, 1, 3)
        vh = v.reshape(bs, L, NH, DH).transpose(0, 2, 1, 3)
        s = jnp.einsum("bhld,bhmd->bhlm", qh, kh) / math.sqrt(DH)
        s = s + neg[:, None, None, :]
        a = jax.nn.softmax(s, axis=-1)
        o = jnp.einsum("bhlm,bhmd->bhld", a, vh
                       ).transpose(0, 2, 1, 3).reshape(bs, L, Cd)
        attn = o @ p["wo"] + p["bo"]
        y = _ln_ref(x + attn, p["ln1g"], p["ln1b"])
        h1 = jax.nn.relu(y @ p["w1"] + p["b1"])
        ff = h1 @ p["w2"] + p["b2"]
        x = _ln_ref(y + ff, p["ln2g"], p["ln2b"])
    return x


# --------------------------------- main --------------------------------------
if __name__ == "__main__":
    bs = 2
    spatial_shapes = [(4, 4), (2, 2)]          # n_levels = 2
    L = sum(h * w for h, w in spatial_shapes)  # 20

    key = jax.random.PRNGKey(0)
    k_src, k_pos, k_params = jax.random.split(key, 3)

    src = jax.random.normal(k_src, (bs, L, C), jnp.float32)
    pos = jax.random.normal(k_pos, (bs, L, C), jnp.float32)
    valid_ratios = jnp.array(
        [[[1.0, 1.0], [1.0, 1.0]],
         [[0.75, 0.5], [0.75, 0.5]]], dtype=jnp.float32)      # [bs, 2, 2]
    # True = non-padding; pad the last 4 tokens of batch 1.
    padding_mask = jnp.ones((bs, L), dtype=bool).at[1, -4:].set(False)

    layer_params = [init_layer_params(k)
                    for k in jax.random.split(k_params, NUM_LAYERS)]
    packed_params = pack_params(layer_params)

    out, ref_pts = transformer_encoder_forward(
        src, spatial_shapes, valid_ratios, pos, padding_mask, packed_params)
    out = jax.block_until_ready(out)
    ref_pts = jax.block_until_ready(ref_pts)

    # correctness vs f32 pure-JAX reference (bf16 MXU + approx recip tolerance)
    ref = encoder_forward_reference(src, pos, padding_mask, layer_params)
    err = float(jnp.max(jnp.abs(out - ref)))

    assert out.shape == (bs, L, C)
    assert ref_pts.shape == (bs, L, len(spatial_shapes), 2)
    assert bool(jnp.all(jnp.isfinite(out)))
    assert err < 0.1, f"mismatch vs f32 reference: {err}"
    print("KERNEL_OK")
</pallas_src>

<mosaic_0001>
module attributes {stable_mosaic.version = 11 : i64} {
  func.func @fused_encoder_kernel(%arg0: memref<40x32xf32, #tpu.memory_space<vmem>>, %arg1: memref<40x32xf32, #tpu.memory_space<vmem>>, %arg2: memref<40x40xf32, #tpu.memory_space<vmem>>, %arg3: memref<2x32x64xbf16, #tpu.memory_space<vmem>>, %arg4: memref<2x32x32xbf16, #tpu.memory_space<vmem>>, %arg5: memref<2x32x32xbf16, #tpu.memory_space<vmem>>, %arg6: memref<2x32x64xbf16, #tpu.memory_space<vmem>>, %arg7: memref<2x64x32xbf16, #tpu.memory_space<vmem>>, %arg8: memref<2x9x32xf32, #tpu.memory_space<vmem>>, %arg9: memref<2x1x64xf32, #tpu.memory_space<vmem>>, %arg10: memref<40x32xf32, #tpu.memory_space<vmem>>, %arg11: memref<40x32xf32, #tpu.memory_space<vmem>>) attributes {dimension_semantics = [], scalar_prefetch = 0 : i64, scratch_operands = 1 : i64, tpu.core_type = #tpu.core_type<tc>} {
    %c0 = arith.constant 0 : index
    %c0_0 = arith.constant 0 : index
    %0 = vector.load %arg0[%c0, %c0_0] : memref<40x32xf32, #tpu.memory_space<vmem>>, vector<40x32xf32>
    %c0_1 = arith.constant 0 : index
    %c0_2 = arith.constant 0 : index
    %1 = vector.load %arg1[%c0_1, %c0_2] : memref<40x32xf32, #tpu.memory_space<vmem>>, vector<40x32xf32>
    %c0_3 = arith.constant 0 : index
    %c0_4 = arith.constant 0 : index
    %2 = vector.load %arg2[%c0_3, %c0_4] : memref<40x40xf32, #tpu.memory_space<vmem>>, vector<40x40xf32>
    %c0_5 = arith.constant 0 : index
    %c0_6 = arith.constant 0 : index
    %c0_7 = arith.constant 0 : index
    %3 = vector.load %arg3[%c0_5, %c0_6, %c0_7] : memref<2x32x64xbf16, #tpu.memory_space<vmem>>, vector<1x32x64xbf16>
    %4 = vector.shape_cast %3 : vector<1x32x64xbf16> to vector<32x64xbf16>
    %c0_8 = arith.constant 0 : index
    %c0_9 = arith.constant 0 : index
    %c0_10 = arith.constant 0 : index
    %5 = vector.load %arg4[%c0_8, %c0_9, %c0_10] : memref<2x32x32xbf16, #tpu.memory_space<vmem>>, vector<1x32x32xbf16>
    %6 = vector.shape_cast %5 : vector<1x32x32xbf16> to vector<32x32xbf16>
    %c0_11 = arith.constant 0 : index
    %c0_12 = arith.constant 0 : index
    %c0_13 = arith.constant 0 : index
    %7 = vector.load %arg5[%c0_11, %c0_12, %c0_13] : memref<2x32x32xbf16, #tpu.memory_space<vmem>>, vector<1x32x32xbf16>
    %8 = vector.shape_cast %7 : vector<1x32x32xbf16> to vector<32x32xbf16>
    %c0_14 = arith.constant 0 : index
    %c0_15 = arith.constant 0 : index
    %c0_16 = arith.constant 0 : index
    %9 = vector.load %arg6[%c0_14, %c0_15, %c0_16] : memref<2x32x64xbf16, #tpu.memory_space<vmem>>, vector<1x32x64xbf16>
    %10 = vector.shape_cast %9 : vector<1x32x64xbf16> to vector<32x64xbf16>
    %c0_17 = arith.constant 0 : index
    %c0_18 = arith.constant 0 : index
    %c0_19 = arith.constant 0 : index
    %11 = vector.load %arg7[%c0_17, %c0_18, %c0_19] : memref<2x64x32xbf16, #tpu.memory_space<vmem>>, vector<1x64x32xbf16>
    %12 = vector.shape_cast %11 : vector<1x64x32xbf16> to vector<64x32xbf16>
    %c0_20 = arith.constant 0 : index
    %c0_21 = arith.constant 0 : index
    %c0_22 = arith.constant 0 : index
    %13 = vector.load %arg8[%c0_20, %c0_21, %c0_22] : memref<2x9x32xf32, #tpu.memory_space<vmem>>, vector<1x9x32xf32>
    %14 = vector.shape_cast %13 : vector<1x9x32xf32> to vector<9x32xf32>
    %c0_23 = arith.constant 0 : index
    %c0_24 = arith.constant 0 : index
    %c0_25 = arith.constant 0 : index
    %15 = vector.load %arg9[%c0_23, %c0_24, %c0_25] : memref<2x1x64xf32, #tpu.memory_space<vmem>>, vector<1x1x64xf32>
    %16 = vector.shape_cast %15 : vector<1x1x64xf32> to vector<1x64xf32>
    %17 = vector.extract_strided_slice %14 {offsets = [0, 0], sizes = [1, 32], strides = [1, 1]} : vector<9x32xf32> to vector<1x32xf32>
    %18 = vector.extract_strided_slice %14 {offsets = [1, 0], sizes = [1, 32], strides = [1, 1]} : vector<9x32xf32> to vector<1x32xf32>
    %19 = vector.extract_strided_slice %14 {offsets = [2, 0], sizes = [1, 32], strides = [1, 1]} : vector<9x32xf32> to vector<1x32xf32>
    %20 = vector.extract_strided_slice %14 {offsets = [3, 0], sizes = [1, 32], strides = [1, 1]} : vector<9x32xf32> to vector<1x32xf32>
    %21 = vector.extract_strided_slice %14 {offsets = [4, 0], sizes = [1, 32], strides = [1, 1]} : vector<9x32xf32> to vector<1x32xf32>
    %22 = vector.extract_strided_slice %14 {offsets = [5, 0], sizes = [1, 32], strides = [1, 1]} : vector<9x32xf32> to vector<1x32xf32>
    %23 = vector.extract_strided_slice %14 {offsets = [6, 0], sizes = [1, 32], strides = [1, 1]} : vector<9x32xf32> to vector<1x32xf32>
    %24 = vector.extract_strided_slice %14 {offsets = [7, 0], sizes = [1, 32], strides = [1, 1]} : vector<9x32xf32> to vector<1x32xf32>
    %25 = vector.extract_strided_slice %14 {offsets = [8, 0], sizes = [1, 32], strides = [1, 1]} : vector<9x32xf32> to vector<1x32xf32>
    %26 = arith.addf %0, %1 : vector<40x32xf32>
    %27 = arith.truncf %26 : vector<40x32xf32> to vector<40x32xbf16>
    %cst = arith.constant dense<0.000000e+00> : vector<40x64xf32>
    %28 = tpu.matmul %27, %4, %cst {dimension_numbers = #tpu.dot_dimension_numbers<[1], [0], [0], [1], [0, 0, 1, 1], [], []>} : vector<40x32xbf16>, vector<32x64xbf16>, vector<40x64xf32> -> vector<40x64xf32>
    %29 = vector.extract_strided_slice %28 {offsets = [0, 0], sizes = [40, 32], strides = [1, 1]} : vector<40x64xf32> to vector<40x32xf32>
    %30 = vector.broadcast %17 : vector<1x32xf32> to vector<40x32xf32>
    %31 = arith.addf %29, %30 : vector<40x32xf32>
    %32 = vector.extract_strided_slice %28 {offsets = [0, 32], sizes = [40, 32], strides = [1, 1]} : vector<40x64xf32> to vector<40x32xf32>
    %33 = vector.broadcast %18 : vector<1x32xf32> to vector<40x32xf32>
    %34 = arith.addf %32, %33 : vector<40x32xf32>
    %35 = arith.truncf %0 : vector<40x32xf32> to vector<40x32xbf16>
    %cst_26 = arith.constant dense<0.000000e+00> : vector<40x32xf32>
    %36 = tpu.matmul %35, %6, %cst_26 {dimension_numbers = #tpu.dot_dimension_numbers<[1], [0], [0], [1], [0, 0, 1, 1], [], []>} : vector<40x32xbf16>, vector<32x32xbf16>, vector<40x32xf32> -> vector<40x32xf32>
    %37 = vector.broadcast %19 : vector<1x32xf32> to vector<40x32xf32>
    %38 = arith.addf %36, %37 : vector<40x32xf32>
    %39 = vector.extract_strided_slice %31 {offsets = [0, 0], sizes = [40, 8], strides = [1, 1]} : vector<40x32xf32> to vector<40x8xf32>
    %40 = arith.truncf %39 : vector<40x8xf32> to vector<40x8xbf16>
    %41 = vector.extract_strided_slice %34 {offsets = [0, 0], sizes = [40, 8], strides = [1, 1]} : vector<40x32xf32> to vector<40x8xf32>
    %42 = arith.truncf %41 : vector<40x8xf32> to vector<40x8xbf16>
    %43 = vector.extract_strided_slice %38 {offsets = [0, 0], sizes = [40, 8], strides = [1, 1]} : vector<40x32xf32> to vector<40x8xf32>
    %44 = arith.truncf %43 : vector<40x8xf32> to vector<40x8xbf16>
    %cst_27 = arith.constant dense<0.000000e+00> : vector<40x40xf32>
    %45 = tpu.matmul %40, %42, %cst_27 {dimension_numbers = #tpu.dot_dimension_numbers<[1], [1], [0], [0], [0, 0, 1, 0], [], []>} : vector<40x8xbf16>, vector<40x8xbf16>, vector<40x40xf32> -> vector<40x40xf32>
    %cst_28 = arith.constant 0.353553385 : f32
    %46 = vector.broadcast %cst_28 : f32 to vector<40x40xf32>
    %47 = arith.mulf %45, %46 : vector<40x40xf32>
    %48 = arith.addf %47, %2 : vector<40x40xf32>
    %cst_29 = arith.constant dense<0xFF800000> : vector<40xf32>
    %49 = vector.multi_reduction <maximumf>, %48, %cst_29 [1] : vector<40x40xf32> to vector<40xf32>
    %50 = vector.shape_cast %49 : vector<40xf32> to vector<40x1xf32>
    %51 = vector.broadcast %50 : vector<40x1xf32> to vector<40x40xf32>
    %52 = arith.subf %48, %51 : vector<40x40xf32>
    %53 = math.exp %52 : vector<40x40xf32>
    %cst_30 = arith.constant dense<0.000000e+00> : vector<40xf32>
    %54 = vector.multi_reduction <add>, %53, %cst_30 [1] : vector<40x40xf32> to vector<40xf32>
    %55 = vector.shape_cast %54 : vector<40xf32> to vector<40x1xf32>
    %56 = tpu.reciprocal %55 {approx = true} : vector<40x1xf32> -> vector<40x1xf32>
    %57 = vector.broadcast %56 : vector<40x1xf32> to vector<40x40xf32>
    %58 = arith.mulf %53, %57 : vector<40x40xf32>
    %59 = arith.truncf %58 : vector<40x40xf32> to vector<40x40xbf16>
    %cst_31 = arith.constant dense<0.000000e+00> : vector<40x8xf32>
    %60 = tpu.matmul %59, %44, %cst_31 {dimension_numbers = #tpu.dot_dimension_numbers<[1], [0], [0], [1], [0, 0, 1, 1], [], []>} : vector<40x40xbf16>, vector<40x8xbf16>, vector<40x8xf32> -> vector<40x8xf32>
    %c0_32 = arith.constant 0 : index
    %c0_33 = arith.constant 0 : index
    %61 = vector.load %arg11[%c0_32, %c0_33] : memref<40x32xf32, #tpu.memory_space<vmem>>, vector<40x8xf32>
    tpu.vector_store %arg11[%c0_32, %c0_33], %60 {strides = array<i32>} : memref<40x32xf32, #tpu.memory_space<vmem>>, vector<40x8xf32>,
    %62 = vector.extract_strided_slice %31 {offsets = [0, 8], sizes = [40, 8], strides = [1, 1]} : vector<40x32xf32> to vector<40x8xf32>
    %63 = arith.truncf %62 : vector<40x8xf32> to vector<40x8xbf16>
    %64 = vector.extract_strided_slice %34 {offsets = [0, 8], sizes = [40, 8], strides = [1, 1]} : vector<40x32xf32> to vector<40x8xf32>
    %65 = arith.truncf %64 : vector<40x8xf32> to vector<40x8xbf16>
    %66 = vector.extract_strided_slice %38 {offsets = [0, 8], sizes = [40, 8], strides = [1, 1]} : vector<40x32xf32> to vector<40x8xf32>
    %67 = arith.truncf %66 : vector<40x8xf32> to vector<40x8xbf16>
    %cst_34 = arith.constant dense<0.000000e+00> : vector<40x40xf32>
    %68 = tpu.matmul %63, %65, %cst_34 {dimension_numbers = #tpu.dot_dimension_numbers<[1], [1], [0], [0], [0, 0, 1, 0], [], []>} : vector<40x8xbf16>, vector<40x8xbf16>, vector<40x40xf32> -> vector<40x40xf32>
    %cst_35 = arith.constant 0.353553385 : f32
    %69 = vector.broadcast %cst_35 : f32 to vector<40x40xf32>
    %70 = arith.mulf %68, %69 : vector<40x40xf32>
    %71 = arith.addf %70, %2 : vector<40x40xf32>
    %cst_36 = arith.constant dense<0xFF800000> : vector<40xf32>
    %72 = vector.multi_reduction <maximumf>, %71, %cst_36 [1] : vector<40x40xf32> to vector<40xf32>
    %73 = vector.shape_cast %72 : vector<40xf32> to vector<40x1xf32>
    %74 = vector.broadcast %73 : vector<40x1xf32> to vector<40x40xf32>
    %75 = arith.subf %71, %74 : vector<40x40xf32>
    %76 = math.exp %75 : vector<40x40xf32>
    %cst_37 = arith.constant dense<0.000000e+00> : vector<40xf32>
    %77 = vector.multi_reduction <add>, %76, %cst_37 [1] : vector<40x40xf32> to vector<40xf32>
    %78 = vector.shape_cast %77 : vector<40xf32> to vector<40x1xf32>
    %79 = tpu.reciprocal %78 {approx = true} : vector<40x1xf32> -> vector<40x1xf32>
    %80 = vector.broadcast %79 : vector<40x1xf32> to vector<40x40xf32>
    %81 = arith.mulf %76, %80 : vector<40x40xf32>
    %82 = arith.truncf %81 : vector<40x40xf32> to vector<40x40xbf16>
    %cst_38 = arith.constant dense<0.000000e+00> : vector<40x8xf32>
    %83 = tpu.matmul %82, %67, %cst_38 {dimension_numbers = #tpu.dot_dimension_numbers<[1], [0], [0], [1], [0, 0, 1, 1], [], []>} : vector<40x40xbf16>, vector<40x8xbf16>, vector<40x8xf32> -> vector<40x8xf32>
    %c0_39 = arith.constant 0 : index
    %c8 = arith.constant 8 : index
    %84 = vector.load %arg11[%c0_39, %c8] : memref<40x32xf32, #tpu.memory_space<vmem>>, vector<40x8xf32>
    tpu.vector_store %arg11[%c0_39, %c8], %83 {strides = array<i32>} : memref<40x32xf32, #tpu.memory_space<vmem>>, vector<40x8xf32>,
    %85 = vector.extract_strided_slice %31 {offsets = [0, 16], sizes = [40, 8], strides = [1, 1]} : vector<40x32xf32> to vector<40x8xf32>
    %86 = arith.truncf %85 : vector<40x8xf32> to vector<40x8xbf16>
    %87 = vector.extract_strided_slice %34 {offsets = [0, 16], sizes = [40, 8], strides = [1, 1]} : vector<40x32xf32> to vector<40x8xf32>
    %88 = arith.truncf %87 : vector<40x8xf32> to vector<40x8xbf16>
    %89 = vector.extract_strided_slice %38 {offsets = [0, 16], sizes = [40, 8], strides = [1, 1]} : vector<40x32xf32> to vector<40x8xf32>
    %90 = arith.truncf %89 : vector<40x8xf32> to vector<40x8xbf16>
    %cst_40 = arith.constant dense<0.000000e+00> : vector<40x40xf32>
    %91 = tpu.matmul %86, %88, %cst_40 {dimension_numbers = #tpu.dot_dimension_numbers<[1], [1], [0], [0], [0, 0, 1, 0], [], []>} : vector<40x8xbf16>, vector<40x8xbf16>, vector<40x40xf32> -> vector<40x40xf32>
    %cst_41 = arith.constant 0.353553385 : f32
    %92 = vector.broadcast %cst_41 : f32 to vector<40x40xf32>
    %93 = arith.mulf %91, %92 : vector<40x40xf32>
    %94 = arith.addf %93, %2 : vector<40x40xf32>
    %cst_42 = arith.constant dense<0xFF800000> : vector<40xf32>
    %95 = vector.multi_reduction <maximumf>, %94, %cst_42 [1] : vector<40x40xf32> to vector<40xf32>
    %96 = vector.shape_cast %95 : vector<40xf32> to vector<40x1xf32>
    %97 = vector.broadcast %96 : vector<40x1xf32> to vector<40x40xf32>
    %98 = arith.subf %94, %97 : vector<40x40xf32>
    %99 = math.exp %98 : vector<40x40xf32>
    %cst_43 = arith.constant dense<0.000000e+00> : vector<40xf32>
    %100 = vector.multi_reduction <add>, %99, %cst_43 [1] : vector<40x40xf32> to vector<40xf32>
    %101 = vector.shape_cast %100 : vector<40xf32> to vector<40x1xf32>
    %102 = tpu.reciprocal %101 {approx = true} : vector<40x1xf32> -> vector<40x1xf32>
    %103 = vector.broadcast %102 : vector<40x1xf32> to vector<40x40xf32>
    %104 = arith.mulf %99, %103 : vector<40x40xf32>
    %105 = arith.truncf %104 : vector<40x40xf32> to vector<40x40xbf16>
    %cst_44 = arith.constant dense<0.000000e+00> : vector<40x8xf32>
    %106 = tpu.matmul %105, %90, %cst_44 {dimension_numbers = #tpu.dot_dimension_numbers<[1], [0], [0], [1], [0, 0, 1, 1], [], []>} : vector<40x40xbf16>, vector<40x8xbf16>, vector<40x8xf32> -> vector<40x8xf32>
    %c0_45 = arith.constant 0 : index
    %c16 = arith.constant 16 : index
    %107 = vector.load %arg11[%c0_45, %c16] : memref<40x32xf32, #tpu.memory_space<vmem>>, vector<40x8xf32>
    tpu.vector_store %arg11[%c0_45, %c16], %106 {strides = array<i32>} : memref<40x32xf32, #tpu.memory_space<vmem>>, vector<40x8xf32>,
    %108 = vector.extract_strided_slice %31 {offsets = [0, 24], sizes = [40, 8], strides = [1, 1]} : vector<40x32xf32> to vector<40x8xf32>
    %109 = arith.truncf %108 : vector<40x8xf32> to vector<40x8xbf16>
    %110 = vector.extract_strided_slice %34 {offsets = [0, 24], sizes = [40, 8], strides = [1, 1]} : vector<40x32xf32> to vector<40x8xf32>
    %111 = arith.truncf %110 : vector<40x8xf32> to vector<40x8xbf16>
    %112 = vector.extract_strided_slice %38 {offsets = [0, 24], sizes = [40, 8], strides = [1, 1]} : vector<40x32xf32> to vector<40x8xf32>
    %113 = arith.truncf %112 : vector<40x8xf32> to vector<40x8xbf16>
    %cst_46 = arith.constant dense<0.000000e+00> : vector<40x40xf32>
    %114 = tpu.matmul %109, %111, %cst_46 {dimension_numbers = #tpu.dot_dimension_numbers<[1], [1], [0], [0], [0, 0, 1, 0], [], []>} : vector<40x8xbf16>, vector<40x8xbf16>, vector<40x40xf32> -> vector<40x40xf32>
    %cst_47 = arith.constant 0.353553385 : f32
    %115 = vector.broadcast %cst_47 : f32 to vector<40x40xf32>
    %116 = arith.mulf %114, %115 : vector<40x40xf32>
    %117 = arith.addf %116, %2 : vector<40x40xf32>
    %cst_48 = arith.constant dense<0xFF800000> : vector<40xf32>
    %118 = vector.multi_reduction <maximumf>, %117, %cst_48 [1] : vector<40x40xf32> to vector<40xf32>
    %119 = vector.shape_cast %118 : vector<40xf32> to vector<40x1xf32>
    %120 = vector.broadcast %119 : vector<40x1xf32> to vector<40x40xf32>
    %121 = arith.subf %117, %120 : vector<40x40xf32>
    %122 = math.exp %121 : vector<40x40xf32>
    %cst_49 = arith.constant dense<0.000000e+00> : vector<40xf32>
    %123 = vector.multi_reduction <add>, %122, %cst_49 [1] : vector<40x40xf32> to vector<40xf32>
    %124 = vector.shape_cast %123 : vector<40xf32> to vector<40x1xf32>
    %125 = tpu.reciprocal %124 {approx = true} : vector<40x1xf32> -> vector<40x1xf32>
    %126 = vector.broadcast %125 : vector<40x1xf32> to vector<40x40xf32>
    %127 = arith.mulf %122, %126 : vector<40x40xf32>
    %128 = arith.truncf %127 : vector<40x40xf32> to vector<40x40xbf16>
    %cst_50 = arith.constant dense<0.000000e+00> : vector<40x8xf32>
    %129 = tpu.matmul %128, %113, %cst_50 {dimension_numbers = #tpu.dot_dimension_numbers<[1], [0], [0], [1], [0, 0, 1, 1], [], []>} : vector<40x40xbf16>, vector<40x8xbf16>, vector<40x8xf32> -> vector<40x8xf32>
    %c0_51 = arith.constant 0 : index
    %c24 = arith.constant 24 : index
    %130 = vector.load %arg11[%c0_51, %c24] : memref<40x32xf32, #tpu.memory_space<vmem>>, vector<40x8xf32>
    tpu.vector_store %arg11[%c0_51, %c24], %129 {strides = array<i32>} : memref<40x32xf32, #tpu.memory_space<vmem>>, vector<40x8xf32>,
    %c0_52 = arith.constant 0 : index
    %c0_53 = arith.constant 0 : index
    %131 = vector.load %arg11[%c0_52, %c0_53] : memref<40x32xf32, #tpu.memory_space<vmem>>, vector<40x32xf32>
    %132 = arith.truncf %131 : vector<40x32xf32> to vector<40x32xbf16>
    %cst_54 = arith.constant dense<0.000000e+00> : vector<40x32xf32>
    %133 = tpu.matmul %132, %8, %cst_54 {dimension_numbers = #tpu.dot_dimension_numbers<[1], [0], [0], [1], [0, 0, 1, 1], [], []>} : vector<40x32xbf16>, vector<32x32xbf16>, vector<40x32xf32> -> vector<40x32xf32>
    %134 = vector.broadcast %20 : vector<1x32xf32> to vector<40x32xf32>
    %135 = arith.addf %133, %134 : vector<40x32xf32>
    %136 = arith.addf %0, %135 : vector<40x32xf32>
    %cst_55 = arith.constant dense<0.000000e+00> : vector<40xf32>
    %137 = vector.multi_reduction <add>, %136, %cst_55 [1] : vector<40x32xf32> to vector<40xf32>
    %138 = vector.shape_cast %137 : vector<40xf32> to vector<40x1xf32>
    %cst_56 = arith.constant 3.200000e+01 : f32
    %139 = vector.broadcast %cst_56 : f32 to vector<40x1xf32>
    %140 = arith.divf %138, %139 : vector<40x1xf32>
    %141 = vector.broadcast %140 : vector<40x1xf32> to vector<40x32xf32>
    %142 = arith.subf %136, %141 : vector<40x32xf32>
    %143 = arith.mulf %142, %142 : vector<40x32xf32>
    %cst_57 = arith.constant dense<0.000000e+00> : vector<40xf32>
    %144 = vector.multi_reduction <add>, %143, %cst_57 [1] : vector<40x32xf32> to vector<40xf32>
    %145 = vector.shape_cast %144 : vector<40xf32> to vector<40x1xf32>
    %cst_58 = arith.constant 3.200000e+01 : f32
    %146 = vector.broadcast %cst_58 : f32 to vector<40x1xf32>
    %147 = arith.divf %145, %146 : vector<40x1xf32>
    %148 = vector.broadcast %140 : vector<40x1xf32> to vector<40x32xf32>
    %149 = arith.subf %136, %148 : vector<40x32xf32>
    %cst_59 = arith.constant 9.99999974E-6 : f32
    %150 = vector.broadcast %cst_59 : f32 to vector<40x1xf32>
    %151 = arith.addf %147, %150 : vector<40x1xf32>
    %152 = math.rsqrt %151 : vector<40x1xf32>
    %153 = vector.broadcast %152 : vector<40x1xf32> to vector<40x32xf32>
    %154 = arith.mulf %149, %153 : vector<40x32xf32>
    %155 = vector.broadcast %22 : vector<1x32xf32> to vector<40x32xf32>
    %156 = arith.mulf %154, %155 : vector<40x32xf32>
    %157 = vector.broadcast %23 : vector<1x32xf32> to vector<40x32xf32>
    %158 = arith.addf %156, %157 : vector<40x32xf32>
    %159 = arith.truncf %158 : vector<40x32xf32> to vector<40x32xbf16>
    %cst_60 = arith.constant dense<0.000000e+00> : vector<40x64xf32>
    %160 = tpu.matmul %159, %10, %cst_60 {dimension_numbers = #tpu.dot_dimension_numbers<[1], [0], [0], [1], [0, 0, 1, 1], [], []>} : vector<40x32xbf16>, vector<32x64xbf16>, vector<40x64xf32> -> vector<40x64xf32>
    %161 = vector.broadcast %16 : vector<1x64xf32> to vector<40x64xf32>
    %162 = arith.addf %160, %161 : vector<40x64xf32>
    %cst_61 = arith.constant 0.000000e+00 : f32
    %163 = vector.broadcast %cst_61 : f32 to vector<40x64xf32>
    %164 = arith.maximumf %162, %163 : vector<40x64xf32>
    %165 = arith.truncf %164 : vector<40x64xf32> to vector<40x64xbf16>
    %cst_62 = arith.constant dense<0.000000e+00> : vector<40x32xf32>
    %166 = tpu.matmul %165, %12, %cst_62 {dimension_numbers = #tpu.dot_dimension_numbers<[1], [0], [0], [1], [0, 0, 1, 1], [], []>} : vector<40x64xbf16>, vector<64x32xbf16>, vector<40x32xf32> -> vector<40x32xf32>
    %167 = vector.broadcast %21 : vector<1x32xf32> to vector<40x32xf32>
    %168 = arith.addf %166, %167 : vector<40x32xf32>
    %169 = arith.addf %158, %168 : vector<40x32xf32>
    %cst_63 = arith.constant dense<0.000000e+00> : vector<40xf32>
    %170 = vector.multi_reduction <add>, %169, %cst_63 [1] : vector<40x32xf32> to vector<40xf32>
    %171 = vector.shape_cast %170 : vector<40xf32> to vector<40x1xf32>
    %cst_64 = arith.constant 3.200000e+01 : f32
    %172 = vector.broadcast %cst_64 : f32 to vector<40x1xf32>
    %173 = arith.divf %171, %172 : vector<40x1xf32>
    %174 = vector.broadcast %173 : vector<40x1xf32> to vector<40x32xf32>
    %175 = arith.subf %169, %174 : vector<40x32xf32>
    %176 = arith.mulf %175, %175 : vector<40x32xf32>
    %cst_65 = arith.constant dense<0.000000e+00> : vector<40xf32>
    %177 = vector.multi_reduction <add>, %176, %cst_65 [1] : vector<40x32xf32> to vector<40xf32>
    %178 = vector.shape_cast %177 : vector<40xf32> to vector<40x1xf32>
    %cst_66 = arith.constant 3.200000e+01 : f32
    %179 = vector.broadcast %cst_66 : f32 to vector<40x1xf32>
    %180 = arith.divf %178, %179 : vector<40x1xf32>
    %181 = vector.broadcast %173 : vector<40x1xf32> to vector<40x32xf32>
    %182 = arith.subf %169, %181 : vector<40x32xf32>
    %cst_67 = arith.constant 9.99999974E-6 : f32
    %183 = vector.broadcast %cst_67 : f32 to vector<40x1xf32>
    %184 = arith.addf %180, %183 : vector<40x1xf32>
    %185 = math.rsqrt %184 : vector<40x1xf32>
    %186 = vector.broadcast %185 : vector<40x1xf32> to vector<40x32xf32>
    %187 = arith.mulf %182, %186 : vector<40x32xf32>
    %188 = vector.broadcast %24 : vector<1x32xf32> to vector<40x32xf32>
    %189 = arith.mulf %187, %188 : vector<40x32xf32>
    %190 = vector.broadcast %25 : vector<1x32xf32> to vector<40x32xf32>
    %191 = arith.addf %189, %190 : vector<40x32xf32>
    %c1 = arith.constant 1 : index
    %c0_68 = arith.constant 0 : index
    %c0_69 = arith.constant 0 : index
    %192 = vector.load %arg3[%c1, %c0_68, %c0_69] : memref<2x32x64xbf16, #tpu.memory_space<vmem>>, vector<1x32x64xbf16>
    %193 = vector.shape_cast %192 : vector<1x32x64xbf16> to vector<32x64xbf16>
    %c1_70 = arith.constant 1 : index
    %c0_71 = arith.constant 0 : index
    %c0_72 = arith.constant 0 : index
    %194 = vector.load %arg4[%c1_70, %c0_71, %c0_72] : memref<2x32x32xbf16, #tpu.memory_space<vmem>>, vector<1x32x32xbf16>
    %195 = vector.shape_cast %194 : vector<1x32x32xbf16> to vector<32x32xbf16>
    %c1_73 = arith.constant 1 : index
    %c0_74 = arith.constant 0 : index
    %c0_75 = arith.constant 0 : index
    %196 = vector.load %arg5[%c1_73, %c0_74, %c0_75] : memref<2x32x32xbf16, #tpu.memory_space<vmem>>, vector<1x32x32xbf16>
    %197 = vector.shape_cast %196 : vector<1x32x32xbf16> to vector<32x32xbf16>
    %c1_76 = arith.constant 1 : index
    %c0_77 = arith.constant 0 : index
    %c0_78 = arith.constant 0 : index
    %198 = vector.load %arg6[%c1_76, %c0_77, %c0_78] : memref<2x32x64xbf16, #tpu.memory_space<vmem>>, vector<1x32x64xbf16>
    %199 = vector.shape_cast %198 : vector<1x32x64xbf16> to vector<32x64xbf16>
    %c1_79 = arith.constant 1 : index
    %c0_80 = arith.constant 0 : index
    %c0_81 = arith.constant 0 : index
    %200 = vector.load %arg7[%c1_79, %c0_80, %c0_81] : memref<2x64x32xbf16, #tpu.memory_space<vmem>>, vector<1x64x32xbf16>
    %201 = vector.shape_cast %200 : vector<1x64x32xbf16> to vector<64x32xbf16>
    %c1_82 = arith.constant 1 : index
    %c0_83 = arith.constant 0 : index
    %c0_84 = arith.constant 0 : index
    %202 = vector.load %arg8[%c1_82, %c0_83, %c0_84] : memref<2x9x32xf32, #tpu.memory_space<vmem>>, vector<1x9x32xf32>
    %203 = vector.shape_cast %202 : vector<1x9x32xf32> to vector<9x32xf32>
    %c1_85 = arith.constant 1 : index
    %c0_86 = arith.constant 0 : index
    %c0_87 = arith.constant 0 : index
    %204 = vector.load %arg9[%c1_85, %c0_86, %c0_87] : memref<2x1x64xf32, #tpu.memory_space<vmem>>, vector<1x1x64xf32>
    %205 = vector.shape_cast %204 : vector<1x1x64xf32> to vector<1x64xf32>
    %206 = vector.extract_strided_slice %203 {offsets = [0, 0], sizes = [1, 32], strides = [1, 1]} : vector<9x32xf32> to vector<1x32xf32>
    %207 = vector.extract_strided_slice %203 {offsets = [1, 0], sizes = [1, 32], strides = [1, 1]} : vector<9x32xf32> to vector<1x32xf32>
    %208 = vector.extract_strided_slice %203 {offsets = [2, 0], sizes = [1, 32], strides = [1, 1]} : vector<9x32xf32> to vector<1x32xf32>
    %209 = vector.extract_strided_slice %203 {offsets = [3, 0], sizes = [1, 32], strides = [1, 1]} : vector<9x32xf32> to vector<1x32xf32>
    %210 = vector.extract_strided_slice %203 {offsets = [4, 0], sizes = [1, 32], strides = [1, 1]} : vector<9x32xf32> to vector<1x32xf32>
    %211 = vector.extract_strided_slice %203 {offsets = [5, 0], sizes = [1, 32], strides = [1, 1]} : vector<9x32xf32> to vector<1x32xf32>
    %212 = vector.extract_strided_slice %203 {offsets = [6, 0], sizes = [1, 32], strides = [1, 1]} : vector<9x32xf32> to vector<1x32xf32>
    %213 = vector.extract_strided_slice %203 {offsets = [7, 0], sizes = [1, 32], strides = [1, 1]} : vector<9x32xf32> to vector<1x32xf32>
    %214 = vector.extract_strided_slice %203 {offsets = [8, 0], sizes = [1, 32], strides = [1, 1]} : vector<9x32xf32> to vector<1x32xf32>
    %215 = arith.addf %191, %1 : vector<40x32xf32>
    %216 = arith.truncf %215 : vector<40x32xf32> to vector<40x32xbf16>
    %cst_88 = arith.constant dense<0.000000e+00> : vector<40x64xf32>
    %217 = tpu.matmul %216, %193, %cst_88 {dimension_numbers = #tpu.dot_dimension_numbers<[1], [0], [0], [1], [0, 0, 1, 1], [], []>} : vector<40x32xbf16>, vector<32x64xbf16>, vector<40x64xf32> -> vector<40x64xf32>
    %218 = vector.extract_strided_slice %217 {offsets = [0, 0], sizes = [40, 32], strides = [1, 1]} : vector<40x64xf32> to vector<40x32xf32>
    %219 = vector.broadcast %206 : vector<1x32xf32> to vector<40x32xf32>
    %220 = arith.addf %218, %219 : vector<40x32xf32>
    %221 = vector.extract_strided_slice %217 {offsets = [0, 32], sizes = [40, 32], strides = [1, 1]} : vector<40x64xf32> to vector<40x32xf32>
    %222 = vector.broadcast %207 : vector<1x32xf32> to vector<40x32xf32>
    %223 = arith.addf %221, %222 : vector<40x32xf32>
    %224 = arith.truncf %191 : vector<40x32xf32> to vector<40x32xbf16>
    %cst_89 = arith.constant dense<0.000000e+00> : vector<40x32xf32>
    %225 = tpu.matmul %224, %195, %cst_89 {dimension_numbers = #tpu.dot_dimension_numbers<[1], [0], [0], [1], [0, 0, 1, 1], [], []>} : vector<40x32xbf16>, vector<32x32xbf16>, vector<40x32xf32> -> vector<40x32xf32>
    %226 = vector.broadcast %208 : vector<1x32xf32> to vector<40x32xf32>
    %227 = arith.addf %225, %226 : vector<40x32xf32>
    %228 = vector.extract_strided_slice %220 {offsets = [0, 0], sizes = [40, 8], strides = [1, 1]} : vector<40x32xf32> to vector<40x8xf32>
    %229 = arith.truncf %228 : vector<40x8xf32> to vector<40x8xbf16>
    %230 = vector.extract_strided_slice %223 {offsets = [0, 0], sizes = [40, 8], strides = [1, 1]} : vector<40x32xf32> to vector<40x8xf32>
    %231 = arith.truncf %230 : vector<40x8xf32> to vector<40x8xbf16>
    %232 = vector.extract_strided_slice %227 {offsets = [0, 0], sizes = [40, 8], strides = [1, 1]} : vector<40x32xf32> to vector<40x8xf32>
    %233 = arith.truncf %232 : vector<40x8xf32> to vector<40x8xbf16>
    %cst_90 = arith.constant dense<0.000000e+00> : vector<40x40xf32>
    %234 = tpu.matmul %229, %231, %cst_90 {dimension_numbers = #tpu.dot_dimension_numbers<[1], [1], [0], [0], [0, 0, 1, 0], [], []>} : vector<40x8xbf16>, vector<40x8xbf16>, vector<40x40xf32> -> vector<40x40xf32>
    %cst_91 = arith.constant 0.353553385 : f32
    %235 = vector.broadcast %cst_91 : f32 to vector<40x40xf32>
    %236 = arith.mulf %234, %235 : vector<40x40xf32>
    %237 = arith.addf %236, %2 : vector<40x40xf32>
    %cst_92 = arith.constant dense<0xFF800000> : vector<40xf32>
    %238 = vector.multi_reduction <maximumf>, %237, %cst_92 [1] : vector<40x40xf32> to vector<40xf32>
    %239 = vector.shape_cast %238 : vector<40xf32> to vector<40x1xf32>
    %240 = vector.broadcast %239 : vector<40x1xf32> to vector<40x40xf32>
    %241 = arith.subf %237, %240 : vector<40x40xf32>
    %242 = math.exp %241 : vector<40x40xf32>
    %cst_93 = arith.constant dense<0.000000e+00> : vector<40xf32>
    %243 = vector.multi_reduction <add>, %242, %cst_93 [1] : vector<40x40xf32> to vector<40xf32>
    %244 = vector.shape_cast %243 : vector<40xf32> to vector<40x1xf32>
    %245 = tpu.reciprocal %244 {approx = true} : vector<40x1xf32> -> vector<40x1xf32>
    %246 = vector.broadcast %245 : vector<40x1xf32> to vector<40x40xf32>
    %247 = arith.mulf %242, %246 : vector<40x40xf32>
    %248 = arith.truncf %247 : vector<40x40xf32> to vector<40x40xbf16>
    %cst_94 = arith.constant dense<0.000000e+00> : vector<40x8xf32>
    %249 = tpu.matmul %248, %233, %cst_94 {dimension_numbers = #tpu.dot_dimension_numbers<[1], [0], [0], [1], [0, 0, 1, 1], [], []>} : vector<40x40xbf16>, vector<40x8xbf16>, vector<40x8xf32> -> vector<40x8xf32>
    %c0_95 = arith.constant 0 : index
    %c0_96 = arith.constant 0 : index
    %250 = vector.load %arg11[%c0_95, %c0_96] : memref<40x32xf32, #tpu.memory_space<vmem>>, vector<40x8xf32>
    tpu.vector_store %arg11[%c0_95, %c0_96], %249 {strides = array<i32>} : memref<40x32xf32, #tpu.memory_space<vmem>>, vector<40x8xf32>,
    %251 = vector.extract_strided_slice %220 {offsets = [0, 8], sizes = [40, 8], strides = [1, 1]} : vector<40x32xf32> to vector<40x8xf32>
    %252 = arith.truncf %251 : vector<40x8xf32> to vector<40x8xbf16>
    %253 = vector.extract_strided_slice %223 {offsets = [0, 8], sizes = [40, 8], strides = [1, 1]} : vector<40x32xf32> to vector<40x8xf32>
    %254 = arith.truncf %253 : vector<40x8xf32> to vector<40x8xbf16>
    %255 = vector.extract_strided_slice %227 {offsets = [0, 8], sizes = [40, 8], strides = [1, 1]} : vector<40x32xf32> to vector<40x8xf32>
    %256 = arith.truncf %255 : vector<40x8xf32> to vector<40x8xbf16>
    %cst_97 = arith.constant dense<0.000000e+00> : vector<40x40xf32>
    %257 = tpu.matmul %252, %254, %cst_97 {dimension_numbers = #tpu.dot_dimension_numbers<[1], [1], [0], [0], [0, 0, 1, 0], [], []>} : vector<40x8xbf16>, vector<40x8xbf16>, vector<40x40xf32> -> vector<40x40xf32>
    %cst_98 = arith.constant 0.353553385 : f32
    %258 = vector.broadcast %cst_98 : f32 to vector<40x40xf32>
    %259 = arith.mulf %257, %258 : vector<40x40xf32>
    %260 = arith.addf %259, %2 : vector<40x40xf32>
    %cst_99 = arith.constant dense<0xFF800000> : vector<40xf32>
    %261 = vector.multi_reduction <maximumf>, %260, %cst_99 [1] : vector<40x40xf32> to vector<40xf32>
    %262 = vector.shape_cast %261 : vector<40xf32> to vector<40x1xf32>
    %263 = vector.broadcast %262 : vector<40x1xf32> to vector<40x40xf32>
    %264 = arith.subf %260, %263 : vector<40x40xf32>
    %265 = math.exp %264 : vector<40x40xf32>
    %cst_100 = arith.constant dense<0.000000e+00> : vector<40xf32>
    %266 = vector.multi_reduction <add>, %265, %cst_100 [1] : vector<40x40xf32> to vector<40xf32>
    %267 = vector.shape_cast %266 : vector<40xf32> to vector<40x1xf32>
    %268 = tpu.reciprocal %267 {approx = true} : vector<40x1xf32> -> vector<40x1xf32>
    %269 = vector.broadcast %268 : vector<40x1xf32> to vector<40x40xf32>
    %270 = arith.mulf %265, %269 : vector<40x40xf32>
    %271 = arith.truncf %270 : vector<40x40xf32> to vector<40x40xbf16>
    %cst_101 = arith.constant dense<0.000000e+00> : vector<40x8xf32>
    %272 = tpu.matmul %271, %256, %cst_101 {dimension_numbers = #tpu.dot_dimension_numbers<[1], [0], [0], [1], [0, 0, 1, 1], [], []>} : vector<40x40xbf16>, vector<40x8xbf16>, vector<40x8xf32> -> vector<40x8xf32>
    %c0_102 = arith.constant 0 : index
    %c8_103 = arith.constant 8 : index
    %273 = vector.load %arg11[%c0_102, %c8_103] : memref<40x32xf32, #tpu.memory_space<vmem>>, vector<40x8xf32>
    tpu.vector_store %arg11[%c0_102, %c8_103], %272 {strides = array<i32>} : memref<40x32xf32, #tpu.memory_space<vmem>>, vector<40x8xf32>,
    %274 = vector.extract_strided_slice %220 {offsets = [0, 16], sizes = [40, 8], strides = [1, 1]} : vector<40x32xf32> to vector<40x8xf32>
    %275 = arith.truncf %274 : vector<40x8xf32> to vector<40x8xbf16>
    %276 = vector.extract_strided_slice %223 {offsets = [0, 16], sizes = [40, 8], strides = [1, 1]} : vector<40x32xf32> to vector<40x8xf32>
    %277 = arith.truncf %276 : vector<40x8xf32> to vector<40x8xbf16>
    %278 = vector.extract_strided_slice %227 {offsets = [0, 16], sizes = [40, 8], strides = [1, 1]} : vector<40x32xf32> to vector<40x8xf32>
    %279 = arith.truncf %278 : vector<40x8xf32> to vector<40x8xbf16>
    %cst_104 = arith.constant dense<0.000000e+00> : vector<40x40xf32>
    %280 = tpu.matmul %275, %277, %cst_104 {dimension_numbers = #tpu.dot_dimension_numbers<[1], [1], [0], [0], [0, 0, 1, 0], [], []>} : vector<40x8xbf16>, vector<40x8xbf16>, vector<40x40xf32> -> vector<40x40xf32>
    %cst_105 = arith.constant 0.353553385 : f32
    %281 = vector.broadcast %cst_105 : f32 to vector<40x40xf32>
    %282 = arith.mulf %280, %281 : vector<40x40xf32>
    %283 = arith.addf %282, %2 : vector<40x40xf32>
    %cst_106 = arith.constant dense<0xFF800000> : vector<40xf32>
    %284 = vector.multi_reduction <maximumf>, %283, %cst_106 [1] : vector<40x40xf32> to vector<40xf32>
    %285 = vector.shape_cast %284 : vector<40xf32> to vector<40x1xf32>
    %286 = vector.broadcast %285 : vector<40x1xf32> to vector<40x40xf32>
    %287 = arith.subf %283, %286 : vector<40x40xf32>
    %288 = math.exp %287 : vector<40x40xf32>
    %cst_107 = arith.constant dense<0.000000e+00> : vector<40xf32>
    %289 = vector.multi_reduction <add>, %288, %cst_107 [1] : vector<40x40xf32> to vector<40xf32>
    %290 = vector.shape_cast %289 : vector<40xf32> to vector<40x1xf32>
    %291 = tpu.reciprocal %290 {approx = true} : vector<40x1xf32> -> vector<40x1xf32>
    %292 = vector.broadcast %291 : vector<40x1xf32> to vector<40x40xf32>
    %293 = arith.mulf %288, %292 : vector<40x40xf32>
    %294 = arith.truncf %293 : vector<40x40xf32> to vector<40x40xbf16>
    %cst_108 = arith.constant dense<0.000000e+00> : vector<40x8xf32>
    %295 = tpu.matmul %294, %279, %cst_108 {dimension_numbers = #tpu.dot_dimension_numbers<[1], [0], [0], [1], [0, 0, 1, 1], [], []>} : vector<40x40xbf16>, vector<40x8xbf16>, vector<40x8xf32> -> vector<40x8xf32>
    %c0_109 = arith.constant 0 : index
    %c16_110 = arith.constant 16 : index
    %296 = vector.load %arg11[%c0_109, %c16_110] : memref<40x32xf32, #tpu.memory_space<vmem>>, vector<40x8xf32>
    tpu.vector_store %arg11[%c0_109, %c16_110], %295 {strides = array<i32>} : memref<40x32xf32, #tpu.memory_space<vmem>>, vector<40x8xf32>,
    %297 = vector.extract_strided_slice %220 {offsets = [0, 24], sizes = [40, 8], strides = [1, 1]} : vector<40x32xf32> to vector<40x8xf32>
    %298 = arith.truncf %297 : vector<40x8xf32> to vector<40x8xbf16>
    %299 = vector.extract_strided_slice %223 {offsets = [0, 24], sizes = [40, 8], strides = [1, 1]} : vector<40x32xf32> to vector<40x8xf32>
    %300 = arith.truncf %299 : vector<40x8xf32> to vector<40x8xbf16>
    %301 = vector.extract_strided_slice %227 {offsets = [0, 24], sizes = [40, 8], strides = [1, 1]} : vector<40x32xf32> to vector<40x8xf32>
    %302 = arith.truncf %301 : vector<40x8xf32> to vector<40x8xbf16>
    %cst_111 = arith.constant dense<0.000000e+00> : vector<40x40xf32>
    %303 = tpu.matmul %298, %300, %cst_111 {dimension_numbers = #tpu.dot_dimension_numbers<[1], [1], [0], [0], [0, 0, 1, 0], [], []>} : vector<40x8xbf16>, vector<40x8xbf16>, vector<40x40xf32> -> vector<40x40xf32>
    %cst_112 = arith.constant 0.353553385 : f32
    %304 = vector.broadcast %cst_112 : f32 to vector<40x40xf32>
    %305 = arith.mulf %303, %304 : vector<40x40xf32>
    %306 = arith.addf %305, %2 : vector<40x40xf32>
    %cst_113 = arith.constant dense<0xFF800000> : vector<40xf32>
    %307 = vector.multi_reduction <maximumf>, %306, %cst_113 [1] : vector<40x40xf32> to vector<40xf32>
    %308 = vector.shape_cast %307 : vector<40xf32> to vector<40x1xf32>
    %309 = vector.broadcast %308 : vector<40x1xf32> to vector<40x40xf32>
    %310 = arith.subf %306, %309 : vector<40x40xf32>
    %311 = math.exp %310 : vector<40x40xf32>
    %cst_114 = arith.constant dense<0.000000e+00> : vector<40xf32>
    %312 = vector.multi_reduction <add>, %311, %cst_114 [1] : vector<40x40xf32> to vector<40xf32>
    %313 = vector.shape_cast %312 : vector<40xf32> to vector<40x1xf32>
    %314 = tpu.reciprocal %313 {approx = true} : vector<40x1xf32> -> vector<40x1xf32>
    %315 = vector.broadcast %314 : vector<40x1xf32> to vector<40x40xf32>
    %316 = arith.mulf %311, %315 : vector<40x40xf32>
    %317 = arith.truncf %316 : vector<40x40xf32> to vector<40x40xbf16>
    %cst_115 = arith.constant dense<0.000000e+00> : vector<40x8xf32>
    %318 = tpu.matmul %317, %302, %cst_115 {dimension_numbers = #tpu.dot_dimension_numbers<[1], [0], [0], [1], [0, 0, 1, 1], [], []>} : vector<40x40xbf16>, vector<40x8xbf16>, vector<40x8xf32> -> vector<40x8xf32>
    %c0_116 = arith.constant 0 : index
    %c24_117 = arith.constant 24 : index
    %319 = vector.load %arg11[%c0_116, %c24_117] : memref<40x32xf32, #tpu.memory_space<vmem>>, vector<40x8xf32>
    tpu.vector_store %arg11[%c0_116, %c24_117], %318 {strides = array<i32>} : memref<40x32xf32, #tpu.memory_space<vmem>>, vector<40x8xf32>,
    %c0_118 = arith.constant 0 : index
    %c0_119 = arith.constant 0 : index
    %320 = vector.load %arg11[%c0_118, %c0_119] : memref<40x32xf32, #tpu.memory_space<vmem>>, vector<40x32xf32>
    %321 = arith.truncf %320 : vector<40x32xf32> to vector<40x32xbf16>
    %cst_120 = arith.constant dense<0.000000e+00> : vector<40x32xf32>
    %322 = tpu.matmul %321, %197, %cst_120 {dimension_numbers = #tpu.dot_dimension_numbers<[1], [0], [0], [1], [0, 0, 1, 1], [], []>} : vector<40x32xbf16>, vector<32x32xbf16>, vector<40x32xf32> -> vector<40x32xf32>
    %323 = vector.broadcast %209 : vector<1x32xf32> to vector<40x32xf32>
    %324 = arith.addf %322, %323 : vector<40x32xf32>
    %325 = arith.addf %191, %324 : vector<40x32xf32>
    %cst_121 = arith.constant dense<0.000000e+00> : vector<40xf32>
    %326 = vector.multi_reduction <add>, %325, %cst_121 [1] : vector<40x32xf32> to vector<40xf32>
    %327 = vector.shape_cast %326 : vector<40xf32> to vector<40x1xf32>
    %cst_122 = arith.constant 3.200000e+01 : f32
    %328 = vector.broadcast %cst_122 : f32 to vector<40x1xf32>
    %329 = arith.divf %327, %328 : vector<40x1xf32>
    %330 = vector.broadcast %329 : vector<40x1xf32> to vector<40x32xf32>
    %331 = arith.subf %325, %330 : vector<40x32xf32>
    %332 = arith.mulf %331, %331 : vector<40x32xf32>
    %cst_123 = arith.constant dense<0.000000e+00> : vector<40xf32>
    %333 = vector.multi_reduction <add>, %332, %cst_123 [1] : vector<40x32xf32> to vector<40xf32>
    %334 = vector.shape_cast %333 : vector<40xf32> to vector<40x1xf32>
    %cst_124 = arith.constant 3.200000e+01 : f32
    %335 = vector.broadcast %cst_124 : f32 to vector<40x1xf32>
    %336 = arith.divf %334, %335 : vector<40x1xf32>
    %337 = vector.broadcast %329 : vector<40x1xf32> to vector<40x32xf32>
    %338 = arith.subf %325, %337 : vector<40x32xf32>
    %cst_125 = arith.constant 9.99999974E-6 : f32
    %339 = vector.broadcast %cst_125 : f32 to vector<40x1xf32>
    %340 = arith.addf %336, %339 : vector<40x1xf32>
    %341 = math.rsqrt %340 : vector<40x1xf32>
    %342 = vector.broadcast %341 : vector<40x1xf32> to vector<40x32xf32>
    %343 = arith.mulf %338, %342 : vector<40x32xf32>
    %344 = vector.broadcast %211 : vector<1x32xf32> to vector<40x32xf32>
    %345 = arith.mulf %343, %344 : vector<40x32xf32>
    %346 = vector.broadcast %212 : vector<1x32xf32> to vector<40x32xf32>
    %347 = arith.addf %345, %346 : vector<40x32xf32>
    %348 = arith.truncf %347 : vector<40x32xf32> to vector<40x32xbf16>
    %cst_126 = arith.constant dense<0.000000e+00> : vector<40x64xf32>
    %349 = tpu.matmul %348, %199, %cst_126 {dimension_numbers = #tpu.dot_dimension_numbers<[1], [0], [0], [1], [0, 0, 1, 1], [], []>} : vector<40x32xbf16>, vector<32x64xbf16>, vector<40x64xf32> -> vector<40x64xf32>
    %350 = vector.broadcast %205 : vector<1x64xf32> to vector<40x64xf32>
    %351 = arith.addf %349, %350 : vector<40x64xf32>
    %cst_127 = arith.constant 0.000000e+00 : f32
    %352 = vector.broadcast %cst_127 : f32 to vector<40x64xf32>
    %353 = arith.maximumf %351, %352 : vector<40x64xf32>
    %354 = arith.truncf %353 : vector<40x64xf32> to vector<40x64xbf16>
    %cst_128 = arith.constant dense<0.000000e+00> : vector<40x32xf32>
    %355 = tpu.matmul %354, %201, %cst_128 {dimension_numbers = #tpu.dot_dimension_numbers<[1], [0], [0], [1], [0, 0, 1, 1], [], []>} : vector<40x64xbf16>, vector<64x32xbf16>, vector<40x32xf32> -> vector<40x32xf32>
    %356 = vector.broadcast %210 : vector<1x32xf32> to vector<40x32xf32>
    %357 = arith.addf %355, %356 : vector<40x32xf32>
    %358 = arith.addf %347, %357 : vector<40x32xf32>
    %cst_129 = arith.constant dense<0.000000e+00> : vector<40xf32>
    %359 = vector.multi_reduction <add>, %358, %cst_129 [1] : vector<40x32xf32> to vector<40xf32>
    %360 = vector.shape_cast %359 : vector<40xf32> to vector<40x1xf32>
    %cst_130 = arith.constant 3.200000e+01 : f32
    %361 = vector.broadcast %cst_130 : f32 to vector<40x1xf32>
    %362 = arith.divf %360, %361 : vector<40x1xf32>
    %363 = vector.broadcast %362 : vector<40x1xf32> to vector<40x32xf32>
    %364 = arith.subf %358, %363 : vector<40x32xf32>
    %365 = arith.mulf %364, %364 : vector<40x32xf32>
    %cst_131 = arith.constant dense<0.000000e+00> : vector<40xf32>
    %366 = vector.multi_reduction <add>, %365, %cst_131 [1] : vector<40x32xf32> to vector<40xf32>
    %367 = vector.shape_cast %366 : vector<40xf32> to vector<40x1xf32>
    %cst_132 = arith.constant 3.200000e+01 : f32
    %368 = vector.broadcast %cst_132 : f32 to vector<40x1xf32>
    %369 = arith.divf %367, %368 : vector<40x1xf32>
    %370 = vector.broadcast %362 : vector<40x1xf32> to vector<40x32xf32>
    %371 = arith.subf %358, %370 : vector<40x32xf32>
    %cst_133 = arith.constant 9.99999974E-6 : f32
    %372 = vector.broadcast %cst_133 : f32 to vector<40x1xf32>
    %373 = arith.addf %369, %372 : vector<40x1xf32>
    %374 = math.rsqrt %373 : vector<40x1xf32>
    %375 = vector.broadcast %374 : vector<40x1xf32> to vector<40x32xf32>
    %376 = arith.mulf %371, %375 : vector<40x32xf32>
    %377 = vector.broadcast %213 : vector<1x32xf32> to vector<40x32xf32>
    %378 = arith.mulf %376, %377 : vector<40x32xf32>
    %379 = vector.broadcast %214 : vector<1x32xf32> to vector<40x32xf32>
    %380 = arith.addf %378, %379 : vector<40x32xf32>
    %c0_134 = arith.constant 0 : index
    %c0_135 = arith.constant 0 : index
    %381 = vector.load %arg10[%c0_134, %c0_135] : memref<40x32xf32, #tpu.memory_space<vmem>>, vector<40x32xf32>
    tpu.vector_store %arg10[%c0_134, %c0_135], %380 {strides = array<i32>} : memref<40x32xf32, #tpu.memory_space<vmem>>, vector<40x32xf32>,
    return
  }
}

</mosaic_0001>

<bundles_post_ra>
// kernel: tpu_custom_call.1
= control target key start
LH: loop header
LB: loop body
LE: loop exit
PB: predicated region body
PF: predicated region fallthrough
CT: control target
= control target key end

     0   :  { %v164_v0 = vlaneseq  ;;  %v4417_v1 = vmov 0.0   ;;  %vm4418_vm0 = vmmov 0   ;;  %vm98_vm1 = vcmask 261120   ;;  %s4419_s15 = smov 32   ;;  %s4420_s24 = smov 96   ;;  %s5904_s3 = inlined_call_operand.vmem [shape: bf16[2,32,64], index: 3, kind: input, shape index: {}]   ;;  %s5905_s0 = inlined_call_operand.vmem [shape: f32[40,32], index: 0, kind: input, shape index: {}]   ;;  %s5906_s1 = inlined_call_operand.vmem [shape: f32[40,32], index: 1, kind: input, shape index: {}]   ;;  %s5907_s8 = inlined_call_operand.vmem [shape: f32[2,9,32], index: 8, kind: input, shape index: {}]   ;;  %s5908_s4 = inlined_call_operand.vmem [shape: bf16[2,32,32], index: 4, kind: input, shape index: {}]   ;;  %s5909_s2 = inlined_call_operand.vmem [shape: f32[40,40], index: 2, kind: input, shape index: {}]   ;;  %s5910_s5 = inlined_call_operand.vmem [shape: bf16[2,32,32], index: 5, kind: input, shape index: {}]   ;;  %s5911_s6 = inlined_call_operand.vmem [shape: bf16[2,32,64], index: 6, kind: input, shape index: {}]   ;;  %s5912_s7 = inlined_call_operand.vmem [shape: bf16[2,64,32], index: 7, kind: input, shape index: {}]   ;;  %s5913_s9 = inlined_call_operand.vmem [shape: f32[2,1,64], index: 9, kind: input, shape index: {}]   ;;  %s5914_s10 = inlined_call_operand.vmem [shape: f32[40,32], index: 10, kind: output, shape index: {}]  }
   0x1   :  { %3707 = vmatprep.subr.bf16.mxu0 %v4417_v1  ;;  %v4176_v2 = vld [vmem:[%s5904_s3 + $0x8] sm:$0xff]   ;;  %3711 = vmatprep.mubr.msk.bf16.mxu0 %vm4418_vm0, %v4417_v1  ;;  %v4177_v3 = vld [vmem:[%s5904_s3] sm:$0xff]   ;;  %v38_v12 = vld [vmem:[%s5905_s0 + $0x10] sm:$0xff]  ;;  %s4421_s25 = smov 88   ;;  %s4422_s26 = smov 120   ;;  %vm288_vm2 = vcmask 64512  }
   0x2   :  { %v4494_v4 = vshrl.u32 %v164_v0, 7  ;;  %3723 = vmatprep.subr.bf16.mxu1 %v4417_v1  ;;  %3727 = vmatprep.mubr.msk.bf16.mxu1 %vm4418_vm0, %v4417_v1  ;;  %v36_v5 = vld [vmem:[%s5905_s0] sm:$0xff]  ;;  %v37_v6 = vld [vmem:[%s5905_s0 + $0x8] sm:$0xff]  ;;  %v39_v13 = vld [vmem:[%s5905_s0 + $0x18] sm:$0xff]  ;;  %s4423_s27 = smov 80   ;;  %s4424_s28 = smov 112  }
   0x3   :  { %3708 = vmatpush3.bf16.msra.mxu0 %v4176_v2  ;;  %v41_v7 = vld [vmem:[%s5906_s1] sm:$0xff]  ;;  %v42_v8 = vld [vmem:[%s5906_s1 + $0x8] sm:$0xff]  ;;  %v43_v16 = vld [vmem:[%s5906_s1 + $0x10] sm:$0xff]  ;;  %v186_v28 = vpack.c.bf16 %v37_v6, %v36_v5  ;;  %v187_v29 = vpack.c.bf16 %v39_v13, %v38_v12  ;;  %s4425_s29 = smov 72   ;;  %s4426_s30 = smov 104   ;;  %vm441_vm3 = vcmask 1043456  }
   0x4   :  { %3709 = vmatprep.subr.bf16.mxu0 %v4417_v1  ;;  %v78_v9 = vadd.f32 %v41_v7, %v36_v5  ;;  %v175_v10 = vsub.s32 1, %v4494_v4  ;;  %v79_v11 = vadd.f32 %v42_v8, %v37_v6  ;;  %v4522_v14 = vld [vmem:[%s5907_s8] sm:$0xff]  ;;  %v44_v17 = vld [vmem:[%s5906_s1 + $0x18] sm:$0xff]  ;;  %v80_v19 = vadd.f32 %v43_v16, %v38_v12  ;;  %v4178_v26 = vld [vmem:[%s5908_s4 + $0x8] sm:$0xff]   ;;  %s4427_s22 = smov 8   ;;  %s4428_s12 = smov 16  }
   0x5   :  { %v81_v20 = vadd.f32 %v44_v17, %v39_v13  ;;  %v40_v22 = vld [vmem:[%s5905_s0 + $0x20] sm:$0xff]  ;;  %3724 = vmatpush3.bf16.msra.mxu1 %v4178_v26  ;;  %v166_v45 = vsub.s32 0, %v4494_v4  ;;  %v191_v8 = vsub.s32 2, %v4494_v4  ;;  %vm373_vm4 = vcmask 326656   ;;  %s4429_s16 = smov 24  }
   0x6   :  { %v83_v15 = vpack.c.bf16 %v79_v11, %v78_v9  ;;  %v176_v18 = vrot.slane %v4522_v14, %v175_v10  ;;  %v45_v23 = vld [vmem:[%s5906_s1 + $0x20] sm:$0xff]  ;;  %3725 = vmatprep.subr.bf16.mxu1 %v4417_v1  ;;  %v188_v30 = vpack.c.bf16 %v40_v22, %v40_v22  ;;  %vm762_vm5 = vcmask 130112  }
   0x7   :  { %3710 = vmatpush3.bf16.msra.mxu0 %v4177_v3  ;;  %v84_v21 = vpack.c.bf16 %v81_v20, %v80_v19  ;;  %v82_v24 = vadd.f32 %v45_v23, %v40_v22  ;;  %v4179_v27 = vld [vmem:[%s5908_s4] sm:$0xff]   ;;  %v167_v52 = vrot.slane %v4522_v14, %v166_v45  ;;  %v192_v13 = vrot.slane %v4522_v14, %v191_v8 }
   0x8   :  { %3739 = vmatprep.subr.bf16.mxu0 %v4417_v1  ;;  %178 = vrot.lane.b32.xlu0 %v176_v18, %s4419_s15  ;;  %vm1018_vm6 = vcmask 195712   ;;  %vm1274_vm7 = vcmask 261312   ;;  %vm1580_vm8 = vcmask 523264  }
   0x9   :  { %v85_v25 = vpack.c.bf16 %v82_v24, %v82_v24  ;;  %3726 = vmatpush3.bf16.msra.mxu1 %v4179_v27 }
   0xa   :  { %3712 = vmatmul.mubr.msk.bf16.vlgmr.msra.gmra.mxu0 %vm98_vm1, %v83_v15  ;;  %3757 = vmatprep.subr.bf16.mxu1 %v4417_v1 }
   0xb   :  { %3715 = vmatprep.mubr.msk.bf16.mxu0 %vm4418_vm0, %v4417_v1 }
   0xc   :  { %3728 = vmatmul.mubr.msk.bf16.vlgmr.msra.gmra.mxu1 %vm98_vm1, %v186_v28 }
   0xd   :  { %3731 = vmatprep.mubr.msk.bf16.mxu1 %vm4418_vm0, %v4417_v1 }
  0x12   :  { %3716 = vmatmul.mubr.msk.bf16.gmra.mxu0 %vm98_vm1, %v84_v21 }
  0x13   :  { %3719 = vmatprep.mubr.msk.bf16.mxu0 %vm4418_vm0, %v4417_v1 }
  0x14   :  { %3732 = vmatmul.mubr.msk.bf16.gmra.mxu1 %vm98_vm1, %v187_v29 }
  0x15   :  { %3735 = vmatprep.mubr.msk.bf16.mxu1 %vm4418_vm0, %v4417_v1 }
  0x1a   :  { %3720 = vmatmul.mubr.msk.bf16.gmra.mxu0 %vm98_vm1, %v85_v25 }
  0x1b   :  { %3745 = vmatprep.mubr.msk.bf16.mxu0 %vm4418_vm0, %v4417_v1 }
  0x1c   :  { %3736 = vmatmul.mubr.msk.bf16.gmra.mxu1 %vm98_vm1, %v188_v30 }
  0x1d   :  { %3763 = vmatprep.mubr.msk.bf16.mxu1 %vm4418_vm0, %v4417_v1 }
  0x7a   :  { %v179_v37 = vpop.permute.xlu0 %178 }
  0xca   :  { %v142_v31 = vpop.f32.mrf.mxu0 }
  0xcb   :  { %v181_v46 = vadd.f32 %v179_v37, %v142_v31  ;;  %v168_v55 = vadd.f32 %v167_v52, %v142_v31 }
  0xcc   :  { %v3713_v32 = vpop.f32.mrf.mxu0  ;;  %v248_v62 = vpop.f32.mrf.mxu1 }
  0xcd   :  { %v249_v14 = vadd.f32 %v248_v62, %v192_v13 }
  0xce   :  { %v145_v33 = vpop.f32.mrf.mxu0  ;;  %v3729_v63 = vpop.f32.mrf.mxu1 }
  0xcf   :  { %v182_v42 = vadd.f32 %v179_v37, %v145_v33  ;;  %v169_v54 = vadd.f32 %v167_v52, %v145_v33 }
  0xd0   :  { %v3714_v34 = vpop.f32.mrf.mxu0  ;;  %v251_v3 = vpop.f32.mrf.mxu1 }
  0xd1   :  { %v273_v49 = vpack.c.bf16 %v182_v42, %v181_v46  ;;  %v4576_v56 = vpack.c.bf16 %v169_v54, %v168_v55  ;;  %v252_v26 = vadd.f32 %v251_v3, %v192_v13 }
  0xd2   :  { %v150_v35 = vpop.f32.mrf.mxu0  ;;  %v3730_v5 = vpop.f32.mrf.mxu1 }
  0xd3   :  { %v183_v39 = vadd.f32 %v179_v37, %v150_v35  ;;  %v170_v58 = vadd.f32 %v167_v52, %v150_v35  ;;  %v4626_v30 = vpack.c.bf16 %v252_v26, %v249_v14 }
  0xd4   :  { %v3717_v36 = vpop.f32.mrf.mxu0  ;;  %v256_v6 = vpop.f32.mrf.mxu1 }
  0xd5   :  { %v257_v19 = vadd.f32 %v256_v6, %v192_v13 }
  0xd6   :  { %v153_v38 = vpop.f32.mrf.mxu0  ;;  %v3733_v9 = vpop.f32.mrf.mxu1 }
  0xd7   :  { %v184_v40 = vadd.f32 %v179_v37, %v153_v38  ;;  %v171_v57 = vadd.f32 %v167_v52, %v153_v38  ;;  %v4710_v9 = vld [vmem:[%s5909_s2 + $0x10] sm:$0xff] }
  0xd8   :  { %v3718_v41 = vpop.f32.mrf.mxu0  ;;  %v259_v12 = vpop.f32.mrf.mxu1 }
  0xd9   :  { %v274_v43 = vpack.c.bf16 %v184_v40, %v183_v39  ;;  %v4581_v59 = vpack.c.bf16 %v171_v57, %v170_v58  ;;  %v260_v20 = vadd.f32 %v259_v12, %v192_v13 }
  0xda   :  { %v158_v44 = vpop.f32.mrf.mxu0  ;;  %v3734_v15 = vpop.f32.mrf.mxu1 }
  0xdb   :  { %v185_v47 = vadd.f32 %v179_v37, %v158_v44  ;;  %284 = vrot.lane.b32.xlu1 %v274_v43, %s4420_s24  ;;  %v172_v60 = vadd.f32 %v167_v52, %v158_v44  ;;  %v4623_v27 = vpack.c.bf16 %v260_v20, %v257_v19 }
  0xdc   :  { %v3721_v48 = vpop.f32.mrf.mxu0  ;;  %v264_v16 = vpop.f32.mrf.mxu1 }
  0xdd   :  { %v275_v50 = vpack.c.bf16 %v185_v47, %v185_v47  ;;  %v4586_v61 = vpack.c.bf16 %v172_v60, %v172_v60  ;;  %v265_v18 = vadd.f32 %v264_v16, %v192_v13 }
  0xde   :  { %v161_v51 = vpop.f32.mrf.mxu0  ;;  %v3737_v21 = vpop.f32.mrf.mxu1 }
  0xdf   :  { %282 = vrot.lane.b32.xlu1 %v273_v49, %s4420_s24  ;;  %286 = vrot.lane.b32.xlu0 %v275_v50, %s4420_s24  ;;  %v4615_v22 = vpack.c.bf16 %v265_v18, %v265_v18 }
  0xe0   :  { %v3722_v53 = vpop.f32.mrf.mxu0  ;;  %v267_v24 = vpop.f32.mrf.mxu1 }
  0xe1   :  { %v443_v25 = vsel %vm441_vm3, %v4615_v22, 0  ;;  %v4730_v24 = vld [vmem:[%s5909_s2 + $0x20] sm:$0xff] }
  0xe2   :  { %3758 = vmatpush3.bf16.msra.mxu1 %v443_v25  ;;  %v3738_v28 = vpop.f32.mrf.mxu1 }
  0xe3   :  { %517 = vrot.lane.b32.xlu1 %v274_v43, %s4421_s25  ;;  %519 = vrot.lane.b32.xlu0 %v275_v50, %s4421_s25 }
  0xe4   :  { %3759 = vmatprep.subr.bf16.mxu1 %v4417_v1 }
  0xe6   :  { %3760 = vmatpush3.bf16.msra.mxu1 %v4623_v27 }
  0xe7   :  { %509 = vrot.lane.b32.xlu1 %v4576_v56, %s4422_s26  ;;  %515 = vrot.lane.b32.xlu0 %v273_v49, %s4421_s25 }
  0xe8   :  { %3761 = vmatprep.subr.bf16.mxu1 %v4417_v1 }
  0xea   :  { %3762 = vmatpush3.bf16.msra.mxu1 %v4626_v30 }
  0xeb   :  { %511 = vrot.lane.b32.xlu1 %v4581_v59, %s4422_s26  ;;  %778 = vrot.lane.b32.xlu0 %v275_v50, %s4423_s27 }
  0xec   :  { %3793 = vmatprep.subr.bf16.mxu1 %v4417_v1 }
  0xef   :  { %776 = vrot.lane.b32.xlu0 %v274_v43, %s4423_s27  ;;  %513 = vrot.lane.b32.xlu1 %v4586_v61, %s4422_s26 }
  0xf3   :  { %774 = vrot.lane.b32.xlu0 %v273_v49, %s4423_s27  ;;  %768 = vrot.lane.b32.xlu1 %v4576_v56, %s4424_s28 }
  0xf7   :  { %1034 = vrot.lane.b32.xlu0 %v275_v50, %s4425_s29  ;;  %770 = vrot.lane.b32.xlu1 %v4581_v59, %s4424_s28 }
  0xfb   :  { %1032 = vrot.lane.b32.xlu0 %v274_v43, %s4425_s29  ;;  %772 = vrot.lane.b32.xlu1 %v4586_v61, %s4424_s28 }
  0xff   :  { %1030 = vrot.lane.b32.xlu0 %v273_v49, %s4425_s29  ;;  %1024 = vrot.lane.b32.xlu1 %v4576_v56, %s4426_s30 }
 0x103   :  { %1026 = vrot.lane.b32.xlu0 %v4581_v59, %s4426_s30  ;;  %1028 = vrot.lane.b32.xlu1 %v4586_v61, %s4426_s30 }
 0x107   :  { %670 = vrot.lane.b32.xlu1 %v4615_v22, %s4422_s26 }
 0x14d   :  { %v285_v7 = vpop.permute.xlu1 %284 }
 0x14e   :  { %v302_v11 = vsel %vm288_vm2, %v285_v7, 0 }
 0x151   :  { %v287_v0 = vpop.permute.xlu0 %286  ;;  %v283_v17 = vpop.permute.xlu1 %282 }
 0x152   :  { %v305_v2 = vsel %vm288_vm2, %v287_v0, 0  ;;  %v299_v23 = vsel %vm288_vm2, %v283_v17, 0  ;;  %v4700_v0 = vld [vmem:[%s5909_s2 + $0x8] sm:$0xff]  ;;  %v4720_v17 = vld [vmem:[%s5909_s2 + $0x18] sm:$0xff] }
 0x153   :  { %3740 = vmatpush3.bf16.xpose.msra.mxu0 %v305_v2 }
 0x154   :  { %3741 = vmatprep.subr.bf16.mxu0 %v4417_v1 }
 0x155   :  { %v520_v29 = vpop.permute.xlu0 %519  ;;  %v518_v32 = vpop.permute.xlu1 %517 }
 0x156   :  { %v537_v31 = vsel %vm288_vm2, %v520_v29, 0  ;;  %v534_v33 = vsel %vm288_vm2, %v518_v32, 0 }
 0x159   :  { %v516_v34 = vpop.permute.xlu0 %515  ;;  %v510_v37 = vpop.permute.xlu1 %509 }
 0x15a   :  { %v531_v35 = vsel %vm288_vm2, %v516_v34, 0 }
 0x15b   :  { %3742 = vmatpush3.bf16.xpose.msra.mxu0 %v302_v11 }
 0x15c   :  { %3743 = vmatprep.subr.bf16.mxu0 %v4417_v1 }
 0x15d   :  { %v779_v36 = vpop.permute.xlu0 %778  ;;  %v512_v40 = vpop.permute.xlu1 %511 }
 0x15e   :  { %v796_v38 = vsel %vm288_vm2, %v779_v36, 0 }
 0x161   :  { %v777_v39 = vpop.permute.xlu0 %776  ;;  %v514_v43 = vpop.permute.xlu1 %513 }
 0x162   :  { %v793_v41 = vsel %vm288_vm2, %v777_v39, 0 }
 0x163   :  { %3744 = vmatpush3.bf16.xpose.msra.mxu0 %v299_v23 }
 0x164   :  { %3775 = vmatprep.subr.bf16.mxu0 %v4417_v1 }
 0x165   :  { %v775_v42 = vpop.permute.xlu0 %774  ;;  %v769_v47 = vpop.permute.xlu1 %768 }
 0x166   :  { %v790_v44 = vsel %vm288_vm2, %v775_v42, 0 }
 0x169   :  { %v1035_v46 = vpop.permute.xlu0 %1034  ;;  %v771_v50 = vpop.permute.xlu1 %770 }
 0x16a   :  { %3746 = vmatmul.mubr.msk.bf16.vlgmr.msra.gmra.mxu0 %vm288_vm2, %v4576_v56  ;;  %v1052_v48 = vsel %vm288_vm2, %v1035_v46, 0 }
 0x16b   :  { %3776 = vmatpush3.bf16.xpose.msra.mxu0 %v537_v31  ;;  %3749 = vmatprep.mubr.msk.bf16.mxu0 %vm4418_vm0, %v4417_v1 }
 0x16c   :  { %3777 = vmatprep.subr.bf16.mxu0 %v4417_v1 }
 0x16d   :  { %v1033_v49 = vpop.permute.xlu0 %1032  ;;  %v773_v53 = vpop.permute.xlu1 %772 }
 0x16e   :  { %v1049_v51 = vsel %vm288_vm2, %v1033_v49, 0 }
 0x171   :  { %v1031_v52 = vpop.permute.xlu0 %1030  ;;  %v1025_v55 = vpop.permute.xlu1 %1024 }
 0x172   :  { %3750 = vmatmul.mubr.msk.bf16.gmra.mxu0 %vm288_vm2, %v4581_v59  ;;  %v1046_v54 = vsel %vm288_vm2, %v1031_v52, 0  ;;  %v4692_v59 = vld [vmem:[%s5909_s2] sm:$0xff] }
 0x173   :  { %3778 = vmatpush3.bf16.xpose.msra.mxu0 %v534_v33  ;;  %3753 = vmatprep.mubr.msk.bf16.mxu0 %vm4418_vm0, %v4417_v1 }
 0x174   :  { %3779 = vmatprep.subr.bf16.mxu0 %v4417_v1 }
 0x175   :  { %v1027_v56 = vpop.permute.xlu0 %1026  ;;  %v1029_v57 = vpop.permute.xlu1 %1028 }
 0x17a   :  { %3754 = vmatmul.mubr.msk.bf16.gmra.mxu0 %vm288_vm2, %v4586_v61 }
 0x17b   :  { %3780 = vmatpush3.bf16.xpose.msra.mxu0 %v531_v35  ;;  %3781 = vmatprep.mubr.msk.bf16.mxu0 %vm4418_vm0, %v4417_v1 }
 0x17c   :  { %3811 = vmatprep.subr.bf16.mxu0 %v4417_v1 }
 0x182   :  { %3782 = vmatmul.mubr.msk.bf16.vlgmr.msra.gmra.mxu0 %vm288_vm2, %v510_v37 }
 0x183   :  { %3812 = vmatpush3.bf16.xpose.msra.mxu0 %v796_v38  ;;  %3785 = vmatprep.mubr.msk.bf16.mxu0 %vm4418_vm0, %v4417_v1 }
 0x184   :  { %3813 = vmatprep.subr.bf16.mxu0 %v4417_v1 }
 0x18a   :  { %3786 = vmatmul.mubr.msk.bf16.gmra.mxu0 %vm288_vm2, %v512_v40 }
 0x18b   :  { %3814 = vmatpush3.bf16.xpose.msra.mxu0 %v793_v41  ;;  %3789 = vmatprep.mubr.msk.bf16.mxu0 %vm4418_vm0, %v4417_v1 }
 0x18c   :  { %3815 = vmatprep.subr.bf16.mxu0 %v4417_v1 }
 0x192   :  { %3790 = vmatmul.mubr.msk.bf16.gmra.mxu0 %vm288_vm2, %v514_v43 }
 0x193   :  { %3816 = vmatpush3.bf16.xpose.msra.mxu0 %v790_v44  ;;  %3817 = vmatprep.mubr.msk.bf16.mxu0 %vm4418_vm0, %v4417_v1 }
 0x194   :  { %3847 = vmatprep.subr.bf16.mxu0 %v4417_v1 }
 0x19a   :  { %3818 = vmatmul.mubr.msk.bf16.vlgmr.msra.gmra.mxu0 %vm288_vm2, %v769_v47 }
 0x19b   :  { %3848 = vmatpush3.bf16.xpose.msra.mxu0 %v1052_v48  ;;  %3821 = vmatprep.mubr.msk.bf16.mxu0 %vm4418_vm0, %v4417_v1 }
 0x19c   :  { %3849 = vmatprep.subr.bf16.mxu0 %v4417_v1 }
 0x1a2   :  { %3822 = vmatmul.mubr.msk.bf16.gmra.mxu0 %vm288_vm2, %v771_v50 }
 0x1a3   :  { %3850 = vmatpush3.bf16.xpose.msra.mxu0 %v1049_v51  ;;  %3825 = vmatprep.mubr.msk.bf16.mxu0 %vm4418_vm0, %v4417_v1 }
 0x1a4   :  { %3851 = vmatprep.subr.bf16.mxu0 %v4417_v1 }
 0x1aa   :  { %3826 = vmatmul.mubr.msk.bf16.gmra.mxu0 %vm288_vm2, %v773_v53 }
 0x1ab   :  { %3852 = vmatpush3.bf16.xpose.msra.mxu0 %v1046_v54  ;;  %3853 = vmatprep.mubr.msk.bf16.mxu0 %vm4418_vm0, %v4417_v1 }
 0x1ac   :  { %3883 = vmatprep.subr.bf16.mxu0 %v4417_v1 }
 0x1b2   :  { %3854 = vmatmul.mubr.msk.bf16.vlgmr.msra.gmra.mxu0 %vm288_vm2, %v1025_v55 }
 0x1b3   :  { %3857 = vmatprep.mubr.msk.bf16.mxu0 %vm4418_vm0, %v4417_v1 }
 0x1ba   :  { %3858 = vmatmul.mubr.msk.bf16.gmra.mxu0 %vm288_vm2, %v1027_v56 }
 0x1bb   :  { %3861 = vmatprep.mubr.msk.bf16.mxu0 %vm4418_vm0, %v4417_v1 }
 0x1c2   :  { %3862 = vmatmul.mubr.msk.bf16.gmra.mxu0 %vm288_vm2, %v1029_v57 }
 0x1c3   :  { %3887 = vmatprep.mubr.msk.bf16.mxu0 %vm4418_vm0, %v4417_v1 }
 0x22a   :  { %v341_v58 = vpop.f32.mrf.mxu0 }
 0x22b   :  { %v363_v60 = vmul.f32 0.35355338, %v341_v58 }
 0x22c   :  { %v3747_v61 = vpop.f32.mrf.mxu0 }
 0x22d   :  { %v4695_v62 = vadd.f32 %v363_v60, %v4692_v59 }
 0x22e   :  { %v344_v63 = vpop.f32.mrf.mxu0 }
 0x22f   :  { %v364_v2 = vmul.f32 0.35355338, %v344_v63  ;;  %v374_v3 = vsel %vm373_vm4, %v4695_v62, -inf }
 0x230   :  { %375 = vmax.xlane.f32.xlu0 %v374_v3  ;;  %v3748_v5 = vpop.f32.mrf.mxu0 }
 0x231   :  { %v4705_v6 = vadd.f32 %v364_v2, %v4700_v0 }
 0x232   :  { %v349_v7 = vpop.f32.mrf.mxu0 }
 0x233   :  { %v365_v11 = vmul.f32 0.35355338, %v349_v7  ;;  %v377_v12 = vsel %vm373_vm4, %v4705_v6, -inf }
 0x234   :  { %378 = vmax.xlane.f32.xlu1 %v377_v12  ;;  %v3751_v13 = vpop.f32.mrf.mxu0 }
 0x235   :  { %v4715_v15 = vadd.f32 %v365_v11, %v4710_v9 }
 0x236   :  { %v352_v16 = vpop.f32.mrf.mxu0 }
 0x237   :  { %v366_v18 = vmul.f32 0.35355338, %v352_v16  ;;  %v380_v19 = vsel %vm373_vm4, %v4715_v15, -inf }
 0x238   :  { %381 = vmax.xlane.f32.xlu0 %v380_v19  ;;  %v3752_v20 = vpop.f32.mrf.mxu0 }
 0x239   :  { %v4725_v21 = vadd.f32 %v366_v18, %v4720_v17 }
 0x23a   :  { %v357_v23 = vpop.f32.mrf.mxu0 }
 0x23b   :  { %v367_v25 = vmul.f32 0.35355338, %v357_v23  ;;  %v383_v14 = vsel %vm373_vm4, %v4725_v21, -inf }
 0x23c   :  { %384 = vmax.xlane.f32.xlu0 %v383_v14  ;;  %v3755_v26 = vpop.f32.mrf.mxu0 }
 0x23d   :  { %v4735_v28 = vadd.f32 %v367_v25, %v4730_v24 }
 0x23e   :  { %v360_v29 = vpop.f32.mrf.mxu0 }
 0x23f   :  { %v386_v31 = vsel %vm373_vm4, %v4735_v28, -inf }
 0x240   :  { %387 = vmax.xlane.f32.xlu1 %v386_v31  ;;  %v3756_v32 = vpop.f32.mrf.mxu0 }
 0x242   :  { %v573_v33 = vpop.f32.mrf.mxu0 }
 0x243   :  { %v595_v34 = vmul.f32 0.35355338, %v573_v33 }
 0x244   :  { %v3783_v35 = vpop.f32.mrf.mxu0 }
 0x245   :  { %v4740_v36 = vadd.f32 %v595_v34, %v4692_v59 }
 0x246   :  { %v576_v37 = vpop.f32.mrf.mxu0 }
 0x247   :  { %v605_v38 = vsel %vm373_vm4, %v4740_v36, -inf  ;;  %v596_v58 = vmul.f32 0.35355338, %v576_v37 }
 0x248   :  { %606 = vmax.xlane.f32.xlu0 %v605_v38  ;;  %v3784_v39 = vpop.f32.mrf.mxu0 }
 0x249   :  { %v4749_v3 = vadd.f32 %v596_v58, %v4700_v0 }
 0x24a   :  { %v581_v40 = vpop.f32.mrf.mxu0 }
 0x24b   :  { %v597_v7 = vmul.f32 0.35355338, %v581_v40  ;;  %v608_v13 = vsel %vm373_vm4, %v4749_v3, -inf }
 0x24c   :  { %v3787_v41 = vpop.f32.mrf.mxu0 }
 0x24d   :  { %v4757_v19 = vadd.f32 %v597_v7, %v4710_v9 }
 0x24e   :  { %v584_v42 = vpop.f32.mrf.mxu0 }
 0x24f   :  { %v598_v63 = vmul.f32 0.35355338, %v584_v42  ;;  %v611_v32 = vsel %vm373_vm4, %v4757_v19, -inf }
 0x250   :  { %v3788_v43 = vpop.f32.mrf.mxu0 }
 0x251   :  { %666 = vrot.lane.b32.xlu1 %v4626_v30, %s4422_s26  ;;  %v4754_v16 = vadd.f32 %v598_v63, %v4720_v17 }
 0x252   :  { %v589_v44 = vpop.f32.mrf.mxu0 }
 0x253   :  { %v599_v20 = vmul.f32 0.35355338, %v589_v44  ;;  %v614_v14 = vsel %vm373_vm4, %v4754_v16, -inf }
 0x254   :  { %v3791_v46 = vpop.f32.mrf.mxu0 }
 0x255   :  { %v4769_v37 = vadd.f32 %v599_v20, %v4730_v24 }
 0x256   :  { %v592_v47 = vpop.f32.mrf.mxu0 }
 0x257   :  { %v617_v44 = vsel %vm373_vm4, %v4769_v37, -inf }
 0x258   :  { %v3792_v48 = vpop.f32.mrf.mxu0 }
 0x25a   :  { %v832_v49 = vpop.f32.mrf.mxu0 }
 0x25b   :  { %v854_v11 = vmul.f32 0.35355338, %v832_v49 }
 0x25c   :  { %v3819_v50 = vpop.f32.mrf.mxu0 }
 0x25d   :  { %v4762_v26 = vadd.f32 %v854_v11, %v4692_v59 }
 0x25e   :  { %668 = vrot.lane.b32.xlu0 %v4623_v27, %s4422_s26  ;;  %v835_v51 = vpop.f32.mrf.mxu0 }
 0x25f   :  { %v855_v31 = vmul.f32 0.35355338, %v835_v51  ;;  %v864_v35 = vsel %vm373_vm4, %v4762_v26, -inf }
 0x260   :  { %v3820_v52 = vpop.f32.mrf.mxu0 }
 0x261   :  { %v4775_v41 = vadd.f32 %v855_v31, %v4700_v0 }
 0x262   :  { %v840_v53 = vpop.f32.mrf.mxu0 }
 0x263   :  { %v856_v23 = vmul.f32 0.35355338, %v840_v53  ;;  %v867_v49 = vsel %vm373_vm4, %v4775_v41, -inf }
 0x264   :  { %v3823_v54 = vpop.f32.mrf.mxu0 }
 0x265   :  { %v4772_v38 = vadd.f32 %v856_v23, %v4710_v9 }
 0x266   :  { %v843_v55 = vpop.f32.mrf.mxu0 }
 0x267   :  { %v857_v40 = vmul.f32 0.35355338, %v843_v55  ;;  %v870_v46 = vsel %vm373_vm4, %v4772_v38, -inf }
 0x268   :  { %v3824_v56 = vpop.f32.mrf.mxu0 }
 0x269   :  { %v4787_v50 = vadd.f32 %v857_v40, %v4720_v17 }
 0x26a   :  { %v848_v57 = vpop.f32.mrf.mxu0 }
 0x26b   :  { %v858_v33 = vmul.f32 0.35355338, %v848_v57  ;;  %v873_v57 = vsel %vm373_vm4, %v4787_v50, -inf }
 0x26c   :  { %v3827_v60 = vpop.f32.mrf.mxu0 }
 0x26d   :  { %v4782_v47 = vadd.f32 %v858_v33, %v4730_v24 }
 0x26e   :  { %v851_v61 = vpop.f32.mrf.mxu0 }
 0x26f   :  { %v876_v54 = vsel %vm373_vm4, %v4782_v47, -inf }
 0x270   :  { %v3828_v2 = vpop.f32.mrf.mxu0 }
 0x272   :  { %v1088_v5 = vpop.f32.mrf.mxu0 }
 0x273   :  { %v1110_v51 = vmul.f32 0.35355338, %v1088_v5 }
 0x274   :  { %v3855_v12 = vpop.f32.mrf.mxu0 }
 0x275   :  { %609 = vmax.xlane.f32.xlu1 %v608_v13  ;;  %v4799_v63 = vadd.f32 %v1110_v51, %v4692_v59  ;;  %v4818_v13 = vpop.permute.xlu1 %670 }
 0x276   :  { %v1091_v18 = vpop.f32.mrf.mxu0 }
 0x277   :  { %v1111_v42 = vmul.f32 0.35355338, %v1091_v18  ;;  %v1120_v5 = vsel %vm373_vm4, %v4799_v63, -inf }
 0x278   :  { %v3856_v25 = vpop.f32.mrf.mxu0 }
 0x279   :  { %615 = vmax.xlane.f32.xlu1 %v614_v14  ;;  %v4792_v55 = vadd.f32 %v1111_v42, %v4700_v0 }
 0x27a   :  { %v1096_v29 = vpop.f32.mrf.mxu0 }
 0x27b   :  { %v1112_v58 = vmul.f32 0.35355338, %v1096_v29  ;;  %v1123_v61 = vsel %vm373_vm4, %v4792_v55, -inf }
 0x27c   :  { %v3859_v34 = vpop.f32.mrf.mxu0 }
 0x27d   :  { %612 = vmax.xlane.f32.xlu0 %v611_v32  ;;  %865 = vmax.xlane.f32.xlu1 %v864_v35  ;;  %v4809_v11 = vadd.f32 %v1112_v58, %v4710_v9 }
 0x27e   :  { %v1099_v39 = vpop.f32.mrf.mxu0 }
 0x27f   :  { %v1113_v52 = vmul.f32 0.35355338, %v1099_v39  ;;  %v1126_v59 = vsel %vm373_vm4, %v4809_v11, -inf }
 0x280   :  { %v3860_v43 = vpop.f32.mrf.mxu0 }
 0x281   :  { %618 = vmax.xlane.f32.xlu0 %v617_v44  ;;  %871 = vmax.xlane.f32.xlu1 %v870_v46  ;;  %v4802_v2 = vadd.f32 %v1113_v52, %v4720_v17 }
 0x282   :  { %v1104_v48 = vpop.f32.mrf.mxu0 }
 0x283   :  { %v1114_v0 = vmul.f32 0.35355338, %v1104_v48  ;;  %v1129_v7 = vsel %vm373_vm4, %v4802_v2, -inf }
 0x284   :  { %v3863_v53 = vpop.f32.mrf.mxu0 }
 0x285   :  { %868 = vmax.xlane.f32.xlu0 %v867_v49  ;;  %877 = vmax.xlane.f32.xlu1 %v876_v54  ;;  %v4814_v17 = vadd.f32 %v1114_v0, %v4730_v24 }
 0x286   :  { %v1107_v56 = vpop.f32.mrf.mxu0 }
 0x287   :  { %v1132_v12 = vsel %vm373_vm4, %v4814_v17, -inf }
 0x288   :  { %v3864_v60 = vpop.f32.mrf.mxu0 }
 0x289   :  { %874 = vmax.xlane.f32.xlu0 %v873_v57  ;;  %1124 = vmax.xlane.f32.xlu1 %v1123_v61 }
 0x28d   :  { %1121 = vmax.xlane.f32.xlu0 %v1120_v5  ;;  %1130 = vmax.xlane.f32.xlu1 %v1129_v7 }
 0x291   :  { %1127 = vmax.xlane.f32.xlu0 %v1126_v59 }
 0x295   :  { %1133 = vmax.xlane.f32.xlu0 %v1132_v12 }
 0x2b9   :  { %v376_v18 = vpop.xlane.xlu0 %375 }
 0x2ba   :  { %v389_v20 = vsub.f32 %v4695_v62, %v376_v18 }
 0x2bc   :  { %v394_v9 = vmul.f32 1.442695, %v389_v20 }
 0x2bd   :  { %v379_v23 = vpop.xlane.xlu1 %378 }
 0x2be   :  { %4200 = vpow2.f32 %v394_v9  ;;  %v390_v25 = vsub.f32 %v4705_v6, %v379_v23 }
 0x2c0   :  { %v396_v14 = vmul.f32 1.442695, %v390_v25 }
 0x2c1   :  { %v382_v29 = vpop.xlane.xlu0 %381 }
 0x2c2   :  { %4202 = vpow2.f32 %v396_v14  ;;  %v391_v24 = vsub.f32 %v4715_v15, %v382_v29 }
 0x2c4   :  { %v398_v31 = vmul.f32 1.442695, %v391_v24 }
 0x2c5   :  { %v385_v32 = vpop.xlane.xlu0 %384 }
 0x2c6   :  { %4204 = vpow2.f32 %v398_v31  ;;  %v392_v33 = vsub.f32 %v4725_v21, %v385_v32 }
 0x2c8   :  { %v400_v34 = vmul.f32 1.442695, %v392_v33 }
 0x2c9   :  { %v388_v35 = vpop.xlane.xlu1 %387 }
 0x2ca   :  { %4206 = vpow2.f32 %v400_v34  ;;  %v393_v62 = vsub.f32 %v4735_v28, %v388_v35 }
 0x2cb   :  { %v4825_v39 = vpop.eup %4200 }
 0x2cc   :  { %v402_v40 = vmul.f32 1.442695, %v393_v62  ;;  %v404_v6 = vsel %vm373_vm4, %v4825_v39, 0.0 }
 0x2cd   :  { %405 = vadd.xlane.f32.xlu0 %v404_v6  ;;  %v4854_v54 = vpop.permute.xlu1 %666 }
 0x2ce   :  { %4208 = vpow2.f32 %v402_v40 }
 0x2cf   :  { %v4829_v42 = vpop.eup %4202 }
 0x2d0   :  { %v407_v15 = vsel %vm373_vm4, %v4829_v42, 0.0 }
 0x2d1   :  { %v607_v43 = vpop.xlane.xlu0 %606  ;;  %408 = vadd.xlane.f32.xlu1 %v407_v15 }
 0x2d2   :  { %v620_v21 = vsub.f32 %v4740_v36, %v607_v43 }
 0x2d3   :  { %v4834_v44 = vpop.eup %4204 }
 0x2d4   :  { %v625_v28 = vmul.f32 1.442695, %v620_v21  ;;  %v410_v46 = vsel %vm373_vm4, %v4834_v44, 0.0 }
 0x2d5   :  { %411 = vadd.xlane.f32.xlu0 %v410_v46  ;;  %v4859_v60 = vpop.permute.xlu0 %668 }
 0x2d6   :  { %4210 = vpow2.f32 %v625_v28 }
 0x2d7   :  { %v4838_v48 = vpop.eup %4206 }
 0x2d8   :  { %v413_v49 = vsel %vm373_vm4, %v4838_v48, 0.0 }
 0x2d9   :  { %414 = vadd.xlane.f32.xlu1 %v413_v49 }
 0x2db   :  { %v4842_v51 = vpop.eup %4208 }
 0x2dc   :  { %v416_v52 = vsel %vm373_vm4, %v4842_v51, 0.0 }
 0x2dd   :  { %417 = vadd.xlane.f32.xlu1 %v416_v52 }
 0x2e3   :  { %v4846_v36 = vpop.eup %4210 }
 0x2e4   :  { %v635_v53 = vsel %vm373_vm4, %v4846_v36, 0.0 }
 0x2e5   :  { %636 = vadd.xlane.f32.xlu0 %v635_v53 }
 0x2ee   :  { %924 = vrot.lane.b32.xlu1 %v4623_v27, %s4424_s28 }
 0x2f2   :  { %922 = vrot.lane.b32.xlu1 %v4626_v30, %s4424_s28 }
 0x2fb   :  { %926 = vrot.lane.b32.xlu0 %v4615_v22, %s4424_s28 }
 0x2fe   :  { %v610_v56 = vpop.xlane.xlu1 %609 }
 0x2ff   :  { %v621_v57 = vsub.f32 %v4749_v3, %v610_v56 }
 0x301   :  { %v627_v58 = vmul.f32 1.442695, %v621_v57 }
 0x302   :  { %v616_v61 = vpop.xlane.xlu1 %615 }
 0x303   :  { %v623_v0 = vsub.f32 %v4754_v16, %v616_v61  ;;  %4212 = vpow2.f32 %v627_v58 }
 0x305   :  { %v631_v5 = vmul.f32 1.442695, %v623_v0 }
 0x306   :  { %v613_v7 = vpop.xlane.xlu0 %612  ;;  %v4862_v59 = vpop.xlane.xlu1 %865 }
 0x307   :  { %v622_v12 = vsub.f32 %v4757_v19, %v613_v7  ;;  %4214 = vpow2.f32 %v631_v5 }
 0x309   :  { %v629_v18 = vmul.f32 1.442695, %v622_v12 }
 0x30a   :  { %v619_v20 = vpop.xlane.xlu0 %618  ;;  %v872_v9 = vpop.xlane.xlu1 %871 }
 0x30b   :  { %4216 = vpow2.f32 %v629_v18  ;;  %v624_v3 = vsub.f32 %v4769_v37, %v619_v20  ;;  %v881_v25 = vsub.f32 %v4772_v38, %v872_v9 }
 0x30d   :  { %v633_v23 = vmul.f32 1.442695, %v624_v3  ;;  %v888_v24 = vmul.f32 1.442695, %v881_v25 }
 0x30e   :  { %v869_v14 = vpop.xlane.xlu0 %868  ;;  %v878_v29 = vpop.xlane.xlu1 %877 }
 0x30f   :  { %4218 = vpow2.f32 %v633_v23  ;;  %v880_v16 = vsub.f32 %v4775_v41, %v869_v14  ;;  %v883_v34 = vsub.f32 %v4782_v47, %v878_v29 }
 0x310   :  { %v4868_v32 = vpop.eup %4212 }
 0x311   :  { %v886_v31 = vmul.f32 1.442695, %v880_v16  ;;  %v638_v38 = vsel %vm373_vm4, %v4868_v32, 0.0  ;;  %v892_v6 = vmul.f32 1.442695, %v883_v34 }
 0x312   :  { %v875_v19 = vpop.xlane.xlu0 %874  ;;  %v1125_v62 = vpop.xlane.xlu1 %1124 }
 0x313   :  { %4220 = vpow2.f32 %v886_v31  ;;  %v882_v33 = vsub.f32 %v4787_v50, %v875_v19  ;;  %v1136_v15 = vsub.f32 %v4792_v55, %v1125_v62 }
 0x314   :  { %4222 = vpow2.f32 %v888_v24  ;;  %v4874_v35 = vpop.eup %4214 }
 0x315   :  { %v890_v37 = vmul.f32 1.442695, %v882_v33  ;;  %v644_v50 = vsel %vm373_vm4, %v4874_v35, 0.0  ;;  %v1142_v28 = vmul.f32 1.442695, %v1136_v15  ;;  %v684_v15 = vsel %vm441_vm3, %v4818_v13, 0 }
 0x316   :  { %v1122_v41 = vpop.xlane.xlu0 %1121  ;;  %639 = vadd.xlane.f32.xlu1 %v638_v38  ;;  %v1131_v52 = vpop.xlane.xlu1 %1130 }
 0x317   :  { %4224 = vpow2.f32 %v890_v37  ;;  %v1138_v53 = vsub.f32 %v4802_v2, %v1131_v52  ;;  %v1135_v14 = vsub.f32 %v4799_v63, %v1122_v41 }
 0x318   :  { %v4876_v40 = vpop.eup %4216  ;;  %4226 = vpow2.f32 %v892_v6 }
 0x319   :  { %v641_v47 = vsel %vm373_vm4, %v4876_v40, 0.0  ;;  %4228 = vpow2.f32 %v1142_v28  ;;  %v1146_v61 = vmul.f32 1.442695, %v1138_v53  ;;  %v1140_v16 = vmul.f32 1.442695, %v1135_v14 }
 0x31a   :  { %v1128_v43 = vpop.xlane.xlu0 %1127  ;;  %645 = vadd.xlane.f32.xlu1 %v644_v50  ;;  %642 = vadd.xlane.f32.xlu0 %v641_v47 }
 0x31b   :  { %v1137_v46 = vsub.f32 %v4809_v11, %v1128_v43 }
 0x31c   :  { %v4883_v21 = vpop.eup %4218 }
 0x31d   :  { %v647_v49 = vsel %vm373_vm4, %v4883_v21, 0.0  ;;  %v1144_v56 = vmul.f32 1.442695, %v1137_v46 }
 0x31e   :  { %648 = vadd.xlane.f32.xlu0 %v647_v49 }
 0x31f   :  { %4230 = vpow2.f32 %v1144_v56 }
 0x320   :  { %v4888_v55 = vpop.eup %4220  ;;  %4232 = vpow2.f32 %v1146_v61 }
 0x321   :  { %v897_v57 = vsel %vm373_vm4, %v4888_v55, 0.0  ;;  %v4893_v58 = vpop.eup %4222 }
 0x322   :  { %898 = vadd.xlane.f32.xlu0 %v897_v57  ;;  %v900_v11 = vsel %vm373_vm4, %v4893_v58, 0.0 }
 0x324   :  { %v4897_v0 = vpop.eup %4224 }
 0x325   :  { %v903_v5 = vsel %vm373_vm4, %v4897_v0, 0.0  ;;  %v4901_v2 = vpop.eup %4226 }
 0x326   :  { %901 = vadd.xlane.f32.xlu0 %v900_v11  ;;  %v906_v7 = vsel %vm373_vm4, %v4901_v2, 0.0  ;;  %v4907_v12 = vpop.eup %4228 }
 0x327   :  { %v1153_v18 = vsel %vm373_vm4, %v4907_v12, 0.0 }
 0x32a   :  { %904 = vadd.xlane.f32.xlu0 %v903_v5 }
 0x32b   :  { %1182 = vrot.lane.b32.xlu1 %v4615_v22, %s4426_s30  ;;  %v879_v22 = vsub.f32 %v4762_v26, %v4862_v59  ;;  %v1134_v26 = vpop.xlane.xlu0 %1133 }
 0x32c   :  { %v4911_v20 = vpop.eup %4230 }
 0x32d   :  { %v1156_v9 = vsel %vm373_vm4, %v4911_v20, 0.0  ;;  %v4915_v3 = vpop.eup %4232  ;;  %v884_v25 = vmul.f32 1.442695, %v879_v22 }
 0x32e   :  { %907 = vadd.xlane.f32.xlu0 %v906_v7  ;;  %v1159_v23 = vsel %vm373_vm4, %v4915_v3, 0.0 }
 0x32f   :  { %4234 = vpow2.f32 %v884_v25 }
 0x330   :  { %4236 = vpow2.f32 %v1140_v16 }
 0x332   :  { %1154 = vadd.xlane.f32.xlu0 %v1153_v18 }
 0x336   :  { %1157 = vadd.xlane.f32.xlu0 %v1156_v9 }
 0x33a   :  { %1160 = vadd.xlane.f32.xlu0 %v1159_v23 }
 0x33c   :  { %v4922_v29 = vpop.eup %4234 }
 0x33d   :  { %v894_v24 = vsel %vm373_vm4, %v4922_v29, 0.0  ;;  %v4926_v31 = vpop.eup %4236 }
 0x33e   :  { %v1150_v59 = vsel %vm373_vm4, %v4926_v31, 0.0 }
 0x34f   :  { %895 = vadd.xlane.f32.xlu1 %v894_v24 }
 0x350   :  { %1180 = vrot.lane.b32.xlu0 %v4623_v27, %s4426_s30 }
 0x353   :  { %1151 = vadd.xlane.f32.xlu1 %v1150_v59 }
 0x356   :  { %v406_v63 = vpop.xlane.xlu0 %405 }
 0x357   :  { %4238 = vrcp.f32 %v406_v63 }
 0x35a   :  { %v409_v19 = vpop.xlane.xlu1 %408 }
 0x35b   :  { %4240 = vrcp.f32 %v409_v19 }
 0x35e   :  { %v412_v33 = vpop.xlane.xlu0 %411 }
 0x35f   :  { %4242 = vrcp.f32 %v412_v33 }
 0x362   :  { %v415_v34 = vpop.xlane.xlu1 %414 }
 0x363   :  { %4244 = vrcp.f32 %v415_v34 }
 0x364   :  { %1178 = vrot.lane.b32.xlu1 %v4626_v30, %s4426_s30  ;;  %v4239_v37 = vpop.eup %4238  ;;  %v1139_v30 = vsub.f32 %v4814_v17, %v1134_v26 }
 0x365   :  { %v424_v62 = vmul.f32 %v4239_v37, %v4825_v39 }
 0x366   :  { %v418_v38 = vpop.xlane.xlu1 %417  ;;  %v1148_v43 = vmul.f32 1.442695, %v1139_v30 }
 0x367   :  { %4246 = vrcp.f32 %v418_v38 }
 0x368   :  { %v4241_v27 = vpop.eup %4240  ;;  %4248 = vpow2.f32 %v1148_v43 }
 0x369   :  { %v425_v41 = vmul.f32 %v4241_v27, %v4829_v42 }
 0x36b   :  { %v429_v6 = vpack.c.bf16 %v425_v41, %v424_v62 }
 0x36c   :  { %v4243_v50 = vpop.eup %4242 }
 0x36d   :  { %3764 = vmatmul.mubr.msk.bf16.vlgmr.msra.gmra.mxu1 %vm373_vm4, %v429_v6  ;;  %v426_v39 = vmul.f32 %v4243_v50, %v4834_v44 }
 0x36e   :  { %3794 = vmatpush3.bf16.msra.mxu1 %v684_v15  ;;  %3767 = vmatprep.mubr.msk.bf16.mxu1 %vm4418_vm0, %v4417_v1  ;;  %v637_v46 = vpop.xlane.xlu0 %636 }
 0x36f   :  { %3795 = vmatprep.subr.bf16.mxu1 %v4417_v1  ;;  %4250 = vrcp.f32 %v637_v46 }
 0x370   :  { %v4245_v47 = vpop.eup %4244 }
 0x371   :  { %v427_v42 = vmul.f32 %v4245_v47, %v4838_v48 }
 0x372   :  { %3796 = vmatpush3.bf16.msra.mxu1 %v4859_v60  ;;  %v927_v52 = vpop.permute.xlu0 %926 }
 0x373   :  { %3797 = vmatprep.subr.bf16.mxu1 %v4417_v1  ;;  %v430_v13 = vpack.c.bf16 %v427_v42, %v426_v39  ;;  %v940_v23 = vsel %vm441_vm3, %v927_v52, 0 }
 0x374   :  { %v4247_v28 = vpop.eup %4246 }
 0x375   :  { %3768 = vmatmul.mubr.msk.bf16.gmra.mxu1 %vm373_vm4, %v430_v13  ;;  %v428_v17 = vmul.f32 %v4247_v28, %v4842_v51  ;;  %v4956_v48 = vpop.eup %4248 }
 0x376   :  { %3798 = vmatpush3.bf16.msra.mxu1 %v4854_v54  ;;  %3771 = vmatprep.mubr.msk.bf16.mxu1 %vm4418_vm0, %v4417_v1  ;;  %v1162_v60 = vsel %vm373_vm4, %v4956_v48, 0.0  ;;  %v925_v54 = vpop.permute.xlu1 %924 }
 0x377   :  { %3829 = vmatprep.subr.bf16.mxu1 %v4417_v1  ;;  %v431_v44 = vpack.c.bf16 %v428_v17, %v428_v17 }
 0x37a   :  { %v923_v49 = vpop.permute.xlu1 %922 }
 0x37c   :  { %v4251_v61 = vpop.eup %4250 }
 0x37d   :  { %3772 = vmatmul.mubr.msk.bf16.gmra.mxu1 %vm373_vm4, %v431_v44  ;;  %v655_v5 = vmul.f32 %v4251_v61, %v4846_v36 }
 0x37e   :  { %3799 = vmatprep.mubr.msk.bf16.mxu1 %vm4418_vm0, %v4417_v1 }
 0x388   :  { %1163 = vadd.xlane.f32.xlu1 %v1162_v60 }
 0x39f   :  { %v640_v51 = vpop.xlane.xlu1 %639 }
 0x3a0   :  { %4252 = vrcp.f32 %v640_v51 }
 0x3a3   :  { %v646_v53 = vpop.xlane.xlu1 %645  ;;  %v643_v56 = vpop.xlane.xlu0 %642 }
 0x3a4   :  { %4254 = vrcp.f32 %v646_v53 }
 0x3a5   :  { %4256 = vrcp.f32 %v643_v56 }
 0x3a7   :  { %v649_v57 = vpop.xlane.xlu0 %648  ;;  %v1183_v59 = vpop.permute.xlu1 %1182 }
 0x3a8   :  { %4258 = vrcp.f32 %v649_v57  ;;  %v1196_v50 = vsel %vm441_vm3, %v1183_v59, 0 }
 0x3ad   :  { %v4253_v11 = vpop.eup %4252 }
 0x3ae   :  { %v656_v7 = vmul.f32 %v4253_v11, %v4868_v32 }
 0x3b0   :  { %v660_v18 = vpack.c.bf16 %v656_v7, %v655_v5 }
 0x3b1   :  { %v4255_v9 = vpop.eup %4254 }
 0x3b2   :  { %v4257_v22 = vpop.eup %4256  ;;  %3800 = vmatmul.mubr.msk.bf16.vlgmr.msra.gmra.mxu1 %vm373_vm4, %v660_v18  ;;  %v658_v14 = vmul.f32 %v4255_v9, %v4874_v35  ;;  %v899_v35 = vpop.xlane.xlu0 %898 }
 0x3b3   :  { %3830 = vmatpush3.bf16.msra.mxu1 %v940_v23  ;;  %3803 = vmatprep.mubr.msk.bf16.mxu1 %vm4418_vm0, %v4417_v1  ;;  %v657_v25 = vmul.f32 %v4257_v22, %v4876_v40  ;;  %4260 = vrcp.f32 %v899_v35 }
 0x3b4   :  { %3831 = vmatprep.subr.bf16.mxu1 %v4417_v1 }
 0x3b5   :  { %v661_v36 = vpack.c.bf16 %v658_v14, %v657_v25  ;;  %v4259_v32 = vpop.eup %4258 }
 0x3b6   :  { %v659_v16 = vmul.f32 %v4259_v32, %v4883_v21  ;;  %v902_v40 = vpop.xlane.xlu0 %901 }
 0x3b7   :  { %3832 = vmatpush3.bf16.msra.mxu1 %v925_v54 }
 0x3b8   :  { %3833 = vmatprep.subr.bf16.mxu1 %v4417_v1  ;;  %v662_v24 = vpack.c.bf16 %v659_v16, %v659_v16 }
 0x3ba   :  { %3804 = vmatmul.mubr.msk.bf16.gmra.mxu1 %vm373_vm4, %v661_v36  ;;  %v905_v26 = vpop.xlane.xlu0 %904 }
 0x3bb   :  { %3834 = vmatpush3.bf16.msra.mxu1 %v923_v49  ;;  %3807 = vmatprep.mubr.msk.bf16.mxu1 %vm4418_vm0, %v4417_v1 }
 0x3bc   :  { %3865 = vmatprep.subr.bf16.mxu1 %v4417_v1 }
 0x3be   :  { %v908_v63 = vpop.xlane.xlu0 %907 }
 0x3c0   :  { %v4261_v34 = vpop.eup %4260 }
 0x3c1   :  { %v915_v38 = vmul.f32 %v4261_v34, %v4888_v55 }
 0x3c2   :  { %3808 = vmatmul.mubr.msk.bf16.gmra.mxu1 %vm373_vm4, %v662_v24  ;;  %v1155_v33 = vpop.xlane.xlu0 %1154 }
 0x3c3   :  { %3835 = vmatprep.mubr.msk.bf16.mxu1 %vm4418_vm0, %v4417_v1 }
 0x3c6   :  { %v1158_v21 = vpop.xlane.xlu0 %1157 }
 0x3ca   :  { %v1161_v62 = vpop.xlane.xlu0 %1160 }
 0x3d8   :  { %v896_v19 = vpop.xlane.xlu1 %895 }
 0x3d9   :  { %4262 = vrcp.f32 %v896_v19  ;;  %v4180_v19 = vld [vmem:[%s5910_s5 + $0x8] sm:$0xff]  }
 0x3da   :  { %4264 = vrcp.f32 %v905_v26  ;;  %3884 = vmatpush3.bf16.msra.mxu0 %v4180_v19 }
 0x3db   :  { %4266 = vrcp.f32 %v902_v40  ;;  %3885 = vmatprep.subr.bf16.mxu0 %v4417_v1 }
 0x3dc   :  { %4268 = vrcp.f32 %v908_v63  ;;  %v1152_v15 = vpop.xlane.xlu1 %1151 }
 0x3dd   :  { %4270 = vrcp.f32 %v1152_v15  ;;  %v4181_v15 = vld [vmem:[%s5910_s5] sm:$0xff]  }
 0x3de   :  { %4272 = vrcp.f32 %v1155_v33  ;;  %3886 = vmatpush3.bf16.msra.mxu0 %v4181_v15 }
 0x3df   :  { %4274 = vrcp.f32 %v1161_v62  ;;  %3915 = vmatprep.subr.bf16.mxu0 %v4417_v1 }
 0x3e0   :  { %v1179_v43 = vpop.permute.xlu1 %1178  ;;  %4276 = vrcp.f32 %v1158_v21 }
 0x3e6   :  { %v4263_v37 = vpop.eup %4262 }
 0x3e7   :  { %v914_v27 = vmul.f32 %v4263_v37, %v4922_v29  ;;  %v4265_v6 = vpop.eup %4264  ;;  %v1181_v29 = vpop.permute.xlu0 %1180 }
 0x3e8   :  { %v4267_v30 = vpop.eup %4266  ;;  %v917_v55 = vmul.f32 %v4265_v6, %v4897_v0 }
 0x3e9   :  { %v919_v41 = vpack.c.bf16 %v915_v38, %v914_v27  ;;  %v916_v47 = vmul.f32 %v4267_v30, %v4893_v58  ;;  %v4269_v42 = vpop.eup %4268 }
 0x3ea   :  { %v918_v13 = vmul.f32 %v4269_v42, %v4901_v2  ;;  %v4271_v58 = vpop.eup %4270 }
 0x3eb   :  { %3836 = vmatmul.mubr.msk.bf16.vlgmr.msra.gmra.mxu1 %vm373_vm4, %v919_v41  ;;  %v920_v39 = vpack.c.bf16 %v917_v55, %v916_v47  ;;  %v4273_v28 = vpop.eup %4272  ;;  %v1170_v17 = vmul.f32 %v4271_v58, %v4926_v31 }
 0x3ec   :  { %3866 = vmatpush3.bf16.msra.mxu1 %v1196_v50  ;;  %3839 = vmatprep.mubr.msk.bf16.mxu1 %vm4418_vm0, %v4417_v1  ;;  %v921_v0 = vpack.c.bf16 %v918_v13, %v918_v13  ;;  %v1171_v44 = vmul.f32 %v4273_v28, %v4907_v12  ;;  %v4275_v54 = vpop.eup %4274 }
 0x3ed   :  { %3867 = vmatprep.subr.bf16.mxu1 %v4417_v1  ;;  %v4277_v2 = vpop.eup %4276  ;;  %v1173_v46 = vmul.f32 %v4275_v54, %v4915_v3 }
 0x3ee   :  { %v1175_v60 = vpack.c.bf16 %v1171_v44, %v1170_v17  ;;  %v1172_v49 = vmul.f32 %v4277_v2, %v4911_v20 }
 0x3f0   :  { %3868 = vmatpush3.bf16.msra.mxu1 %v1181_v29  ;;  %v1176_v52 = vpack.c.bf16 %v1173_v46, %v1172_v49 }
 0x3f1   :  { %3869 = vmatprep.subr.bf16.mxu1 %v4417_v1 }
 0x3f3   :  { %3840 = vmatmul.mubr.msk.bf16.gmra.mxu1 %vm373_vm4, %v920_v39 }
 0x3f4   :  { %3870 = vmatpush3.bf16.msra.mxu1 %v1179_v43  ;;  %3843 = vmatprep.mubr.msk.bf16.mxu1 %vm4418_vm0, %v4417_v1 }
 0x3f5   :  { %3899 = vmatprep.subr.bf16.mxu1 %v4417_v1 }
 0x3fb   :  { %3844 = vmatmul.mubr.msk.bf16.gmra.mxu1 %vm373_vm4, %v921_v0 }
 0x3fc   :  { %3871 = vmatprep.mubr.msk.bf16.mxu1 %vm4418_vm0, %v4417_v1 }
 0x403   :  { %3872 = vmatmul.mubr.msk.bf16.vlgmr.msra.gmra.mxu1 %vm373_vm4, %v1175_v60 }
 0x404   :  { %3875 = vmatprep.mubr.msk.bf16.mxu1 %vm4418_vm0, %v4417_v1 }
 0x40b   :  { %3876 = vmatmul.mubr.msk.bf16.gmra.mxu1 %vm373_vm4, %v1176_v52 }
 0x40c   :  { %3879 = vmatprep.mubr.msk.bf16.mxu1 %vm4418_vm0, %v4417_v1 }
 0x411   :  { %v1164_v31 = vpop.xlane.xlu1 %1163 }
 0x412   :  { %4278 = vrcp.f32 %v1164_v31 }
 0x41f   :  { %v4279_v12 = vpop.eup %4278 }
 0x420   :  { %v1174_v51 = vmul.f32 %v4279_v12, %v4956_v48 }
 0x422   :  { %v1177_v53 = vpack.c.bf16 %v1174_v51, %v1174_v51 }
 0x424   :  { %3880 = vmatmul.mubr.msk.bf16.gmra.mxu1 %vm373_vm4, %v1177_v53 }
 0x425   :  { %3903 = vmatprep.mubr.msk.bf16.mxu1 %vm4418_vm0, %v4417_v1 }
 0x42d   :  { %v479_v3 = vpop.f32.mrf.mxu1 }
 0x42e   :  { %501 = vst.msk [vmem:[#allocation2] sm:$0xff] %vm288_vm2, %v479_v3 }
 0x42f   :  { %v3765_v20 = vpop.f32.mrf.mxu1 }
 0x431   :  { %v482_v56 = vpop.f32.mrf.mxu1 }
 0x432   :  { %502 = vst.msk [vmem:[#allocation2 + $0x8] sm:$0xff] %vm288_vm2, %v482_v56 }
 0x433   :  { %v3766_v57 = vpop.f32.mrf.mxu1 }
 0x435   :  { %v487_v61 = vpop.f32.mrf.mxu1 }
 0x436   :  { %503 = vst.msk [vmem:[#allocation2 + $0x10] sm:$0xff] %vm288_vm2, %v487_v61 }
 0x437   :  { %v3769_v11 = vpop.f32.mrf.mxu1 }
 0x439   :  { %v490_v5 = vpop.f32.mrf.mxu1 }
 0x43a   :  { %504 = vst.msk [vmem:[#allocation2 + $0x18] sm:$0xff] %vm288_vm2, %v490_v5 }
 0x43b   :  { %v3770_v48 = vpop.f32.mrf.mxu1 }
 0x43d   :  { %v495_v7 = vpop.f32.mrf.mxu1 }
 0x43e   :  { %505 = vst.msk [vmem:[#allocation2 + $0x20] sm:$0xff] %vm288_vm2, %v495_v7 }
 0x43f   :  { %v3773_v18 = vpop.f32.mrf.mxu1 }
 0x441   :  { %v498_v9 = vpop.f32.mrf.mxu1 }
 0x443   :  { %v3774_v22 = vpop.f32.mrf.mxu1 }
 0x472   :  { %v720_v23 = vpop.f32.mrf.mxu1 }
 0x473   :  { %747 = vrot.lane.b32.xlu0 %v720_v23, %s4427_s22 }
 0x474   :  { %v3801_v25 = vpop.f32.mrf.mxu1 }
 0x476   :  { %v723_v14 = vpop.f32.mrf.mxu1 }
 0x477   :  { %749 = vrot.lane.b32.xlu0 %v723_v14, %s4427_s22  ;;  %v1290_v14 = vsub.s32 3, %v4494_v4 }
 0x478   :  { %v3802_v36 = vpop.f32.mrf.mxu1 }
 0x479   :  { %v5066_v36 = vld [vmem:[%s5907_s8] sm:$0xff] }
 0x47a   :  { %v728_v32 = vpop.f32.mrf.mxu1 }
 0x47b   :  { %751 = vrot.lane.b32.xlu1 %v728_v32, %s4427_s22  ;;  %v1291_v32 = vrot.slane %v5066_v36, %v1290_v14 }
 0x47c   :  { %v3805_v16 = vpop.f32.mrf.mxu1 }
 0x47e   :  { %v731_v24 = vpop.f32.mrf.mxu1 }
 0x47f   :  { %753 = vrot.lane.b32.xlu0 %v731_v24, %s4427_s22 }
 0x480   :  { %v3806_v35 = vpop.f32.mrf.mxu1 }
 0x482   :  { %v736_v40 = vpop.f32.mrf.mxu1 }
 0x484   :  { %v3809_v26 = vpop.f32.mrf.mxu1 }
 0x486   :  { %v739_v59 = vpop.f32.mrf.mxu1 }
 0x488   :  { %v3810_v63 = vpop.f32.mrf.mxu1 }
 0x4ab   :  { %v976_v33 = vpop.f32.mrf.mxu1 }
 0x4ac   :  { %1003 = vrot.lane.b32.xlu0 %v976_v33, %s4428_s12 }
 0x4ad   :  { %v3837_v21 = vpop.f32.mrf.mxu1 }
 0x4ae   :  { %v4402_v21 = vld [vmem:[%s5905_s0 + $0x8] sm:$0xff] }
 0x4af   :  { %v979_v34 = vpop.f32.mrf.mxu1 }
 0x4b0   :  { %1005 = vrot.lane.b32.xlu0 %v979_v34, %s4428_s12 }
 0x4b1   :  { %v3838_v37 = vpop.f32.mrf.mxu1 }
 0x4b3   :  { %v984_v38 = vpop.f32.mrf.mxu1 }
 0x4b4   :  { %1007 = vrot.lane.b32.xlu0 %v984_v38, %s4428_s12 }
 0x4b5   :  { %v3841_v27 = vpop.f32.mrf.mxu1 }
 0x4b7   :  { %v987_v62 = vpop.f32.mrf.mxu1 }
 0x4b9   :  { %v3842_v41 = vpop.f32.mrf.mxu1 }
 0x4ba   :  { %v4403_v41 = vld [vmem:[%s5905_s0 + $0x10] sm:$0xff] }
 0x4bb   :  { %v992_v6 = vpop.f32.mrf.mxu1 }
 0x4bd   :  { %v3845_v50 = vpop.f32.mrf.mxu1 }
 0x4bf   :  { %v995_v30 = vpop.f32.mrf.mxu1 }
 0x4c1   :  { %v3846_v55 = vpop.f32.mrf.mxu1 }
 0x4c3   :  { %v1232_v29 = vpop.f32.mrf.mxu1 }
 0x4c4   :  { %1259 = vrot.lane.b32.xlu0 %v1232_v29, %s4429_s16  ;;  %v4404_v29 = vld [vmem:[%s5905_s0 + $0x18] sm:$0xff] }
 0x4c5   :  { %v3873_v47 = vpop.f32.mrf.mxu1 }
 0x4c7   :  { %v1235_v39 = vpop.f32.mrf.mxu1 }
 0x4c8   :  { %1261 = vrot.lane.b32.xlu0 %v1235_v39, %s4429_s16 }
 0x4c9   :  { %v3874_v42 = vpop.f32.mrf.mxu1 }
 0x4cb   :  { %v1240_v43 = vpop.f32.mrf.mxu1 }
 0x4cc   :  { %1009 = vrot.lane.b32.xlu0 %v987_v62, %s4428_s12 }
 0x4cd   :  { %v3877_v13 = vpop.f32.mrf.mxu1 }
 0x4cf   :  { %v1243_v0 = vpop.f32.mrf.mxu1 }
 0x4d0   :  { %1263 = vrot.lane.b32.xlu0 %v1240_v43, %s4429_s16  ;;  %1265 = vrot.lane.b32.xlu1 %v1243_v0, %s4429_s16  ;;  %v4405_v0 = vld [vmem:[%s5905_s0 + $0x20] sm:$0xff] }
 0x4d1   :  { %v3878_v58 = vpop.f32.mrf.mxu1 }
 0x4d4   :  { %755 = vrot.lane.b32.xlu0 %v736_v40, %s4427_s22  ;;  %1011 = vrot.lane.b32.xlu1 %v992_v6, %s4428_s12  ;;  %v4401_v40 = vld [vmem:[%s5905_s0] sm:$0xff] }
 0x4e4   :  { %v1248_v28 = vpop.f32.mrf.mxu1 }
 0x4e5   :  { %1267 = vrot.lane.b32.xlu0 %v1248_v28, %s4429_s16  ;;  %v748_v17 = vpop.permute.xlu0 %747 }
 0x4e6   :  { %763 = vst.msk [vmem:[#allocation2] sm:$0xff] %vm762_vm5, %v748_v17  ;;  %v3881_v44 = vpop.f32.mrf.mxu1 }
 0x4e8   :  { %v1251_v60 = vpop.f32.mrf.mxu1 }
 0x4e9   :  { %v750_v54 = vpop.permute.xlu0 %749 }
 0x4ea   :  { %764 = vst.msk [vmem:[#allocation2 + $0x8] sm:$0xff] %vm762_vm5, %v750_v54  ;;  %v3882_v2 = vpop.f32.mrf.mxu1 }
 0x4ed   :  { %v752_v46 = vpop.permute.xlu1 %751 }
 0x4ee   :  { %765 = vst.msk [vmem:[#allocation2 + $0x10] sm:$0xff] %vm762_vm5, %v752_v46 }
 0x4f1   :  { %v754_v49 = vpop.permute.xlu0 %753 }
 0x4f2   :  { %766 = vst.msk [vmem:[#allocation2 + $0x18] sm:$0xff] %vm762_vm5, %v754_v49 }
 0x51e   :  { %v1004_v52 = vpop.permute.xlu0 %1003 }
 0x51f   :  { %1019 = vst.msk [vmem:[#allocation2] sm:$0xff] %vm1018_vm6, %v1004_v52 }
 0x522   :  { %v1006_v31 = vpop.permute.xlu0 %1005 }
 0x523   :  { %1020 = vst.msk [vmem:[#allocation2 + $0x8] sm:$0xff] %vm1018_vm6, %v1006_v31 }
 0x526   :  { %v1008_v12 = vpop.permute.xlu0 %1007 }
 0x527   :  { %1021 = vst.msk [vmem:[#allocation2 + $0x10] sm:$0xff] %vm1018_vm6, %v1008_v12 }
 0x536   :  { %v1260_v51 = vpop.permute.xlu0 %1259 }
 0x537   :  { %1275 = vst.msk [vmem:[#allocation2] sm:$0xff] %vm1274_vm7, %v1260_v51 }
 0x53a   :  { %v1262_v53 = vpop.permute.xlu0 %1261 }
 0x53b   :  { %1276 = vst.msk [vmem:[#allocation2 + $0x8] sm:$0xff] %vm1274_vm7, %v1262_v53 }
 0x53e   :  { %v1010_v3 = vpop.permute.xlu0 %1009  ;;  %v1280_v57 = vld [vmem:[#allocation2] sm:$0xff] }
 0x53f   :  { %1022 = vst.msk [vmem:[#allocation2 + $0x18] sm:$0xff] %vm1018_vm6, %v1010_v3 }
 0x542   :  { %v1266_v20 = vpop.permute.xlu1 %1265  ;;  %v1264_v56 = vpop.permute.xlu0 %1263  ;;  %v1281_v61 = vld [vmem:[#allocation2 + $0x8] sm:$0xff] }
 0x543   :  { %1278 = vst.msk [vmem:[#allocation2 + $0x18] sm:$0xff] %vm1274_vm7, %v1266_v20  ;;  %1277 = vst.msk [vmem:[#allocation2 + $0x10] sm:$0xff] %vm1274_vm7, %v1264_v56  ;;  %v1285_v11 = vpack.c.bf16 %v1281_v61, %v1280_v57 }
 0x545   :  { %3888 = vmatmul.mubr.msk.bf16.vlgmr.msra.gmra.mxu0 %vm98_vm1, %v1285_v11 }
 0x546   :  { %v1012_v5 = vpop.permute.xlu1 %1011  ;;  %v756_v48 = vpop.permute.xlu0 %755  ;;  %3891 = vmatprep.mubr.msk.bf16.mxu0 %vm4418_vm0, %v4417_v1 }
 0x547   :  { %767 = vst.msk [vmem:[#allocation2 + $0x20] sm:$0xff] %vm762_vm5, %v756_v48 }
 0x548   :  { %1023 = vst.msk [vmem:[#allocation2 + $0x20] sm:$0xff] %vm1018_vm6, %v1012_v5 }
 0x54a   :  { %v1282_v7 = vld [vmem:[#allocation2 + $0x10] sm:$0xff]  ;;  %v1283_v18 = vld [vmem:[#allocation2 + $0x18] sm:$0xff] }
 0x54b   :  { %v1286_v9 = vpack.c.bf16 %v1283_v18, %v1282_v7 }
 0x54d   :  { %3892 = vmatmul.mubr.msk.bf16.gmra.mxu0 %vm98_vm1, %v1286_v9 }
 0x54e   :  { %3895 = vmatprep.mubr.msk.bf16.mxu0 %vm4418_vm0, %v4417_v1 }
 0x557   :  { %v1268_v22 = vpop.permute.xlu0 %1267 }
 0x558   :  { %1279 = vst.msk [vmem:[#allocation2 + $0x20] sm:$0xff] %vm1274_vm7, %v1268_v22 }
 0x55f   :  { %v1284_v23 = vld [vmem:[#allocation2 + $0x20] sm:$0xff] }
 0x560   :  { %v1287_v25 = vpack.c.bf16 %v1284_v23, %v1284_v23 }
 0x562   :  { %3896 = vmatmul.mubr.msk.bf16.gmra.mxu0 %vm98_vm1, %v1287_v25 }
 0x563   :  { %3923 = vmatprep.mubr.msk.bf16.mxu0 %vm4418_vm0, %v4417_v1 }
 0x605   :  { %v1347_v16 = vpop.f32.mrf.mxu0 }
 0x606   :  { %v1348_v24 = vadd.f32 %v1347_v16, %v1291_v32  ;;  %v4182_v16 = vld [vmem:[%s5911_s6 + $0x8] sm:$0xff]  }
 0x607   :  { %v3889_v35 = vpop.f32.mrf.mxu0  ;;  %3900 = vmatpush3.bf16.msra.mxu1 %v4182_v16 }
 0x608   :  { %v1369_v26 = vadd.f32 %v4401_v40, %v1348_v24  ;;  %v4183_v24 = vld [vmem:[%s5911_s6] sm:$0xff]   ;;  %3901 = vmatprep.subr.bf16.mxu1 %v4417_v1  ;;  %v4184_v35 = vld [vmem:[%s5912_s7 + $0x18] sm:$0xff]   ;;  %v4185_v40 = vld [vmem:[%s5912_s7 + $0x10] sm:$0xff]  }
 0x609   :  { %v1350_v59 = vpop.f32.mrf.mxu0  ;;  %3916 = vmatpush3.bf16.msra.mxu0 %v4184_v35 }
 0x60a   :  { %v1351_v63 = vadd.f32 %v1350_v59, %v1291_v32  ;;  %v1374_v19 = vsel %vm98_vm1, %v1369_v26, 0.0  ;;  %3917 = vmatprep.subr.bf16.mxu0 %v4417_v1 }
 0x60b   :  { %1375 = vadd.xlane.f32.xlu1 %v1374_v19  ;;  %v3890_v33 = vpop.f32.mrf.mxu0  ;;  %3902 = vmatpush3.bf16.msra.mxu1 %v4183_v24 }
 0x60c   :  { %v1370_v34 = vadd.f32 %v4402_v21, %v1351_v63  ;;  %3935 = vmatprep.subr.bf16.mxu1 %v4417_v1 }
 0x60d   :  { %v1355_v37 = vpop.f32.mrf.mxu0  ;;  %3918 = vmatpush3.bf16.msra.mxu0 %v4185_v40 }
 0x60e   :  { %v1356_v38 = vadd.f32 %v1355_v37, %v1291_v32  ;;  %v1377_v27 = vsel %vm98_vm1, %v1370_v34, 0.0  ;;  %3919 = vmatprep.subr.bf16.mxu0 %v4417_v1 }
 0x60f   :  { %1378 = vadd.xlane.f32.xlu0 %v1377_v27  ;;  %v3893_v62 = vpop.f32.mrf.mxu0 }
 0x610   :  { %v1371_v6 = vadd.f32 %v4403_v41, %v1356_v38  ;;  %v1442_v41 = vsub.s32 5, %v4494_v4 }
 0x611   :  { %v1358_v15 = vpop.f32.mrf.mxu0 }
 0x612   :  { %v1359_v50 = vadd.f32 %v1358_v15, %v1291_v32  ;;  %v1380_v30 = vsel %vm98_vm1, %v1371_v6, 0.0 }
 0x613   :  { %1381 = vadd.xlane.f32.xlu0 %v1380_v30  ;;  %v3894_v55 = vpop.f32.mrf.mxu0 }
 0x614   :  { %v1372_v47 = vadd.f32 %v4404_v29, %v1359_v50  ;;  %v1443_v50 = vrot.slane %v5066_v36, %v1442_v41  ;;  %v1451_v55 = vsub.s32 6, %v4494_v4 }
 0x616   :  { %v1383_v39 = vsel %vm98_vm1, %v1372_v47, 0.0 }
 0x617   :  { %1384 = vadd.xlane.f32.xlu1 %v1383_v39 }
 0x622   :  { %v1363_v42 = vpop.f32.mrf.mxu0 }
 0x623   :  { %v1364_v43 = vadd.f32 %v1363_v42, %v1291_v32  ;;  %v1452_v42 = vrot.slane %v5066_v36, %v1451_v55 }
 0x624   :  { %v3897_v13 = vpop.f32.mrf.mxu0 }
 0x625   :  { %v1373_v58 = vadd.f32 %v4405_v0, %v1364_v43 }
 0x626   :  { %v1366_v28 = vpop.f32.mrf.mxu0 }
 0x627   :  { %v1386_v17 = vsel %vm98_vm1, %v1373_v58, 0.0 }
 0x628   :  { %1387 = vadd.xlane.f32.xlu0 %v1386_v17  ;;  %v3898_v44 = vpop.f32.mrf.mxu0 }
 0x694   :  { %v1376_v60 = vpop.xlane.xlu1 %1375 }
 0x695   :  { %v1390_v54 = vmul.f32 0.03125, %v1376_v60 }
 0x697   :  { %v1395_v2 = vsub.f32 %v1369_v26, %v1390_v54 }
 0x698   :  { %v1379_v46 = vpop.xlane.xlu0 %1378 }
 0x699   :  { %v1391_v49 = vmul.f32 0.03125, %v1379_v46  ;;  %v1400_v52 = vmul.f32 %v1395_v2, %v1395_v2 }
 0x69b   :  { %v1396_v31 = vsub.f32 %v1370_v34, %v1391_v49  ;;  %v1405_v12 = vsel %vm98_vm1, %v1400_v52, 0.0 }
 0x69c   :  { %v1382_v51 = vpop.xlane.xlu0 %1381  ;;  %1406 = vadd.xlane.f32.xlu1 %v1405_v12 }
 0x69d   :  { %v1392_v53 = vmul.f32 0.03125, %v1382_v51  ;;  %v1401_v3 = vmul.f32 %v1396_v31, %v1396_v31 }
 0x69f   :  { %v1397_v20 = vsub.f32 %v1371_v6, %v1392_v53  ;;  %v1408_v56 = vsel %vm98_vm1, %v1401_v3, 0.0 }
 0x6a0   :  { %v1385_v57 = vpop.xlane.xlu1 %1384  ;;  %1409 = vadd.xlane.f32.xlu0 %v1408_v56 }
 0x6a1   :  { %v1393_v61 = vmul.f32 0.03125, %v1385_v57  ;;  %v1402_v11 = vmul.f32 %v1397_v20, %v1397_v20 }
 0x6a3   :  { %v1398_v5 = vsub.f32 %v1372_v47, %v1393_v61  ;;  %v1411_v48 = vsel %vm98_vm1, %v1402_v11, 0.0  ;;  %v4186_v61 = vld [vmem:[%s5912_s7 + $0x8] sm:$0xff]   ;;  %v4187_v11 = vld [vmem:[%s5912_s7] sm:$0xff]  }
 0x6a4   :  { %1412 = vadd.xlane.f32.xlu1 %v1411_v48  ;;  %3920 = vmatpush3.bf16.msra.mxu0 %v4186_v61 }
 0x6a5   :  { %v1403_v7 = vmul.f32 %v1398_v5, %v1398_v5  ;;  %3921 = vmatprep.subr.bf16.mxu0 %v4417_v1 }
 0x6a7   :  { %v1414_v18 = vsel %vm98_vm1, %v1403_v7, 0.0 }
 0x6a8   :  { %1415 = vadd.xlane.f32.xlu0 %v1414_v18  ;;  %3922 = vmatpush3.bf16.msra.mxu0 %v4187_v11 }
 0x6a9   :  { %3951 = vmatprep.subr.bf16.mxu0 %v4417_v1 }
 0x6b1   :  { %v1388_v9 = vpop.xlane.xlu0 %1387 }
 0x6b2   :  { %v1394_v22 = vmul.f32 0.03125, %v1388_v9 }
 0x6b4   :  { %v5095_v23 = vsub.f32 %v1373_v58, %v1394_v22 }
 0x6b6   :  { %v1404_v25 = vmul.f32 %v5095_v23, %v5095_v23 }
 0x6b8   :  { %v1417_v32 = vsel %vm98_vm1, %v1404_v25, 0.0 }
 0x6b9   :  { %1418 = vadd.xlane.f32.xlu1 %v1417_v32 }
 0x725   :  { %v1407_v26 = vpop.xlane.xlu1 %1406 }
 0x726   :  { %v1420_v59 = vmul.f32 0.03125, %v1407_v26 }
 0x728   :  { %v1425_v63 = vadd.f32 1e-05, %v1420_v59 }
 0x729   :  { %v1410_v19 = vpop.xlane.xlu0 %1409 }
 0x72a   :  { %4280 = vrsqrt.f32 %v1425_v63  ;;  %v1421_v33 = vmul.f32 0.03125, %v1410_v19 }
 0x72c   :  { %v1426_v21 = vadd.f32 1e-05, %v1421_v33 }
 0x72d   :  { %v1413_v34 = vpop.xlane.xlu1 %1412 }
 0x72e   :  { %4282 = vrsqrt.f32 %v1426_v21  ;;  %v1422_v37 = vmul.f32 0.03125, %v1413_v34 }
 0x730   :  { %v1427_v38 = vadd.f32 1e-05, %v1422_v37 }
 0x731   :  { %v1416_v27 = vpop.xlane.xlu0 %1415 }
 0x732   :  { %4284 = vrsqrt.f32 %v1427_v38  ;;  %v1423_v62 = vmul.f32 0.03125, %v1416_v27 }
 0x734   :  { %v1428_v6 = vadd.f32 1e-05, %v1423_v62 }
 0x736   :  { %4286 = vrsqrt.f32 %v1428_v6 }
 0x737   :  { %v4281_v15 = vpop.eup %4280 }
 0x738   :  { %v1435_v30 = vmul.f32 %v4281_v15, %v1395_v2 }
 0x73a   :  { %v1444_v47 = vmul.f32 %v1443_v50, %v1435_v30 }
 0x73b   :  { %v4283_v29 = vpop.eup %4282 }
 0x73c   :  { %v1436_v39 = vmul.f32 %v4283_v29, %v1396_v31  ;;  %v5124_v0 = vadd.f32 %v1452_v42, %v1444_v47 }
 0x73e   :  { %v1445_v43 = vmul.f32 %v1443_v50, %v1436_v39 }
 0x73f   :  { %v4285_v13 = vpop.eup %4284 }
 0x740   :  { %v5126_v58 = vadd.f32 %v1452_v42, %v1445_v43  ;;  %v1437_v28 = vmul.f32 %v4285_v13, %v1397_v20 }
 0x742   :  { %v1419_v17 = vpop.xlane.xlu1 %1418  ;;  %v1458_v44 = vpack.c.bf16 %v5126_v58, %v5124_v0  ;;  %v1446_v46 = vmul.f32 %v1443_v50, %v1437_v28 }
 0x743   :  { %v4287_v60 = vpop.eup %4286  ;;  %v1424_v54 = vmul.f32 0.03125, %v1419_v17 }
 0x744   :  { %3904 = vmatmul.mubr.msk.bf16.vlgmr.msra.gmra.mxu1 %vm98_vm1, %v1458_v44  ;;  %v1438_v2 = vmul.f32 %v4287_v60, %v1398_v5  ;;  %v5133_v31 = vadd.f32 %v1452_v42, %v1446_v46  ;;  %v3463_v5 = vld [vmem:[%s5913_s9] ss:$0 sm:$0xff] }
 0x745   :  { %v1429_v49 = vadd.f32 1e-05, %v1424_v54  ;;  %3907 = vmatprep.mubr.msk.bf16.mxu1 %vm4418_vm0, %v4417_v1 }
 0x746   :  { %v1447_v52 = vmul.f32 %v1443_v50, %v1438_v2 }
 0x747   :  { %4288 = vrsqrt.f32 %v1429_v49 }
 0x748   :  { %v5135_v12 = vadd.f32 %v1452_v42, %v1447_v52 }
 0x74a   :  { %v1459_v51 = vpack.c.bf16 %v5135_v12, %v5133_v31 }
 0x74c   :  { %3908 = vmatmul.mubr.msk.bf16.gmra.mxu1 %vm98_vm1, %v1459_v51 }
 0x74d   :  { %3911 = vmatprep.mubr.msk.bf16.mxu1 %vm4418_vm0, %v4417_v1 }
 0x754   :  { %v4289_v53 = vpop.eup %4288 }
 0x755   :  { %v1439_v3 = vmul.f32 %v4289_v53, %v5095_v23 }
 0x757   :  { %v1448_v20 = vmul.f32 %v1443_v50, %v1439_v3  ;;  %v1554_v50 = vsub.s32 4, %v4494_v4 }
 0x759   :  { %v5143_v56 = vadd.f32 %v1452_v42, %v1448_v20  ;;  %v1555_v30 = vrot.slane %v5066_v36, %v1554_v50 }
 0x75b   :  { %v1460_v57 = vpack.c.bf16 %v5143_v56, %v5143_v56 }
 0x75d   :  { %3912 = vmatmul.mubr.msk.bf16.gmra.mxu1 %vm98_vm1, %v1460_v57 }
 0x75e   :  { %3939 = vmatprep.mubr.msk.bf16.mxu1 %vm4418_vm0, %v4417_v1 }
 0x804   :  { %v1522_v48 = vpop.f32.mrf.mxu1 }
 0x805   :  { %v1523_v18 = vadd.f32 %v3463_v5, %v1522_v48 }
 0x806   :  { %v3905_v7 = vpop.f32.mrf.mxu1 }
 0x807   :  { %v1544_v25 = vmax.f32 %v1523_v18, 0.0 }
 0x808   :  { %v1525_v9 = vpop.f32.mrf.mxu1 }
 0x809   :  { %v1526_v22 = vadd.f32 %v3463_v5, %v1525_v9 }
 0x80a   :  { %v3906_v23 = vpop.f32.mrf.mxu1 }
 0x80b   :  { %v1545_v32 = vmax.f32 %v1526_v22, 0.0 }
 0x80c   :  { %v1530_v16 = vpop.f32.mrf.mxu1 }
 0x80d   :  { %v1549_v24 = vpack.c.bf16 %v1545_v32, %v1544_v25  ;;  %v1531_v40 = vadd.f32 %v3463_v5, %v1530_v16 }
 0x80e   :  { %v3909_v35 = vpop.f32.mrf.mxu1 }
 0x80f   :  { %3924 = vmatmul.mubr.msk.bf16.vlgmr.msra.gmra.mxu0 %vm1580_vm8, %v1549_v24  ;;  %v1546_v19 = vmax.f32 %v1531_v40, 0.0 }
 0x810   :  { %v1533_v26 = vpop.f32.mrf.mxu1  ;;  %3927 = vmatprep.mubr.msk.bf16.mxu0 %vm4418_vm0, %v4417_v1 }
 0x811   :  { %v1534_v59 = vadd.f32 %v3463_v5, %v1533_v26 }
 0x812   :  { %v3910_v63 = vpop.f32.mrf.mxu1 }
 0x813   :  { %v1547_v33 = vmax.f32 %v1534_v59, 0.0 }
 0x815   :  { %v1550_v21 = vpack.c.bf16 %v1547_v33, %v1546_v19 }
 0x817   :  { %3928 = vmatmul.mubr.msk.bf16.gmra.mxu0 %vm1580_vm8, %v1550_v21 }
 0x818   :  { %3931 = vmatprep.mubr.msk.bf16.mxu0 %vm4418_vm0, %v4417_v1 }
 0x81d   :  { %v1538_v34 = vpop.f32.mrf.mxu1 }
 0x81e   :  { %v1539_v37 = vadd.f32 %v3463_v5, %v1538_v34 }
 0x81f   :  { %v3913_v38 = vpop.f32.mrf.mxu1 }
 0x820   :  { %v1548_v27 = vmax.f32 %v1539_v37, 0.0 }
 0x821   :  { %v1541_v62 = vpop.f32.mrf.mxu1 }
 0x822   :  { %v1551_v6 = vpack.c.bf16 %v1548_v27, %v1548_v27 }
 0x823   :  { %v3914_v15 = vpop.f32.mrf.mxu1 }
 0x824   :  { %3932 = vmatmul.mubr.msk.bf16.gmra.mxu0 %vm1580_vm8, %v1551_v6  ;;  %v5208_v15 = vld [vmem:[%s5907_s8 + $0x10] sm:$0xff] }
 0x825   :  { %3955 = vmatprep.mubr.msk.bf16.mxu0 %vm4418_vm0, %v4417_v1 }
 0x8cf   :  { %v1624_v29 = vpop.f32.mrf.mxu0 }
 0x8d0   :  { %v1625_v47 = vadd.f32 %v1624_v29, %v1555_v30  ;;  %v4190_v29 = vld [vmem:[%s5908_s4 + $0x18] sm:$0xff]  }
 0x8d1   :  { %v3925_v39 = vpop.f32.mrf.mxu0  ;;  %3952 = vmatpush3.bf16.msra.mxu0 %v4190_v29 }
 0x8d2   :  { %v1646_v42 = vadd.f32 %v1625_v47, %v5124_v0  ;;  %v4188_v47 = vld [vmem:[%s5904_s3 + $0x18] sm:$0xff]   ;;  %3953 = vmatprep.subr.bf16.mxu0 %v4417_v1  ;;  %v4191_v39 = vld [vmem:[%s5908_s4 + $0x10] sm:$0xff]  }
 0x8d3   :  { %v1627_v43 = vpop.f32.mrf.mxu0  ;;  %3936 = vmatpush3.bf16.msra.mxu1 %v4188_v47  ;;  %v4410_v47 = vld [vmem:[%s5906_s1 + $0x20] sm:$0xff] }
 0x8d4   :  { %v1628_v13 = vadd.f32 %v1627_v43, %v1555_v30  ;;  %v1651_v28 = vsel %vm98_vm1, %v1646_v42, 0.0  ;;  %3937 = vmatprep.subr.bf16.mxu1 %v4417_v1 }
 0x8d5   :  { %1652 = vadd.xlane.f32.xlu0 %v1651_v28  ;;  %v3926_v17 = vpop.f32.mrf.mxu0  ;;  %3954 = vmatpush3.bf16.msra.mxu0 %v4191_v39 }
 0x8d6   :  { %v1647_v44 = vadd.f32 %v1628_v13, %v5126_v58  ;;  %3985 = vmatprep.subr.bf16.mxu0 %v4417_v1 }
 0x8d7   :  { %v1632_v60 = vpop.f32.mrf.mxu0 }
 0x8d8   :  { %v1633_v54 = vadd.f32 %v1632_v60, %v1555_v30  ;;  %v1654_v2 = vsel %vm98_vm1, %v1647_v44, 0.0 }
 0x8d9   :  { %1655 = vadd.xlane.f32.xlu1 %v1654_v2  ;;  %v3929_v46 = vpop.f32.mrf.mxu0 }
 0x8da   :  { %v1648_v49 = vadd.f32 %v1633_v54, %v5133_v31 }
 0x8db   :  { %v1635_v52 = vpop.f32.mrf.mxu0 }
 0x8dc   :  { %v1636_v51 = vadd.f32 %v1635_v52, %v1555_v30  ;;  %v1657_v0 = vsel %vm98_vm1, %v1648_v49, 0.0 }
 0x8dd   :  { %1658 = vadd.xlane.f32.xlu0 %v1657_v0  ;;  %v3930_v53 = vpop.f32.mrf.mxu0 }
 0x8de   :  { %v1649_v3 = vadd.f32 %v1636_v51, %v5135_v12 }
 0x8e0   :  { %v1660_v20 = vsel %vm98_vm1, %v1649_v3, 0.0 }
 0x8e1   :  { %1661 = vadd.xlane.f32.xlu1 %v1660_v20 }
 0x8e4   :  { %v1640_v58 = vpop.f32.mrf.mxu0 }
 0x8e5   :  { %v1641_v57 = vadd.f32 %v1640_v58, %v1555_v30  ;;  %v1865_v30 = vrot.slane %v5208_v15, %v175_v10  ;;  %v4189_v10 = vld [vmem:[%s5904_s3 + $0x10] sm:$0xff]  }
 0x8e6   :  { %v3933_v61 = vpop.f32.mrf.mxu0  ;;  %3938 = vmatpush3.bf16.msra.mxu1 %v4189_v10 }
 0x8e7   :  { %v1650_v11 = vadd.f32 %v1641_v57, %v5143_v56  ;;  %3967 = vmatprep.subr.bf16.mxu1 %v4417_v1  ;;  %v3476_v61 = vld [vmem:[%s5907_s8 + $0x8] ss:$0 sm:$0xff] }
 0x8e8   :  { %v1643_v5 = vpop.f32.mrf.mxu0 }
 0x8e9   :  { %v1663_v48 = vsel %vm98_vm1, %v1650_v11, 0.0 }
 0x8ea   :  { %1664 = vadd.xlane.f32.xlu0 %v1663_v48  ;;  %v3934_v31 = vpop.f32.mrf.mxu0 }
 0x95e   :  { %v1653_v7 = vpop.xlane.xlu0 %1652 }
 0x95f   :  { %v1666_v18 = vmul.f32 0.03125, %v1653_v7 }
 0x961   :  { %v1671_v9 = vsub.f32 %v1646_v42, %v1666_v18 }
 0x962   :  { %v1656_v22 = vpop.xlane.xlu1 %1655 }
 0x963   :  { %v1667_v23 = vmul.f32 0.03125, %v1656_v22  ;;  %v1676_v25 = vmul.f32 %v1671_v9, %v1671_v9 }
 0x965   :  { %v5184_v12 = vsub.f32 %v1647_v44, %v1667_v23  ;;  %v1681_v32 = vsel %vm98_vm1, %v1676_v25, 0.0  ;;  %v4406_v23 = vld [vmem:[%s5906_s1] sm:$0xff] }
 0x966   :  { %v1659_v16 = vpop.xlane.xlu0 %1658  ;;  %1682 = vadd.xlane.f32.xlu1 %v1681_v32 }
 0x967   :  { %v1668_v24 = vmul.f32 0.03125, %v1659_v16  ;;  %v1677_v56 = vmul.f32 %v5184_v12, %v5184_v12 }
 0x969   :  { %v5189_v35 = vsub.f32 %v1648_v49, %v1668_v24  ;;  %v1684_v40 = vsel %vm98_vm1, %v1677_v56, 0.0  ;;  %v1718_v49 = vsub.s32 7, %v4494_v4 }
 0x96a   :  { %v1662_v26 = vpop.xlane.xlu1 %1661  ;;  %1685 = vadd.xlane.f32.xlu0 %v1684_v40 }
 0x96b   :  { %v1669_v59 = vmul.f32 0.03125, %v1662_v26  ;;  %v1678_v63 = vmul.f32 %v5189_v35, %v5189_v35  ;;  %v1719_v0 = vrot.slane %v5066_v36, %v1718_v49 }
 0x96d   :  { %v5194_v19 = vsub.f32 %v1649_v3, %v1669_v59  ;;  %v1687_v33 = vsel %vm98_vm1, %v1678_v63, 0.0 }
 0x96e   :  { %1688 = vadd.xlane.f32.xlu1 %v1687_v33 }
 0x96f   :  { %v1679_v21 = vmul.f32 %v5194_v19, %v5194_v19 }
 0x971   :  { %v1690_v34 = vsel %vm98_vm1, %v1679_v21, 0.0  ;;  %v4409_v21 = vld [vmem:[%s5906_s1 + $0x18] sm:$0xff] }
 0x972   :  { %1691 = vadd.xlane.f32.xlu0 %v1690_v34 }
 0x973   :  { %v1665_v37 = vpop.xlane.xlu0 %1664 }
 0x974   :  { %v1670_v38 = vmul.f32 0.03125, %v1665_v37 }
 0x976   :  { %v5200_v27 = vsub.f32 %v1650_v11, %v1670_v38 }
 0x978   :  { %v1680_v62 = vmul.f32 %v5200_v27, %v5200_v27 }
 0x97a   :  { %v1693_v6 = vsel %vm98_vm1, %v1680_v62, 0.0 }
 0x97b   :  { %1694 = vadd.xlane.f32.xlu1 %v1693_v6 }
 0x988   :  { %1867 = vrot.lane.b32.xlu0 %v1865_v30, %s4419_s15 }
 0x9ef   :  { %v1683_v42 = vpop.xlane.xlu1 %1682 }
 0x9f0   :  { %v1696_v43 = vmul.f32 0.03125, %v1683_v42 }
 0x9f2   :  { %v1701_v13 = vadd.f32 1e-05, %v1696_v43 }
 0x9f3   :  { %v1686_v28 = vpop.xlane.xlu0 %1685 }
 0x9f4   :  { %4290 = vrsqrt.f32 %v1701_v13  ;;  %v1697_v17 = vmul.f32 0.03125, %v1686_v28 }
 0x9f6   :  { %v1702_v44 = vadd.f32 1e-05, %v1697_v17 }
 0x9f7   :  { %v1689_v60 = vpop.xlane.xlu1 %1688 }
 0x9f8   :  { %4292 = vrsqrt.f32 %v1702_v44  ;;  %v1698_v54 = vmul.f32 0.03125, %v1689_v60 }
 0x9fa   :  { %v1703_v2 = vadd.f32 1e-05, %v1698_v54 }
 0x9fb   :  { %v1692_v46 = vpop.xlane.xlu0 %1691 }
 0x9fc   :  { %4294 = vrsqrt.f32 %v1703_v2  ;;  %v1699_v52 = vmul.f32 0.03125, %v1692_v46 }
 0x9fe   :  { %v1704_v51 = vadd.f32 1e-05, %v1699_v52 }
 0x9ff   :  { %v1868_v13 = vpop.permute.xlu0 %1867 }
 0xa00   :  { %4296 = vrsqrt.f32 %v1704_v51 }
 0xa01   :  { %v4291_v53 = vpop.eup %4290 }
 0xa02   :  { %v1711_v3 = vmul.f32 %v4291_v53, %v1671_v9 }
 0xa04   :  { %v1720_v20 = vmul.f32 %v1719_v0, %v1711_v3  ;;  %v1695_v58 = vpop.xlane.xlu1 %1694 }
 0xa05   :  { %v4293_v57 = vpop.eup %4292  ;;  %v1700_v11 = vmul.f32 0.03125, %v1695_v58 }
 0xa06   :  { %v1712_v5 = vmul.f32 %v4293_v57, %v5184_v12  ;;  %v5238_v31 = vadd.f32 %v3476_v61, %v1720_v20  ;;  %v4407_v12 = vld [vmem:[%s5906_s1 + $0x8] sm:$0xff] }
 0xa07   :  { %v1705_v48 = vadd.f32 1e-05, %v1700_v11 }
 0xa08   :  { %v1721_v7 = vmul.f32 %v1719_v0, %v1712_v5  ;;  %v1768_v25 = vadd.f32 %v4406_v23, %v5238_v31 }
 0xa09   :  { %v4295_v18 = vpop.eup %4294  ;;  %4298 = vrsqrt.f32 %v1705_v48  ;;  %v1881_v48 = vrot.slane %v5208_v15, %v191_v8 }
 0xa0a   :  { %v5240_v36 = vadd.f32 %v3476_v61, %v1721_v7  ;;  %v1713_v9 = vmul.f32 %v4295_v18, %v5189_v35 }
 0xa0c   :  { %v1875_v22 = vpack.c.bf16 %v5240_v36, %v5238_v31  ;;  %v1769_v32 = vadd.f32 %v4407_v12, %v5240_v36  ;;  %v1722_v16 = vmul.f32 %v1719_v0, %v1713_v9 }
 0xa0d   :  { %v4297_v24 = vpop.eup %4296 }
 0xa0e   :  { %v1714_v56 = vmul.f32 %v4297_v24, %v5194_v19  ;;  %3956 = vmatmul.mubr.msk.bf16.vlgmr.msra.gmra.mxu0 %vm98_vm1, %v1875_v22  ;;  %v1773_v35 = vpack.c.bf16 %v1769_v32, %v1768_v25  ;;  %v5258_v26 = vadd.f32 %v3476_v61, %v1722_v16  ;;  %v4408_v19 = vld [vmem:[%s5906_s1 + $0x10] sm:$0xff] }
 0xa0f   :  { %3959 = vmatprep.mubr.msk.bf16.mxu0 %vm4418_vm0, %v4417_v1 }
 0xa10   :  { %3940 = vmatmul.mubr.msk.bf16.vlgmr.msra.gmra.mxu1 %vm98_vm1, %v1773_v35  ;;  %v1723_v40 = vmul.f32 %v1719_v0, %v1714_v56  ;;  %v1770_v33 = vadd.f32 %v4408_v19, %v5258_v26 }
 0xa11   :  { %3943 = vmatprep.mubr.msk.bf16.mxu1 %vm4418_vm0, %v4417_v1 }
 0xa12   :  { %v5262_v59 = vadd.f32 %v3476_v61, %v1723_v40 }
 0xa14   :  { %v1876_v63 = vpack.c.bf16 %v5262_v59, %v5258_v26  ;;  %v1771_v34 = vadd.f32 %v4409_v21, %v5262_v59 }
 0xa16   :  { %v4299_v37 = vpop.eup %4298  ;;  %3960 = vmatmul.mubr.msk.bf16.gmra.mxu0 %vm98_vm1, %v1876_v63  ;;  %v1774_v38 = vpack.c.bf16 %v1771_v34, %v1770_v33 }
 0xa17   :  { %3963 = vmatprep.mubr.msk.bf16.mxu0 %vm4418_vm0, %v4417_v1  ;;  %v1715_v62 = vmul.f32 %v4299_v37, %v5200_v27 }
 0xa18   :  { %3944 = vmatmul.mubr.msk.bf16.gmra.mxu1 %vm98_vm1, %v1774_v38 }
 0xa19   :  { %v1724_v6 = vmul.f32 %v1719_v0, %v1715_v62  ;;  %3947 = vmatprep.mubr.msk.bf16.mxu1 %vm4418_vm0, %v4417_v1 }
 0xa1b   :  { %v5281_v30 = vadd.f32 %v3476_v61, %v1724_v6  ;;  %v1856_v61 = vrot.slane %v5208_v15, %v166_v45 }
 0xa1d   :  { %v1877_v29 = vpack.c.bf16 %v5281_v30, %v5281_v30  ;;  %v1772_v39 = vadd.f32 %v4410_v47, %v5281_v30 }
 0xa1f   :  { %3964 = vmatmul.mubr.msk.bf16.gmra.mxu0 %vm98_vm1, %v1877_v29  ;;  %v1775_v27 = vpack.c.bf16 %v1772_v39, %v1772_v39 }
 0xa20   :  { %3991 = vmatprep.mubr.msk.bf16.mxu0 %vm4418_vm0, %v4417_v1 }
 0xa21   :  { %3948 = vmatmul.mubr.msk.bf16.gmra.mxu1 %vm98_vm1, %v1775_v27 }
 0xa22   :  { %3973 = vmatprep.mubr.msk.bf16.mxu1 %vm4418_vm0, %v4417_v1 }
 0xace   :  { %v1937_v10 = vpop.f32.mrf.mxu0 }
 0xacf   :  { %v1938_v47 = vadd.f32 %v1937_v10, %v1881_v48 }
 0xad0   :  { %v1831_v42 = vpop.f32.mrf.mxu1  ;;  %v3957_v43 = vpop.f32.mrf.mxu0 }
 0xad1   :  { %v1870_v54 = vadd.f32 %v1868_v13, %v1831_v42  ;;  %v1857_v25 = vadd.f32 %v1856_v61, %v1831_v42 }
 0xad2   :  { %v3941_v28 = vpop.f32.mrf.mxu1  ;;  %v1940_v17 = vpop.f32.mrf.mxu0 }
 0xad3   :  { %v1941_v37 = vadd.f32 %v1940_v17, %v1881_v48 }
 0xad4   :  { %v1834_v44 = vpop.f32.mrf.mxu1  ;;  %v3958_v60 = vpop.f32.mrf.mxu0 }
 0xad5   :  { %v1871_v2 = vadd.f32 %v1868_v13, %v1834_v44  ;;  %v1858_v18 = vadd.f32 %v1856_v61, %v1834_v44  ;;  %v5319_v39 = vpack.c.bf16 %v1941_v37, %v1938_v47 }
 0xad6   :  { %v3942_v46 = vpop.f32.mrf.mxu1  ;;  %v1945_v52 = vpop.f32.mrf.mxu0 }
 0xad7   :  { %v5295_v51 = vpack.c.bf16 %v1871_v2, %v1870_v54  ;;  %v1959_v45 = vpack.c.bf16 %v1858_v18, %v1857_v25  ;;  %v1946_v15 = vadd.f32 %v1945_v52, %v1881_v48 }
 0xad8   :  { %v1839_v0 = vpop.f32.mrf.mxu1  ;;  %v3961_v53 = vpop.f32.mrf.mxu0 }
 0xad9   :  { %1971 = vrot.lane.b32.xlu0 %v5295_v51, %s4420_s24  ;;  %v1872_v11 = vadd.f32 %v1868_v13, %v1839_v0  ;;  %v1859_v33 = vadd.f32 %v1856_v61, %v1839_v0 }
 0xada   :  { %v3945_v3 = vpop.f32.mrf.mxu1  ;;  %v1948_v20 = vpop.f32.mrf.mxu0 }
 0xadb   :  { %v1949_v56 = vadd.f32 %v1948_v20, %v1881_v48 }
 0xadc   :  { %v1842_v58 = vpop.f32.mrf.mxu1  ;;  %v3962_v57 = vpop.f32.mrf.mxu0 }
 0xadd   :  { %v1873_v5 = vadd.f32 %v1868_v13, %v1842_v58  ;;  %v1860_v35 = vadd.f32 %v1856_v61, %v1842_v58  ;;  %v5313_v38 = vpack.c.bf16 %v1949_v56, %v1946_v15 }
 0xade   :  { %v3946_v7 = vpop.f32.mrf.mxu1 }
 0xadf   :  { %v1963_v9 = vpack.c.bf16 %v1873_v5, %v1872_v11  ;;  %v1953_v22 = vpop.f32.mrf.mxu0  ;;  %v1960_v62 = vpack.c.bf16 %v1860_v35, %v1859_v33 }
 0xae0   :  { %v1954_v23 = vadd.f32 %v1953_v22, %v1881_v48 }
 0xae1   :  { %v1847_v12 = vpop.f32.mrf.mxu1  ;;  %2203 = vrot.lane.b32.xlu0 %v1963_v9, %s4421_s25  ;;  %v3965_v32 = vpop.f32.mrf.mxu0 }
 0xae2   :  { %v5306_v16 = vpack.c.bf16 %v1954_v23, %v1954_v23  ;;  %v1874_v24 = vadd.f32 %v1868_v13, %v1847_v12  ;;  %v1861_v6 = vadd.f32 %v1856_v61, %v1847_v12 }
 0xae3   :  { %v3949_v40 = vpop.f32.mrf.mxu1  ;;  %v1956_v63 = vpop.f32.mrf.mxu0 }
 0xae4   :  { %v1964_v19 = vpack.c.bf16 %v1874_v24, %v1874_v24  ;;  %v2129_v8 = vsel %vm441_vm3, %v5306_v16, 0  ;;  %v1961_v27 = vpack.c.bf16 %v1861_v6, %v1861_v6  ;;  %v5406_v63 = vld [vmem:[%s5909_s2] sm:$0xff] }
 0xae5   :  { %v1850_v21 = vpop.f32.mrf.mxu1  ;;  %2195 = vrot.lane.b32.xlu0 %v1959_v45, %s4422_s26  ;;  %v3966_v34 = vpop.f32.mrf.mxu0  ;;  %3986 = vmatpush3.bf16.msra.mxu0 %v2129_v8 }
 0xae6   :  { %1975 = vrot.lane.b32.xlu1 %v1964_v19, %s4420_s24  ;;  %3987 = vmatprep.subr.bf16.mxu0 %v4417_v1  ;;  %v5416_v34 = vld [vmem:[%s5909_s2 + $0x8] sm:$0xff] }
 0xae7   :  { %v3950_v29 = vpop.f32.mrf.mxu1 }
 0xae9   :  { %2197 = vrot.lane.b32.xlu0 %v1960_v62, %s4422_s26  ;;  %3988 = vmatpush3.bf16.msra.mxu0 %v5313_v38 }
 0xaea   :  { %1973 = vrot.lane.b32.xlu1 %v1963_v9, %s4420_s24  ;;  %3989 = vmatprep.subr.bf16.mxu0 %v4417_v1 }
 0xaed   :  { %2199 = vrot.lane.b32.xlu0 %v1961_v27, %s4422_s26  ;;  %3990 = vmatpush3.bf16.msra.mxu0 %v5319_v39 }
 0xaee   :  { %2205 = vrot.lane.b32.xlu1 %v1964_v19, %s4421_s25  ;;  %4021 = vmatprep.subr.bf16.mxu0 %v4417_v1 }
 0xaf1   :  { %2453 = vrot.lane.b32.xlu0 %v1959_v45, %s4424_s28 }
 0xaf2   :  { %2201 = vrot.lane.b32.xlu1 %v5295_v51, %s4421_s25 }
 0xaf5   :  { %2455 = vrot.lane.b32.xlu0 %v1960_v62, %s4424_s28 }
 0xaf6   :  { %2463 = vrot.lane.b32.xlu1 %v1964_v19, %s4423_s27 }
 0xaf9   :  { %2457 = vrot.lane.b32.xlu0 %v1961_v27, %s4424_s28 }
 0xafa   :  { %2461 = vrot.lane.b32.xlu1 %v1963_v9, %s4423_s27 }
 0xafd   :  { %2708 = vrot.lane.b32.xlu0 %v1959_v45, %s4426_s30 }
 0xafe   :  { %2459 = vrot.lane.b32.xlu1 %v5295_v51, %s4423_s27 }
 0xb01   :  { %2712 = vrot.lane.b32.xlu0 %v1961_v27, %s4426_s30 }
 0xb02   :  { %2718 = vrot.lane.b32.xlu1 %v1964_v19, %s4425_s29 }
 0xb05   :  { %2356 = vrot.lane.b32.xlu0 %v5306_v16, %s4422_s26 }
 0xb06   :  { %2716 = vrot.lane.b32.xlu1 %v1963_v9, %s4425_s29 }
 0xb0a   :  { %2714 = vrot.lane.b32.xlu1 %v5295_v51, %s4425_s29 }
 0xb0e   :  { %2710 = vrot.lane.b32.xlu1 %v1960_v62, %s4426_s30 }
 0xb4b   :  { %v1972_v28 = vpop.permute.xlu0 %1971 }
 0xb4c   :  { %v1987_v17 = vsel %vm288_vm2, %v1972_v28, 0 }
 0xb53   :  { %v2204_v54 = vpop.permute.xlu0 %2203 }
 0xb54   :  { %v2220_v2 = vsel %vm288_vm2, %v2204_v54, 0 }
 0xb57   :  { %v2196_v0 = vpop.permute.xlu0 %2195 }
 0xb58   :  { %v1976_v10 = vpop.permute.xlu1 %1975 }
 0xb59   :  { %v1993_v42 = vsel %vm288_vm2, %v1976_v10, 0 }
 0xb5a   :  { %3968 = vmatpush3.bf16.xpose.msra.mxu1 %v1993_v42 }
 0xb5b   :  { %3969 = vmatprep.subr.bf16.mxu1 %v4417_v1  ;;  %v2198_v20 = vpop.permute.xlu0 %2197 }
 0xb5c   :  { %v1974_v43 = vpop.permute.xlu1 %1973 }
 0xb5d   :  { %v1990_v13 = vsel %vm288_vm2, %v1974_v43, 0 }
 0xb5f   :  { %v2200_v61 = vpop.permute.xlu0 %2199 }
 0xb60   :  { %v2206_v44 = vpop.permute.xlu1 %2205 }
 0xb61   :  { %v2223_v60 = vsel %vm288_vm2, %v2206_v44, 0 }
 0xb62   :  { %3970 = vmatpush3.bf16.xpose.msra.mxu1 %v1990_v13 }
 0xb63   :  { %3971 = vmatprep.subr.bf16.mxu1 %v4417_v1  ;;  %v2454_v48 = vpop.permute.xlu0 %2453 }
 0xb64   :  { %v2202_v46 = vpop.permute.xlu1 %2201 }
 0xb65   :  { %v2217_v52 = vsel %vm288_vm2, %v2202_v46, 0 }
 0xb67   :  { %v2456_v9 = vpop.permute.xlu0 %2455 }
 0xb68   :  { %v2464_v51 = vpop.permute.xlu1 %2463 }
 0xb69   :  { %v2481_v53 = vsel %vm288_vm2, %v2464_v51, 0 }
 0xb6a   :  { %3972 = vmatpush3.bf16.xpose.msra.mxu1 %v1987_v17  ;;  %v5436_v17 = vld [vmem:[%s5909_s2 + $0x18] sm:$0xff] }
 0xb6b   :  { %4003 = vmatprep.subr.bf16.mxu1 %v4417_v1  ;;  %v2458_v25 = vpop.permute.xlu0 %2457 }
 0xb6c   :  { %v2462_v3 = vpop.permute.xlu1 %2461 }
 0xb6d   :  { %v2478_v58 = vsel %vm288_vm2, %v2462_v3, 0 }
 0xb6f   :  { %v2709_v32 = vpop.permute.xlu0 %2708 }
 0xb70   :  { %v2460_v57 = vpop.permute.xlu1 %2459 }
 0xb71   :  { %3974 = vmatmul.mubr.msk.bf16.vlgmr.msra.gmra.mxu1 %vm288_vm2, %v1959_v45  ;;  %v2475_v11 = vsel %vm288_vm2, %v2460_v57, 0 }
 0xb72   :  { %4004 = vmatpush3.bf16.xpose.msra.mxu1 %v2223_v60  ;;  %3977 = vmatprep.mubr.msk.bf16.mxu1 %vm4418_vm0, %v4417_v1 }
 0xb73   :  { %4005 = vmatprep.subr.bf16.mxu1 %v4417_v1  ;;  %v2713_v45 = vpop.permute.xlu0 %2712 }
 0xb74   :  { %v2719_v5 = vpop.permute.xlu1 %2718 }
 0xb75   :  { %v2736_v7 = vsel %vm288_vm2, %v2719_v5, 0 }
 0xb78   :  { %v2717_v18 = vpop.permute.xlu1 %2716 }
 0xb79   :  { %3978 = vmatmul.mubr.msk.bf16.gmra.mxu1 %vm288_vm2, %v1960_v62  ;;  %v2733_v22 = vsel %vm288_vm2, %v2717_v18, 0 }
 0xb7a   :  { %4006 = vmatpush3.bf16.xpose.msra.mxu1 %v2220_v2  ;;  %3981 = vmatprep.mubr.msk.bf16.mxu1 %vm4418_vm0, %v4417_v1 }
 0xb7b   :  { %4007 = vmatprep.subr.bf16.mxu1 %v4417_v1 }
 0xb7c   :  { %v2715_v23 = vpop.permute.xlu1 %2714 }
 0xb7d   :  { %v2730_v12 = vsel %vm288_vm2, %v2715_v23, 0 }
 0xb80   :  { %v2711_v24 = vpop.permute.xlu1 %2710 }
 0xb81   :  { %3982 = vmatmul.mubr.msk.bf16.gmra.mxu1 %vm288_vm2, %v1961_v27  ;;  %v5426_v27 = vld [vmem:[%s5909_s2 + $0x10] sm:$0xff] }
 0xb82   :  { %4008 = vmatpush3.bf16.xpose.msra.mxu1 %v2217_v52  ;;  %4009 = vmatprep.mubr.msk.bf16.mxu1 %vm4418_vm0, %v4417_v1 }
 0xb83   :  { %4039 = vmatprep.subr.bf16.mxu1 %v4417_v1 }
 0xb89   :  { %4010 = vmatmul.mubr.msk.bf16.vlgmr.msra.gmra.mxu1 %vm288_vm2, %v2196_v0 }
 0xb8a   :  { %4040 = vmatpush3.bf16.xpose.msra.mxu1 %v2481_v53  ;;  %4013 = vmatprep.mubr.msk.bf16.mxu1 %vm4418_vm0, %v4417_v1 }
 0xb8b   :  { %4041 = vmatprep.subr.bf16.mxu1 %v4417_v1 }
 0xb91   :  { %4014 = vmatmul.mubr.msk.bf16.gmra.mxu1 %vm288_vm2, %v2198_v20 }
 0xb92   :  { %4042 = vmatpush3.bf16.xpose.msra.mxu1 %v2478_v58  ;;  %4017 = vmatprep.mubr.msk.bf16.mxu1 %vm4418_vm0, %v4417_v1 }
 0xb93   :  { %4043 = vmatprep.subr.bf16.mxu1 %v4417_v1 }
 0xb99   :  { %4018 = vmatmul.mubr.msk.bf16.gmra.mxu1 %vm288_vm2, %v2200_v61 }
 0xb9a   :  { %4044 = vmatpush3.bf16.xpose.msra.mxu1 %v2475_v11  ;;  %4045 = vmatprep.mubr.msk.bf16.mxu1 %vm4418_vm0, %v4417_v1 }
 0xb9b   :  { %4075 = vmatprep.subr.bf16.mxu1 %v4417_v1 }
 0xba1   :  { %4046 = vmatmul.mubr.msk.bf16.vlgmr.msra.gmra.mxu1 %vm288_vm2, %v2454_v48 }
 0xba2   :  { %4076 = vmatpush3.bf16.xpose.msra.mxu1 %v2736_v7  ;;  %4049 = vmatprep.mubr.msk.bf16.mxu1 %vm4418_vm0, %v4417_v1 }
 0xba3   :  { %4077 = vmatprep.subr.bf16.mxu1 %v4417_v1 }
 0xba9   :  { %4050 = vmatmul.mubr.msk.bf16.gmra.mxu1 %vm288_vm2, %v2456_v9 }
 0xbaa   :  { %4078 = vmatpush3.bf16.xpose.msra.mxu1 %v2733_v22  ;;  %4053 = vmatprep.mubr.msk.bf16.mxu1 %vm4418_vm0, %v4417_v1 }
 0xbab   :  { %4079 = vmatprep.subr.bf16.mxu1 %v4417_v1 }
 0xbb1   :  { %4054 = vmatmul.mubr.msk.bf16.gmra.mxu1 %vm288_vm2, %v2458_v25 }
 0xbb2   :  { %4080 = vmatpush3.bf16.xpose.msra.mxu1 %v2730_v12  ;;  %4081 = vmatprep.mubr.msk.bf16.mxu1 %vm4418_vm0, %v4417_v1 }
 0xbb3   :  { %4111 = vmatprep.subr.bf16.mxu1 %v4417_v1 }
 0xbb9   :  { %4082 = vmatmul.mubr.msk.bf16.vlgmr.msra.gmra.mxu1 %vm288_vm2, %v2709_v32 }
 0xbba   :  { %4085 = vmatprep.mubr.msk.bf16.mxu1 %vm4418_vm0, %v4417_v1 }
 0xbc1   :  { %4086 = vmatmul.mubr.msk.bf16.gmra.mxu1 %vm288_vm2, %v2711_v24 }
 0xbc2   :  { %4089 = vmatprep.mubr.msk.bf16.mxu1 %vm4418_vm0, %v4417_v1 }
 0xbc9   :  { %4090 = vmatmul.mubr.msk.bf16.gmra.mxu1 %vm288_vm2, %v2713_v45  ;;  %v5450_v45 = vld [vmem:[%s5909_s2 + $0x20] sm:$0xff] }
 0xbca   :  { %4115 = vmatprep.mubr.msk.bf16.mxu1 %vm4418_vm0, %v4417_v1 }
 0xc31   :  { %v2029_v56 = vpop.f32.mrf.mxu1 }
 0xc32   :  { %v2051_v35 = vmul.f32 0.35355338, %v2029_v56 }
 0xc33   :  { %v3975_v40 = vpop.f32.mrf.mxu1 }
 0xc34   :  { %v5409_v19 = vadd.f32 %v5406_v63, %v2051_v35 }
 0xc35   :  { %v2032_v8 = vpop.f32.mrf.mxu1 }
 0xc36   :  { %v2052_v15 = vmul.f32 0.35355338, %v2032_v8  ;;  %v2061_v33 = vsel %vm373_vm4, %v5409_v19, -inf }
 0xc37   :  { %2062 = vmax.xlane.f32.xlu1 %v2061_v33  ;;  %v3976_v21 = vpop.f32.mrf.mxu1 }
 0xc38   :  { %v5419_v37 = vadd.f32 %v5416_v34, %v2052_v15 }
 0xc39   :  { %v2037_v62 = vpop.f32.mrf.mxu1 }
 0xc3a   :  { %v2053_v6 = vmul.f32 0.35355338, %v2037_v62  ;;  %v2064_v29 = vsel %vm373_vm4, %v5419_v37, -inf }
 0xc3b   :  { %v3979_v47 = vpop.f32.mrf.mxu1  ;;  %2065 = vmax.xlane.f32.xlu0 %v2064_v29 }
 0xc3c   :  { %v5429_v10 = vadd.f32 %v5426_v27, %v2053_v6 }
 0xc3d   :  { %v2040_v42 = vpop.f32.mrf.mxu1 }
 0xc3e   :  { %v2054_v43 = vmul.f32 0.35355338, %v2040_v42  ;;  %v2067_v13 = vsel %vm373_vm4, %v5429_v10, -inf }
 0xc3f   :  { %v3980_v28 = vpop.f32.mrf.mxu1  ;;  %2068 = vmax.xlane.f32.xlu0 %v2067_v13 }
 0xc40   :  { %v5439_v44 = vadd.f32 %v5436_v17, %v2054_v43 }
 0xc41   :  { %v2045_v60 = vpop.f32.mrf.mxu1 }
 0xc42   :  { %v2070_v54 = vsel %vm373_vm4, %v5439_v44, -inf  ;;  %v2055_v12 = vmul.f32 0.35355338, %v2045_v60 }
 0xc43   :  { %2071 = vmax.xlane.f32.xlu1 %v2070_v54  ;;  %v3983_v2 = vpop.f32.mrf.mxu1 }
 0xc44   :  { %v5453_v56 = vadd.f32 %v5450_v45, %v2055_v12 }
 0xc45   :  { %v2048_v46 = vpop.f32.mrf.mxu1 }
 0xc46   :  { %v2073_v47 = vsel %vm373_vm4, %v5453_v56, -inf }
 0xc47   :  { %v3984_v52 = vpop.f32.mrf.mxu1 }
 0xc49   :  { %v2259_v51 = vpop.f32.mrf.mxu1 }
 0xc4a   :  { %v2281_v35 = vmul.f32 0.35355338, %v2259_v51 }
 0xc4b   :  { %v4011_v0 = vpop.f32.mrf.mxu1 }
 0xc4c   :  { %v5456_v21 = vadd.f32 %v5406_v63, %v2281_v35 }
 0xc4d   :  { %v2262_v53 = vpop.f32.mrf.mxu1 }
 0xc4e   :  { %v2282_v40 = vmul.f32 0.35355338, %v2262_v53  ;;  %v2291_v2 = vsel %vm373_vm4, %v5456_v21, -inf }
 0xc4f   :  { %v4012_v3 = vpop.f32.mrf.mxu1 }
 0xc50   :  { %v5459_v62 = vadd.f32 %v5416_v34, %v2282_v40 }
 0xc51   :  { %v2267_v20 = vpop.f32.mrf.mxu1 }
 0xc52   :  { %v2283_v33 = vmul.f32 0.35355338, %v2267_v20  ;;  %v2294_v46 = vsel %vm373_vm4, %v5459_v62, -inf }
 0xc53   :  { %v4015_v58 = vpop.f32.mrf.mxu1 }
 0xc54   :  { %2354 = vrot.lane.b32.xlu1 %v5313_v38, %s4422_s26  ;;  %v5464_v43 = vadd.f32 %v5426_v27, %v2283_v33 }
 0xc55   :  { %v2270_v57 = vpop.f32.mrf.mxu1  ;;  %2352 = vrot.lane.b32.xlu0 %v5319_v39, %s4422_s26 }
 0xc56   :  { %v2284_v6 = vmul.f32 0.35355338, %v2270_v57  ;;  %v2297_v0 = vsel %vm373_vm4, %v5464_v43, -inf }
 0xc57   :  { %v4016_v61 = vpop.f32.mrf.mxu1 }
 0xc58   :  { %v5467_v28 = vadd.f32 %v5436_v17, %v2284_v6 }
 0xc59   :  { %v2275_v11 = vpop.f32.mrf.mxu1 }
 0xc5a   :  { %v2285_v13 = vmul.f32 0.35355338, %v2275_v11  ;;  %v2300_v57 = vsel %vm373_vm4, %v5467_v28, -inf }
 0xc5b   :  { %v4019_v5 = vpop.f32.mrf.mxu1 }
 0xc5c   :  { %v5474_v51 = vadd.f32 %v5450_v45, %v2285_v13 }
 0xc5d   :  { %v2278_v48 = vpop.f32.mrf.mxu1 }
 0xc5e   :  { %v2303_v5 = vsel %vm373_vm4, %v5474_v51, -inf }
 0xc5f   :  { %v4020_v7 = vpop.f32.mrf.mxu1 }
 0xc61   :  { %v2517_v18 = vpop.f32.mrf.mxu1 }
 0xc62   :  { %v2539_v60 = vmul.f32 0.35355338, %v2517_v18 }
 0xc63   :  { %v4047_v9 = vpop.f32.mrf.mxu1 }
 0xc64   :  { %v5479_v53 = vadd.f32 %v5406_v63, %v2539_v60 }
 0xc65   :  { %v2520_v22 = vpop.f32.mrf.mxu1 }
 0xc66   :  { %v2540_v3 = vmul.f32 0.35355338, %v2520_v22  ;;  %v2549_v22 = vsel %vm373_vm4, %v5479_v53, -inf }
 0xc67   :  { %v4048_v23 = vpop.f32.mrf.mxu1 }
 0xc68   :  { %v5486_v48 = vadd.f32 %v5416_v34, %v2540_v3 }
 0xc69   :  { %v2525_v25 = vpop.f32.mrf.mxu1 }
 0xc6a   :  { %v2541_v20 = vmul.f32 0.35355338, %v2525_v25  ;;  %v2552_v40 = vsel %vm373_vm4, %v5486_v48, -inf }
 0xc6b   :  { %v4051_v32 = vpop.f32.mrf.mxu1 }
 0xc6c   :  { %v5489_v7 = vadd.f32 %v5426_v27, %v2541_v20 }
 0xc6d   :  { %v2528_v24 = vpop.f32.mrf.mxu1 }
 0xc6e   :  { %v2542_v11 = vmul.f32 0.35355338, %v2528_v24 }
 0xc6f   :  { %v4052_v8 = vpop.f32.mrf.mxu1 }
 0xc70   :  { %v5494_v25 = vadd.f32 %v5436_v17, %v2542_v11  ;;  %v2555_v8 = vsel %vm373_vm4, %v5489_v7, -inf }
 0xc71   :  { %v2533_v15 = vpop.f32.mrf.mxu1 }
 0xc72   :  { %v2543_v18 = vmul.f32 0.35355338, %v2533_v15  ;;  %v2558_v6 = vsel %vm373_vm4, %v5494_v25, -inf }
 0xc73   :  { %v4055_v29 = vpop.f32.mrf.mxu1 }
 0xc74   :  { %2074 = vmax.xlane.f32.xlu0 %v2073_v47  ;;  %v5497_v32 = vadd.f32 %v5450_v45, %v2543_v18 }
 0xc75   :  { %v2536_v42 = vpop.f32.mrf.mxu1 }
 0xc76   :  { %v2561_v60 = vsel %vm373_vm4, %v5497_v32, -inf }
 0xc77   :  { %v4056_v54 = vpop.f32.mrf.mxu1 }
 0xc78   :  { %2292 = vmax.xlane.f32.xlu1 %v2291_v2  ;;  %2295 = vmax.xlane.f32.xlu0 %v2294_v46 }
 0xc79   :  { %v2772_v52 = vpop.f32.mrf.mxu1 }
 0xc7a   :  { %v2794_v12 = vmul.f32 0.35355338, %v2772_v52 }
 0xc7b   :  { %v4083_v58 = vpop.f32.mrf.mxu1 }
 0xc7c   :  { %2298 = vmax.xlane.f32.xlu1 %v2297_v0  ;;  %2301 = vmax.xlane.f32.xlu0 %v2300_v57  ;;  %v5504_v33 = vadd.f32 %v5406_v63, %v2794_v12 }
 0xc7d   :  { %v2775_v61 = vpop.f32.mrf.mxu1 }
 0xc7e   :  { %v2795_v24 = vmul.f32 0.35355338, %v2775_v61  ;;  %v2804_v2 = vsel %vm373_vm4, %v5504_v33, -inf  ;;  %v5532_v61 = vpop.permute.xlu0 %2356 }
 0xc7f   :  { %v4084_v9 = vpop.f32.mrf.mxu1 }
 0xc80   :  { %2304 = vmax.xlane.f32.xlu1 %v2303_v5  ;;  %2550 = vmax.xlane.f32.xlu0 %v2549_v22  ;;  %v5509_v29 = vadd.f32 %v5416_v34, %v2795_v24 }
 0xc81   :  { %v2780_v23 = vpop.f32.mrf.mxu1 }
 0xc82   :  { %v2796_v47 = vmul.f32 0.35355338, %v2780_v23  ;;  %v2807_v0 = vsel %vm373_vm4, %v5509_v29, -inf }
 0xc83   :  { %v4087_v35 = vpop.f32.mrf.mxu1 }
 0xc84   :  { %2553 = vmax.xlane.f32.xlu1 %v2552_v40  ;;  %2556 = vmax.xlane.f32.xlu0 %v2555_v8  ;;  %v5516_v63 = vadd.f32 %v5426_v27, %v2796_v47 }
 0xc85   :  { %v2783_v15 = vpop.f32.mrf.mxu1 }
 0xc86   :  { %v2797_v42 = vmul.f32 0.35355338, %v2783_v15  ;;  %v2810_v57 = vsel %vm373_vm4, %v5516_v63, -inf }
 0xc87   :  { %v4088_v13 = vpop.f32.mrf.mxu1 }
 0xc88   :  { %2559 = vmax.xlane.f32.xlu1 %v2558_v6  ;;  %2562 = vmax.xlane.f32.xlu0 %v2561_v60  ;;  %v5519_v46 = vadd.f32 %v5436_v17, %v2797_v42 }
 0xc89   :  { %v2788_v54 = vpop.f32.mrf.mxu1 }
 0xc8a   :  { %v2798_v34 = vmul.f32 0.35355338, %v2788_v54  ;;  %v2813_v27 = vsel %vm373_vm4, %v5519_v46, -inf }
 0xc8b   :  { %v4091_v52 = vpop.f32.mrf.mxu1 }
 0xc8c   :  { %2805 = vmax.xlane.f32.xlu1 %v2804_v2  ;;  %2808 = vmax.xlane.f32.xlu0 %v2807_v0  ;;  %v5524_v20 = vadd.f32 %v5450_v45, %v2798_v34 }
 0xc8d   :  { %v2791_v3 = vpop.f32.mrf.mxu1 }
 0xc8e   :  { %v2816_v17 = vsel %vm373_vm4, %v5524_v20, -inf }
 0xc8f   :  { %v4092_v58 = vpop.f32.mrf.mxu1 }
 0xc90   :  { %2811 = vmax.xlane.f32.xlu1 %v2810_v57  ;;  %2814 = vmax.xlane.f32.xlu0 %v2813_v27 }
 0xc94   :  { %2817 = vmax.xlane.f32.xlu1 %v2816_v17 }
 0xcc0   :  { %v2063_v11 = vpop.xlane.xlu1 %2062 }
 0xcc1   :  { %v2076_v5 = vsub.f32 %v5409_v19, %v2063_v11 }
 0xcc3   :  { %v2081_v45 = vmul.f32 1.442695, %v2076_v5 }
 0xcc4   :  { %v2066_v18 = vpop.xlane.xlu0 %2065 }
 0xcc5   :  { %4300 = vpow2.f32 %v2081_v45  ;;  %v2077_v9 = vsub.f32 %v5419_v37, %v2066_v18 }
 0xcc7   :  { %v2083_v22 = vmul.f32 1.442695, %v2077_v9 }
 0xcc8   :  { %v2069_v23 = vpop.xlane.xlu0 %2068 }
 0xcc9   :  { %4302 = vpow2.f32 %v2083_v22  ;;  %v2078_v12 = vsub.f32 %v5429_v10, %v2069_v23 }
 0xccb   :  { %v2085_v24 = vmul.f32 1.442695, %v2078_v12 }
 0xccc   :  { %v2072_v10 = vpop.xlane.xlu1 %2071  ;;  %v5554_v42 = vpop.permute.xlu0 %2352 }
 0xccd   :  { %4304 = vpow2.f32 %v2085_v24  ;;  %v2079_v6 = vsub.f32 %v5439_v44, %v2072_v10 }
 0xccf   :  { %v2087_v47 = vmul.f32 1.442695, %v2079_v6 }
 0xcd0   :  { %v5556_v13 = vpop.permute.xlu1 %2354 }
 0xcd1   :  { %4306 = vpow2.f32 %v2087_v47 }
 0xcd2   :  { %v5537_v35 = vpop.eup %4300 }
 0xcd3   :  { %v2091_v40 = vsel %vm373_vm4, %v5537_v35, 0.0 }
 0xcd4   :  { %2092 = vadd.xlane.f32.xlu1 %v2091_v40 }
 0xcd6   :  { %v5541_v8 = vpop.eup %4302 }
 0xcd7   :  { %v2094_v19 = vsel %vm373_vm4, %v5541_v8, 0.0 }
 0xcd8   :  { %2095 = vadd.xlane.f32.xlu0 %v2094_v19 }
 0xcda   :  { %v5545_v37 = vpop.eup %4304 }
 0xcdb   :  { %v2097_v15 = vsel %vm373_vm4, %v5545_v37, 0.0 }
 0xcdc   :  { %2098 = vadd.xlane.f32.xlu1 %v2097_v15 }
 0xcde   :  { %v5563_v45 = vpop.eup %4306 }
 0xced   :  { %2611 = vrot.lane.b32.xlu1 %v5306_v16, %s4424_s28 }
 0xcee   :  { %2609 = vrot.lane.b32.xlu0 %v5313_v38, %s4424_s28 }
 0xcfd   :  { %v2075_v60 = vpop.xlane.xlu0 %2074 }
 0xcfe   :  { %v2080_v54 = vsub.f32 %v5453_v56, %v2075_v60 }
 0xd00   :  { %v2089_v2 = vmul.f32 1.442695, %v2080_v54 }
 0xd01   :  { %v2293_v34 = vpop.xlane.xlu1 %2292  ;;  %v2296_v52 = vpop.xlane.xlu0 %2295 }
 0xd02   :  { %4308 = vpow2.f32 %v2089_v2  ;;  %v2306_v0 = vsub.f32 %v5456_v21, %v2293_v34  ;;  %v2307_v3 = vsub.f32 %v5459_v62, %v2296_v52 }
 0xd04   :  { %v2311_v58 = vmul.f32 1.442695, %v2306_v0  ;;  %v2313_v57 = vmul.f32 1.442695, %v2307_v3 }
 0xd05   :  { %v2299_v44 = vpop.xlane.xlu1 %2298  ;;  %v2302_v27 = vpop.xlane.xlu0 %2301 }
 0xd06   :  { %4310 = vpow2.f32 %v2311_v58  ;;  %v2308_v17 = vsub.f32 %v5464_v43, %v2299_v44  ;;  %v2309_v11 = vsub.f32 %v5467_v28, %v2302_v27  ;;  %v2100_v43 = vsel %vm373_vm4, %v5563_v45, 0.0 }
 0xd07   :  { %4312 = vpow2.f32 %v2313_v57 }
 0xd08   :  { %v2315_v5 = vmul.f32 1.442695, %v2308_v17  ;;  %v2317_v56 = vmul.f32 1.442695, %v2309_v11 }
 0xd09   :  { %v2305_v18 = vpop.xlane.xlu1 %2304  ;;  %v2551_v9 = vpop.xlane.xlu0 %2550 }
 0xd0a   :  { %4314 = vpow2.f32 %v2315_v5  ;;  %v2310_v21 = vsub.f32 %v5474_v51, %v2305_v18  ;;  %v2564_v62 = vsub.f32 %v5479_v53, %v2551_v9 }
 0xd0b   :  { %4316 = vpow2.f32 %v2317_v56 }
 0xd0c   :  { %v2319_v22 = vmul.f32 1.442695, %v2310_v21  ;;  %v2569_v23 = vmul.f32 1.442695, %v2564_v62 }
 0xd0d   :  { %v5569_v12 = vpop.xlane.xlu1 %2553  ;;  %2101 = vadd.xlane.f32.xlu0 %v2100_v43  ;;  %v2557_v28 = vpop.xlane.xlu0 %2556 }
 0xd0e   :  { %4318 = vpow2.f32 %v2319_v22  ;;  %v2566_v24 = vsub.f32 %v5489_v7, %v2557_v28 }
 0xd0f   :  { %v5572_v40 = vpop.eup %4308  ;;  %4320 = vpow2.f32 %v2569_v23 }
 0xd10   :  { %v2573_v19 = vmul.f32 1.442695, %v2566_v24  ;;  %v2103_v51 = vsel %vm373_vm4, %v5572_v40, 0.0 }
 0xd11   :  { %v2560_v53 = vpop.xlane.xlu1 %2559  ;;  %2104 = vadd.xlane.f32.xlu0 %v2103_v51  ;;  %v2563_v15 = vpop.xlane.xlu0 %2562 }
 0xd12   :  { %v2567_v10 = vsub.f32 %v5494_v25, %v2560_v53  ;;  %4322 = vpow2.f32 %v2573_v19  ;;  %v2568_v7 = vsub.f32 %v5497_v32, %v2563_v15 }
 0xd13   :  { %v5577_v6 = vpop.eup %4310 }
 0xd14   :  { %v5579_v47 = vpop.eup %4312  ;;  %v2575_v60 = vmul.f32 1.442695, %v2567_v10  ;;  %v2321_v54 = vsel %vm373_vm4, %v5577_v6, 0.0  ;;  %v2577_v3 = vmul.f32 1.442695, %v2568_v7  ;;  %v2565_v10 = vsub.f32 %v5486_v48, %v5569_v12 }
 0xd15   :  { %v2806_v2 = vpop.xlane.xlu1 %2805  ;;  %2322 = vadd.xlane.f32.xlu1 %v2321_v54  ;;  %v2324_v34 = vsel %vm373_vm4, %v5579_v47, 0.0  ;;  %v2809_v52 = vpop.xlane.xlu0 %2808 }
 0xd16   :  { %2325 = vadd.xlane.f32.xlu0 %v2324_v34  ;;  %4324 = vpow2.f32 %v2575_v60  ;;  %v2820_v58 = vsub.f32 %v5509_v29, %v2809_v52  ;;  %v2571_v7 = vmul.f32 1.442695, %v2565_v10  ;;  %v2819_v54 = vsub.f32 %v5504_v33, %v2806_v2 }
 0xd17   :  { %v5586_v0 = vpop.eup %4314  ;;  %4326 = vpow2.f32 %v2577_v3 }
 0xd18   :  { %v5588_v25 = vpop.eup %4316  ;;  %v2327_v32 = vsel %vm373_vm4, %v5586_v0, 0.0  ;;  %v2826_v17 = vmul.f32 1.442695, %v2820_v58  ;;  %v2824_v34 = vmul.f32 1.442695, %v2819_v54 }
 0xd19   :  { %v2812_v57 = vpop.xlane.xlu1 %2811  ;;  %2328 = vadd.xlane.f32.xlu1 %v2327_v32  ;;  %v2330_v44 = vsel %vm373_vm4, %v5588_v25, 0.0  ;;  %v2815_v29 = vpop.xlane.xlu0 %2814 }
 0xd1a   :  { %2331 = vadd.xlane.f32.xlu0 %v2330_v44  ;;  %v2821_v11 = vsub.f32 %v5516_v63, %v2812_v57  ;;  %4328 = vpow2.f32 %v2826_v17  ;;  %v2822_v9 = vsub.f32 %v5519_v46, %v2815_v29 }
 0xd1b   :  { %v5595_v27 = vpop.eup %4318 }
 0xd1c   :  { %v2333_v5 = vsel %vm373_vm4, %v5595_v27, 0.0  ;;  %v5600_v56 = vpop.eup %4320  ;;  %v2828_v18 = vmul.f32 1.442695, %v2821_v11  ;;  %v2830_v22 = vmul.f32 1.442695, %v2822_v9 }
 0xd1d   :  { %2334 = vadd.xlane.f32.xlu1 %v2333_v5  ;;  %v2579_v21 = vsel %vm373_vm4, %v5600_v56, 0.0  ;;  %v2818_v12 = vpop.xlane.xlu1 %2817  ;;  %v2370_v5 = vsel %vm441_vm3, %v5532_v61, 0 }
 0xd1e   :  { %4330 = vpow2.f32 %v2828_v18  ;;  %v2823_v11 = vsub.f32 %v5524_v20, %v2818_v12 }
 0xd1f   :  { %v5605_v62 = vpop.eup %4322  ;;  %4332 = vpow2.f32 %v2830_v22 }
 0xd20   :  { %v2585_v63 = vsel %vm373_vm4, %v5605_v62, 0.0  ;;  %4334 = vpow2.f32 %v2571_v7 }
 0xd21   :  { %2580 = vadd.xlane.f32.xlu1 %v2579_v21  ;;  %4336 = vpow2.f32 %v2824_v34 }
 0xd23   :  { %v5609_v23 = vpop.eup %4324 }
 0xd24   :  { %v2588_v43 = vsel %vm373_vm4, %v5609_v23, 0.0  ;;  %v5613_v28 = vpop.eup %4326 }
 0xd25   :  { %2586 = vadd.xlane.f32.xlu1 %v2585_v63  ;;  %v2591_v46 = vsel %vm373_vm4, %v5613_v28, 0.0 }
 0xd27   :  { %v5617_v24 = vpop.eup %4328 }
 0xd28   :  { %v2837_v19 = vsel %vm373_vm4, %v5617_v24, 0.0 }
 0xd29   :  { %2589 = vadd.xlane.f32.xlu1 %v2588_v43 }
 0xd2b   :  { %v5623_v51 = vpop.eup %4330 }
 0xd2c   :  { %v2840_v53 = vsel %vm373_vm4, %v5623_v51, 0.0  ;;  %v5627_v15 = vpop.eup %4332 }
 0xd2d   :  { %2592 = vadd.xlane.f32.xlu1 %v2591_v46  ;;  %v2843_v60 = vsel %vm373_vm4, %v5627_v15, 0.0  ;;  %v5636_v52 = vpop.eup %4334 }
 0xd2e   :  { %v2582_v3 = vsel %vm373_vm4, %v5636_v52, 0.0  ;;  %v5640_v58 = vpop.eup %4336 }
 0xd2f   :  { %v2834_v48 = vsel %vm373_vm4, %v5640_v58, 0.0 }
 0xd30   :  { %2607 = vrot.lane.b32.xlu0 %v5319_v39, %s4424_s28 }
 0xd31   :  { %2838 = vadd.xlane.f32.xlu1 %v2837_v19 }
 0xd35   :  { %2841 = vadd.xlane.f32.xlu1 %v2840_v53 }
 0xd39   :  { %2844 = vadd.xlane.f32.xlu1 %v2843_v60 }
 0xd4a   :  { %2866 = vrot.lane.b32.xlu1 %v5306_v16, %s4426_s30 }
 0xd4f   :  { %2583 = vadd.xlane.f32.xlu0 %v2582_v3 }
 0xd53   :  { %2835 = vadd.xlane.f32.xlu0 %v2834_v48 }
 0xd5d   :  { %v2093_v33 = vpop.xlane.xlu1 %2092 }
 0xd5e   :  { %4338 = vrcp.f32 %v2093_v33 }
 0xd61   :  { %v2096_v2 = vpop.xlane.xlu0 %2095 }
 0xd62   :  { %4340 = vrcp.f32 %v2096_v2 }
 0xd65   :  { %v2099_v61 = vpop.xlane.xlu1 %2098 }
 0xd69   :  { %2864 = vrot.lane.b32.xlu0 %v5313_v38, %s4426_s30  ;;  %v2832_v38 = vmul.f32 1.442695, %v2823_v11 }
 0xd6b   :  { %v4339_v16 = vpop.eup %4338  ;;  %4342 = vpow2.f32 %v2832_v38 }
 0xd6c   :  { %v2111_v57 = vmul.f32 %v4339_v16, %v5537_v35  ;;  %v2610_v35 = vpop.permute.xlu0 %2609  ;;  %4344 = vrcp.f32 %v2099_v61 }
 0xd6d   :  { %2862 = vrot.lane.b32.xlu0 %v5319_v39, %s4426_s30 }
 0xd6f   :  { %v4341_v32 = vpop.eup %4340 }
 0xd70   :  { %v2112_v44 = vmul.f32 %v4341_v32, %v5541_v8 }
 0xd72   :  { %v2116_v17 = vpack.c.bf16 %v2112_v44, %v2111_v57 }
 0xd74   :  { %3992 = vmatmul.mubr.msk.bf16.vlgmr.msra.gmra.mxu0 %vm373_vm4, %v2116_v17 }
 0xd75   :  { %4022 = vmatpush3.bf16.msra.mxu0 %v2370_v5  ;;  %3995 = vmatprep.mubr.msk.bf16.mxu0 %vm4418_vm0, %v4417_v1 }
 0xd76   :  { %4023 = vmatprep.subr.bf16.mxu0 %v4417_v1 }
 0xd78   :  { %v5661_v39 = vpop.eup %4342 }
 0xd79   :  { %4024 = vmatpush3.bf16.msra.mxu0 %v5556_v13  ;;  %v2846_v20 = vsel %vm373_vm4, %v5661_v39, 0.0  ;;  %v2612_v13 = vpop.permute.xlu1 %2611  ;;  %v4345_v21 = vpop.eup %4344 }
 0xd7a   :  { %4025 = vmatprep.subr.bf16.mxu0 %v4417_v1  ;;  %v2113_v22 = vmul.f32 %v4345_v21, %v5545_v37  ;;  %v2625_v33 = vsel %vm441_vm3, %v2612_v13, 0 }
 0xd7d   :  { %4026 = vmatpush3.bf16.msra.mxu0 %v5554_v42 }
 0xd7e   :  { %4057 = vmatprep.subr.bf16.mxu0 %v4417_v1 }
 0xd8c   :  { %2847 = vadd.xlane.f32.xlu0 %v2846_v20 }
 0xd96   :  { %v2102_v8 = vpop.xlane.xlu0 %2101 }
 0xd97   :  { %4346 = vrcp.f32 %v2102_v8 }
 0xd9a   :  { %v2105_v29 = vpop.xlane.xlu0 %2104 }
 0xd9b   :  { %4348 = vrcp.f32 %v2105_v29 }
 0xd9e   :  { %v2323_v18 = vpop.xlane.xlu1 %2322 }
 0xd9f   :  { %v2326_v9 = vpop.xlane.xlu0 %2325  ;;  %4350 = vrcp.f32 %v2323_v18 }
 0xda0   :  { %4352 = vrcp.f32 %v2326_v9 }
 0xda2   :  { %v2329_v43 = vpop.xlane.xlu1 %2328 }
 0xda3   :  { %v2332_v53 = vpop.xlane.xlu0 %2331  ;;  %4354 = vrcp.f32 %v2329_v43 }
 0xda4   :  { %v4347_v42 = vpop.eup %4346  ;;  %4356 = vrcp.f32 %v2332_v53 }
 0xda5   :  { %v2114_v63 = vmul.f32 %v4347_v42, %v5563_v45 }
 0xda6   :  { %v2335_v34 = vpop.xlane.xlu1 %2334 }
 0xda7   :  { %v2117_v46 = vpack.c.bf16 %v2114_v63, %v2113_v22  ;;  %4358 = vrcp.f32 %v2335_v34  ;;  %v2608_v32 = vpop.permute.xlu0 %2607 }
 0xda8   :  { %v4349_v19 = vpop.eup %4348 }
 0xda9   :  { %3996 = vmatmul.mubr.msk.bf16.gmra.mxu0 %vm373_vm4, %v2117_v46  ;;  %v2115_v10 = vmul.f32 %v4349_v19, %v5572_v40 }
 0xdaa   :  { %3999 = vmatprep.mubr.msk.bf16.mxu0 %vm4418_vm0, %v4417_v1  ;;  %v2581_v2 = vpop.xlane.xlu1 %2580 }
 0xdab   :  { %v2118_v7 = vpack.c.bf16 %v2115_v10, %v2115_v10  ;;  %4360 = vrcp.f32 %v2581_v2 }
 0xdac   :  { %v4351_v60 = vpop.eup %4350 }
 0xdad   :  { %v4353_v54 = vpop.eup %4352  ;;  %v2341_v37 = vmul.f32 %v4351_v60, %v5577_v6 }
 0xdae   :  { %v2342_v45 = vmul.f32 %v4353_v54, %v5579_v47 }
 0xdb0   :  { %v4355_v3 = vpop.eup %4354  ;;  %v2346_v48 = vpack.c.bf16 %v2342_v45, %v2341_v37 }
 0xdb1   :  { %4000 = vmatmul.mubr.msk.bf16.gmra.mxu0 %vm373_vm4, %v2118_v7  ;;  %v4357_v12 = vpop.eup %4356  ;;  %v2343_v40 = vmul.f32 %v4355_v3, %v5586_v0  ;;  %v2587_v0 = vpop.xlane.xlu1 %2586 }
 0xdb2   :  { %4027 = vmatprep.mubr.msk.bf16.mxu0 %vm4418_vm0, %v4417_v1  ;;  %v2344_v6 = vmul.f32 %v4357_v12, %v5588_v25 }
 0xdb4   :  { %v2347_v47 = vpack.c.bf16 %v2344_v6, %v2343_v40  ;;  %v4359_v16 = vpop.eup %4358 }
 0xdb5   :  { %v2345_v57 = vmul.f32 %v4359_v16, %v5595_v27  ;;  %v2590_v25 = vpop.xlane.xlu1 %2589 }
 0xdb7   :  { %v2348_v44 = vpack.c.bf16 %v2345_v57, %v2345_v57 }
 0xdb8   :  { %v4361_v27 = vpop.eup %4360 }
 0xdb9   :  { %4028 = vmatmul.mubr.msk.bf16.vlgmr.msra.gmra.mxu0 %vm373_vm4, %v2346_v48  ;;  %v2593_v17 = vpop.xlane.xlu1 %2592 }
 0xdba   :  { %4058 = vmatpush3.bf16.msra.mxu0 %v2625_v33  ;;  %4031 = vmatprep.mubr.msk.bf16.mxu0 %vm4418_vm0, %v4417_v1 }
 0xdbb   :  { %4059 = vmatprep.subr.bf16.mxu0 %v4417_v1 }
 0xdbd   :  { %v2839_v11 = vpop.xlane.xlu1 %2838 }
 0xdbe   :  { %4060 = vmatpush3.bf16.msra.mxu0 %v2610_v35  ;;  %v2599_v35 = vmul.f32 %v4361_v27, %v5600_v56 }
 0xdbf   :  { %4061 = vmatprep.subr.bf16.mxu0 %v4417_v1 }
 0xdc1   :  { %4032 = vmatmul.mubr.msk.bf16.gmra.mxu0 %vm373_vm4, %v2347_v47  ;;  %v2842_v38 = vpop.xlane.xlu1 %2841 }
 0xdc2   :  { %4062 = vmatpush3.bf16.msra.mxu0 %v2608_v32  ;;  %4035 = vmatprep.mubr.msk.bf16.mxu0 %vm4418_vm0, %v4417_v1 }
 0xdc3   :  { %4093 = vmatprep.subr.bf16.mxu0 %v4417_v1 }
 0xdc5   :  { %v2845_v20 = vpop.xlane.xlu1 %2844 }
 0xdc9   :  { %4036 = vmatmul.mubr.msk.bf16.gmra.mxu0 %vm373_vm4, %v2348_v44  ;;  %v2867_v13 = vpop.permute.xlu1 %2866 }
 0xdca   :  { %4063 = vmatprep.mubr.msk.bf16.mxu0 %vm4418_vm0, %v4417_v1  ;;  %v2880_v21 = vsel %vm441_vm3, %v2867_v13, 0 }
 0xdd8   :  { %v2584_v5 = vpop.xlane.xlu0 %2583 }
 0xdd9   :  { %4362 = vrcp.f32 %v2584_v5 }
 0xdda   :  { %4364 = vrcp.f32 %v2590_v25 }
 0xddb   :  { %4366 = vrcp.f32 %v2587_v0 }
 0xddc   :  { %4368 = vrcp.f32 %v2593_v17  ;;  %v2836_v29 = vpop.xlane.xlu0 %2835 }
 0xddd   :  { %4370 = vrcp.f32 %v2836_v29 }
 0xdde   :  { %4372 = vrcp.f32 %v2839_v11 }
 0xddf   :  { %4374 = vrcp.f32 %v2845_v20 }
 0xde0   :  { %v2865_v22 = vpop.permute.xlu0 %2864  ;;  %4376 = vrcp.f32 %v2842_v38 }
 0xde4   :  { %v2863_v46 = vpop.permute.xlu0 %2862 }
 0xde6   :  { %v4363_v61 = vpop.eup %4362 }
 0xde7   :  { %v2600_v8 = vmul.f32 %v4363_v61, %v5636_v52  ;;  %v4365_v9 = vpop.eup %4364 }
 0xde8   :  { %v4367_v42 = vpop.eup %4366  ;;  %v2602_v56 = vmul.f32 %v4365_v9, %v5609_v23 }
 0xde9   :  { %v2604_v18 = vpack.c.bf16 %v2600_v8, %v2599_v35  ;;  %v2601_v52 = vmul.f32 %v4367_v42, %v5605_v62  ;;  %v4369_v43 = vpop.eup %4368 }
 0xdea   :  { %v2603_v19 = vmul.f32 %v4369_v43, %v5613_v28  ;;  %v4371_v62 = vpop.eup %4370 }
 0xdeb   :  { %4064 = vmatmul.mubr.msk.bf16.vlgmr.msra.gmra.mxu0 %vm373_vm4, %v2604_v18  ;;  %v2605_v63 = vpack.c.bf16 %v2602_v56, %v2601_v52  ;;  %v4373_v53 = vpop.eup %4372  ;;  %v2854_v10 = vmul.f32 %v4371_v62, %v5640_v58  ;;  %v4192_v56 = vld [vmem:[%s5910_s5 + $0x18] sm:$0xff]  }
 0xdec   :  { %4094 = vmatpush3.bf16.msra.mxu0 %v2880_v21  ;;  %4067 = vmatprep.mubr.msk.bf16.mxu0 %vm4418_vm0, %v4417_v1  ;;  %v2606_v23 = vpack.c.bf16 %v2603_v19, %v2603_v19  ;;  %v2855_v60 = vmul.f32 %v4373_v53, %v5617_v24  ;;  %v4375_v54 = vpop.eup %4374  ;;  %v4193_v19 = vld [vmem:[%s5910_s5 + $0x10] sm:$0xff]  }
 0xded   :  { %4095 = vmatprep.subr.bf16.mxu0 %v4417_v1  ;;  %v4377_v28 = vpop.eup %4376  ;;  %v2857_v34 = vmul.f32 %v4375_v54, %v5627_v15  ;;  %4112 = vmatpush3.bf16.msra.mxu1 %v4192_v56 }
 0xdee   :  { %v2859_v7 = vpack.c.bf16 %v2855_v60, %v2854_v10  ;;  %v2856_v37 = vmul.f32 %v4377_v28, %v5623_v51  ;;  %4113 = vmatprep.subr.bf16.mxu1 %v4417_v1 }
 0xdf0   :  { %4096 = vmatpush3.bf16.msra.mxu0 %v2865_v22  ;;  %v2860_v45 = vpack.c.bf16 %v2857_v34, %v2856_v37 }
 0xdf1   :  { %4097 = vmatprep.subr.bf16.mxu0 %v4417_v1  ;;  %4114 = vmatpush3.bf16.msra.mxu1 %v4193_v19 }
 0xdf2   :  { %4143 = vmatprep.subr.bf16.mxu1 %v4417_v1 }
 0xdf3   :  { %4068 = vmatmul.mubr.msk.bf16.gmra.mxu0 %vm373_vm4, %v2605_v63 }
 0xdf4   :  { %4098 = vmatpush3.bf16.msra.mxu0 %v2863_v46  ;;  %4071 = vmatprep.mubr.msk.bf16.mxu0 %vm4418_vm0, %v4417_v1 }
 0xdf5   :  { %4127 = vmatprep.subr.bf16.mxu0 %v4417_v1 }
 0xdfb   :  { %4072 = vmatmul.mubr.msk.bf16.gmra.mxu0 %vm373_vm4, %v2606_v23 }
 0xdfc   :  { %4099 = vmatprep.mubr.msk.bf16.mxu0 %vm4418_vm0, %v4417_v1 }
 0xe03   :  { %4100 = vmatmul.mubr.msk.bf16.vlgmr.msra.gmra.mxu0 %vm373_vm4, %v2859_v7 }
 0xe04   :  { %4103 = vmatprep.mubr.msk.bf16.mxu0 %vm4418_vm0, %v4417_v1 }
 0xe0b   :  { %4104 = vmatmul.mubr.msk.bf16.gmra.mxu0 %vm373_vm4, %v2860_v45 }
 0xe0c   :  { %4107 = vmatprep.mubr.msk.bf16.mxu0 %vm4418_vm0, %v4417_v1 }
 0xe15   :  { %v2848_v58 = vpop.xlane.xlu0 %2847 }
 0xe16   :  { %4378 = vrcp.f32 %v2848_v58 }
 0xe23   :  { %v4379_v24 = vpop.eup %4378 }
 0xe24   :  { %v2858_v3 = vmul.f32 %v4379_v24, %v5661_v39 }
 0xe26   :  { %v2861_v48 = vpack.c.bf16 %v2858_v3, %v2858_v3 }
 0xe28   :  { %4108 = vmatmul.mubr.msk.bf16.gmra.mxu0 %vm373_vm4, %v2861_v48 }
 0xe29   :  { %4131 = vmatprep.mubr.msk.bf16.mxu0 %vm4418_vm0, %v4417_v1 }
 0xe34   :  { %v2165_v15 = vpop.f32.mrf.mxu0 }
 0xe35   :  { %2187 = vst.msk [vmem:[#allocation2] sm:$0xff] %vm288_vm2, %v2165_v15 }
 0xe36   :  { %v3993_v51 = vpop.f32.mrf.mxu0 }
 0xe38   :  { %v2168_v12 = vpop.f32.mrf.mxu0 }
 0xe39   :  { %2188 = vst.msk [vmem:[#allocation2 + $0x8] sm:$0xff] %vm288_vm2, %v2168_v12 }
 0xe3a   :  { %v3994_v33 = vpop.f32.mrf.mxu0 }
 0xe69   :  { %v2173_v40 = vpop.f32.mrf.mxu0 }
 0xe6a   :  { %2189 = vst.msk [vmem:[#allocation2 + $0x10] sm:$0xff] %vm288_vm2, %v2173_v40 }
 0xe6b   :  { %v3997_v6 = vpop.f32.mrf.mxu0 }
 0xe6d   :  { %v2176_v2 = vpop.f32.mrf.mxu0 }
 0xe6e   :  { %2190 = vst.msk [vmem:[#allocation2 + $0x18] sm:$0xff] %vm288_vm2, %v2176_v2 }
 0xe6f   :  { %v3998_v39 = vpop.f32.mrf.mxu0 }
 0xe71   :  { %v2181_v47 = vpop.f32.mrf.mxu0 }
 0xe72   :  { %2191 = vst.msk [vmem:[#allocation2 + $0x20] sm:$0xff] %vm288_vm2, %v2181_v47 }
 0xe73   :  { %v4001_v16 = vpop.f32.mrf.mxu0 }
 0xe75   :  { %v2184_v32 = vpop.f32.mrf.mxu0 }
 0xe77   :  { %v4002_v57 = vpop.f32.mrf.mxu0 }
 0xe79   :  { %v2406_v0 = vpop.f32.mrf.mxu0 }
 0xe7a   :  { %2433 = vrot.lane.b32.xlu1 %v2406_v0, %s4427_s22 }
 0xe7b   :  { %v4029_v44 = vpop.f32.mrf.mxu0 }
 0xe7d   :  { %v2409_v25 = vpop.f32.mrf.mxu0 }
 0xe7e   :  { %2435 = vrot.lane.b32.xlu1 %v2409_v25, %s4427_s22 }
 0xe7f   :  { %v4030_v17 = vpop.f32.mrf.mxu0 }
 0xe81   :  { %v2414_v11 = vpop.f32.mrf.mxu0 }
 0xe82   :  { %2437 = vrot.lane.b32.xlu1 %v2414_v11, %s4427_s22 }
 0xe83   :  { %v4033_v5 = vpop.f32.mrf.mxu0 }
 0xe85   :  { %v2417_v38 = vpop.f32.mrf.mxu0 }
 0xe86   :  { %2439 = vrot.lane.b32.xlu0 %v2417_v38, %s4427_s22 }
 0xe87   :  { %v4034_v20 = vpop.f32.mrf.mxu0 }
 0xe89   :  { %v2422_v27 = vpop.f32.mrf.mxu0 }
 0xe8b   :  { %v4037_v61 = vpop.f32.mrf.mxu0 }
 0xe8c   :  { %v5779_v61 = vld [vmem:[%s5907_s8 + $0x10] sm:$0xff] }
 0xe8d   :  { %v2425_v35 = vpop.f32.mrf.mxu0 }
 0xe8e   :  { %v2974_v35 = vrot.slane %v5779_v61, %v1290_v14 }
 0xe8f   :  { %v4038_v8 = vpop.f32.mrf.mxu0 }
 0xeab   :  { %v2661_v29 = vpop.f32.mrf.mxu0 }
 0xeac   :  { %2688 = vrot.lane.b32.xlu1 %v2661_v29, %s4428_s12 }
 0xead   :  { %v4065_v13 = vpop.f32.mrf.mxu0 }
 0xeaf   :  { %v2664_v18 = vpop.f32.mrf.mxu0 }
 0xeb0   :  { %2690 = vrot.lane.b32.xlu1 %v2664_v18, %s4428_s12 }
 0xeb1   :  { %v4066_v9 = vpop.f32.mrf.mxu0 }
 0xeb3   :  { %v2669_v21 = vpop.f32.mrf.mxu0 }
 0xeb4   :  { %2692 = vrot.lane.b32.xlu1 %v2669_v21, %s4428_s12 }
 0xeb5   :  { %v4069_v42 = vpop.f32.mrf.mxu0 }
 0xeb7   :  { %v2672_v22 = vpop.f32.mrf.mxu0 }
 0xeb8   :  { %2694 = vrot.lane.b32.xlu1 %v2672_v22, %s4428_s12 }
 0xeb9   :  { %v4070_v52 = vpop.f32.mrf.mxu0 }
 0xebb   :  { %v2677_v63 = vpop.f32.mrf.mxu0 }
 0xebc   :  { %2696 = vrot.lane.b32.xlu0 %v2677_v63, %s4428_s12 }
 0xebd   :  { %v4073_v43 = vpop.f32.mrf.mxu0 }
 0xebf   :  { %v2680_v46 = vpop.f32.mrf.mxu0 }
 0xec1   :  { %v4074_v23 = vpop.f32.mrf.mxu0 }
 0xec3   :  { %v2916_v62 = vpop.f32.mrf.mxu0 }
 0xec4   :  { %2943 = vrot.lane.b32.xlu1 %v2916_v62, %s4429_s16 }
 0xec5   :  { %v4101_v53 = vpop.f32.mrf.mxu0 }
 0xec7   :  { %v2919_v10 = vpop.f32.mrf.mxu0 }
 0xec8   :  { %2945 = vrot.lane.b32.xlu1 %v2919_v10, %s4429_s16 }
 0xec9   :  { %v4102_v60 = vpop.f32.mrf.mxu0 }
 0xecb   :  { %v2924_v7 = vpop.f32.mrf.mxu0 }
 0xecc   :  { %2947 = vrot.lane.b32.xlu1 %v2924_v7, %s4429_s16 }
 0xecd   :  { %v4105_v54 = vpop.f32.mrf.mxu0 }
 0xecf   :  { %v2927_v28 = vpop.f32.mrf.mxu0 }
 0xed0   :  { %2949 = vrot.lane.b32.xlu1 %v2927_v28, %s4429_s16 }
 0xed1   :  { %v4106_v34 = vpop.f32.mrf.mxu0 }
 0xed4   :  { %2441 = vrot.lane.b32.xlu1 %v2422_v27, %s4427_s22 }
 0xee8   :  { %v2932_v37 = vpop.f32.mrf.mxu0 }
 0xee9   :  { %2951 = vrot.lane.b32.xlu1 %v2932_v37, %s4429_s16 }
 0xeea   :  { %v4109_v45 = vpop.f32.mrf.mxu0 }
 0xeec   :  { %v2935_v58 = vpop.f32.mrf.mxu0  ;;  %v2434_v24 = vpop.permute.xlu1 %2433 }
 0xeed   :  { %2448 = vst.msk [vmem:[#allocation2] sm:$0xff] %vm762_vm5, %v2434_v24 }
 0xeee   :  { %v4110_v3 = vpop.f32.mrf.mxu0 }
 0xef0   :  { %v2436_v48 = vpop.permute.xlu1 %2435 }
 0xef1   :  { %2449 = vst.msk [vmem:[#allocation2 + $0x8] sm:$0xff] %vm762_vm5, %v2436_v48 }
 0xef4   :  { %v2438_v15 = vpop.permute.xlu1 %2437 }
 0xef5   :  { %2450 = vst.msk [vmem:[#allocation2 + $0x10] sm:$0xff] %vm762_vm5, %v2438_v15 }
 0xef8   :  { %v2440_v51 = vpop.permute.xlu0 %2439 }
 0xef9   :  { %2451 = vst.msk [vmem:[#allocation2 + $0x18] sm:$0xff] %vm762_vm5, %v2440_v51 }
 0xf1e   :  { %v2689_v12 = vpop.permute.xlu1 %2688 }
 0xf1f   :  { %2703 = vst.msk [vmem:[#allocation2] sm:$0xff] %vm1018_vm6, %v2689_v12 }
 0xf22   :  { %v2691_v33 = vpop.permute.xlu1 %2690 }
 0xf23   :  { %2704 = vst.msk [vmem:[#allocation2 + $0x8] sm:$0xff] %vm1018_vm6, %v2691_v33 }
 0xf26   :  { %v2693_v40 = vpop.permute.xlu1 %2692 }
 0xf27   :  { %2705 = vst.msk [vmem:[#allocation2 + $0x10] sm:$0xff] %vm1018_vm6, %v2693_v40 }
 0xf2a   :  { %v2695_v6 = vpop.permute.xlu1 %2694 }
 0xf2b   :  { %2706 = vst.msk [vmem:[#allocation2 + $0x18] sm:$0xff] %vm1018_vm6, %v2695_v6 }
 0xf2e   :  { %v2697_v25 = vpop.permute.xlu0 %2696 }
 0xf36   :  { %v2944_v2 = vpop.permute.xlu1 %2943 }
 0xf37   :  { %2958 = vst.msk [vmem:[#allocation2] sm:$0xff] %vm1274_vm7, %v2944_v2 }
 0xf3a   :  { %v2946_v39 = vpop.permute.xlu1 %2945 }
 0xf3b   :  { %2959 = vst.msk [vmem:[#allocation2 + $0x8] sm:$0xff] %vm1274_vm7, %v2946_v39 }
 0xf3e   :  { %v2948_v47 = vpop.permute.xlu1 %2947  ;;  %v2963_v32 = vld [vmem:[#allocation2] sm:$0xff] }
 0xf3f   :  { %2960 = vst.msk [vmem:[#allocation2 + $0x10] sm:$0xff] %vm1274_vm7, %v2948_v47 }
 0xf42   :  { %v2950_v16 = vpop.permute.xlu1 %2949  ;;  %v2964_v57 = vld [vmem:[#allocation2 + $0x8] sm:$0xff] }
 0xf43   :  { %2961 = vst.msk [vmem:[#allocation2 + $0x18] sm:$0xff] %vm1274_vm7, %v2950_v16  ;;  %v2968_v0 = vpack.c.bf16 %v2964_v57, %v2963_v32 }
 0xf45   :  { %4116 = vmatmul.mubr.msk.bf16.vlgmr.msra.gmra.mxu1 %vm98_vm1, %v2968_v0 }
 0xf46   :  { %v2442_v44 = vpop.permute.xlu1 %2441  ;;  %4119 = vmatprep.mubr.msk.bf16.mxu1 %vm4418_vm0, %v4417_v1  ;;  %v2965_v17 = vld [vmem:[#allocation2 + $0x10] sm:$0xff] }
 0xf47   :  { %2452 = vst.msk [vmem:[#allocation2 + $0x20] sm:$0xff] %vm762_vm5, %v2442_v44 }
 0xf48   :  { %2707 = vst.msk [vmem:[#allocation2 + $0x20] sm:$0xff] %vm1018_vm6, %v2697_v25 }
 0xf4a   :  { %v2966_v11 = vld [vmem:[#allocation2 + $0x18] sm:$0xff] }
 0xf4b   :  { %v2969_v5 = vpack.c.bf16 %v2966_v11, %v2965_v17 }
 0xf4d   :  { %4120 = vmatmul.mubr.msk.bf16.gmra.mxu1 %vm98_vm1, %v2969_v5  ;;  %v4194_v5 = vld [vmem:[%s5911_s6 + $0x18] sm:$0xff]  }
 0xf4e   :  { %4123 = vmatprep.mubr.msk.bf16.mxu1 %vm4418_vm0, %v4417_v1  ;;  %4128 = vmatpush3.bf16.msra.mxu0 %v4194_v5 }
 0xf4f   :  { %4129 = vmatprep.subr.bf16.mxu0 %v4417_v1 }
 0xf5b   :  { %v2952_v38 = vpop.permute.xlu1 %2951 }
 0xf5c   :  { %2962 = vst.msk [vmem:[#allocation2 + $0x20] sm:$0xff] %vm1274_vm7, %v2952_v38  ;;  %v4195_v38 = vld [vmem:[%s5911_s6 + $0x10] sm:$0xff]  }
 0xf5d   :  { %4130 = vmatpush3.bf16.msra.mxu0 %v4195_v38 }
 0xf63   :  { %v2967_v20 = vld [vmem:[#allocation2 + $0x20] sm:$0xff] }
 0xf64   :  { %v2970_v27 = vpack.c.bf16 %v2967_v20, %v2967_v20  ;;  %v4196_v20 = vld [vmem:[%s5912_s7 + $0x38] sm:$0xff]  }
 0xf65   :  { %4144 = vmatpush3.bf16.msra.mxu1 %v4196_v20 }
 0xf66   :  { %4124 = vmatmul.mubr.msk.bf16.gmra.mxu1 %vm98_vm1, %v2970_v27  ;;  %4145 = vmatprep.subr.bf16.mxu1 %v4417_v1 }
 0xf67   :  { %4151 = vmatprep.mubr.msk.bf16.mxu1 %vm4418_vm0, %v4417_v1 }
0x1005   :  { %v3030_v8 = vpop.f32.mrf.mxu1 }
0x1006   :  { %v3031_v29 = vadd.f32 %v3030_v8, %v2974_v35 }
0x1007   :  { %v4117_v13 = vpop.f32.mrf.mxu1 }
0x1008   :  { %v3052_v18 = vadd.f32 %v3031_v29, %v5238_v31 }
0x1009   :  { %v3033_v9 = vpop.f32.mrf.mxu1 }
0x100a   :  { %v3034_v21 = vadd.f32 %v3033_v9, %v2974_v35  ;;  %v3057_v42 = vsel %vm98_vm1, %v3052_v18, 0.0 }
0x100b   :  { %3058 = vadd.xlane.f32.xlu0 %v3057_v42  ;;  %v4118_v22 = vpop.f32.mrf.mxu1 }
0x100c   :  { %v3053_v56 = vadd.f32 %v3034_v21, %v5240_v36 }
0x100d   :  { %v3038_v52 = vpop.f32.mrf.mxu1 }
0x100e   :  { %v3039_v63 = vadd.f32 %v3038_v52, %v2974_v35  ;;  %v3060_v43 = vsel %vm98_vm1, %v3053_v56, 0.0 }
0x100f   :  { %v4121_v46 = vpop.f32.mrf.mxu1  ;;  %3061 = vadd.xlane.f32.xlu1 %v3060_v43  ;;  %v3125_v43 = vrot.slane %v5779_v61, %v1442_v41 }
0x1010   :  { %v3054_v14 = vadd.f32 %v3039_v63, %v5258_v26 }
0x1011   :  { %v3041_v19 = vpop.f32.mrf.mxu1 }
0x1012   :  { %v3042_v23 = vadd.f32 %v3041_v19, %v2974_v35  ;;  %v3063_v31 = vsel %vm98_vm1, %v3054_v14, 0.0  ;;  %v3134_v19 = vrot.slane %v5779_v61, %v1451_v55 }
0x1013   :  { %3064 = vadd.xlane.f32.xlu0 %v3063_v31  ;;  %v4122_v62 = vpop.f32.mrf.mxu1 }
0x1014   :  { %v3055_v53 = vadd.f32 %v3042_v23, %v5262_v59 }
0x1016   :  { %v3066_v10 = vsel %vm98_vm1, %v3055_v53, 0.0 }
0x1017   :  { %3067 = vadd.xlane.f32.xlu0 %v3066_v10 }
0x1026   :  { %v3046_v36 = vpop.f32.mrf.mxu1 }
0x1027   :  { %v3047_v60 = vadd.f32 %v3046_v36, %v2974_v35 }
0x1028   :  { %v4125_v7 = vpop.f32.mrf.mxu1 }
0x1029   :  { %v3056_v54 = vadd.f32 %v3047_v60, %v5281_v30 }
0x102a   :  { %v3049_v28 = vpop.f32.mrf.mxu1 }
0x102b   :  { %v3069_v34 = vsel %vm98_vm1, %v3056_v54, 0.0 }
0x102c   :  { %3070 = vadd.xlane.f32.xlu1 %v3069_v34  ;;  %v4126_v26 = vpop.f32.mrf.mxu1 }
0x1094   :  { %v3059_v37 = vpop.xlane.xlu0 %3058 }
0x1095   :  { %v3072_v45 = vmul.f32 0.03125, %v3059_v37 }
0x1097   :  { %v3077_v58 = vsub.f32 %v3052_v18, %v3072_v45 }
0x1098   :  { %v3062_v24 = vpop.xlane.xlu1 %3061 }
0x1099   :  { %v3073_v3 = vmul.f32 0.03125, %v3062_v24  ;;  %v3082_v48 = vmul.f32 %v3077_v58, %v3077_v58 }
0x109b   :  { %v3078_v59 = vsub.f32 %v3053_v56, %v3073_v3  ;;  %v3087_v15 = vsel %vm98_vm1, %v3082_v48, 0.0 }
0x109c   :  { %v3065_v51 = vpop.xlane.xlu0 %3064  ;;  %3088 = vadd.xlane.f32.xlu0 %v3087_v15 }
0x109d   :  { %v3074_v12 = vmul.f32 0.03125, %v3065_v51  ;;  %v3083_v33 = vmul.f32 %v3078_v59, %v3078_v59 }
0x109f   :  { %v3079_v40 = vsub.f32 %v3054_v14, %v3074_v12  ;;  %v3090_v30 = vsel %vm98_vm1, %v3083_v33, 0.0  ;;  %v4197_v12 = vld [vmem:[%s5912_s7 + $0x30] sm:$0xff]   ;;  %v4198_v33 = vld [vmem:[%s5912_s7 + $0x28] sm:$0xff]  }
0x10a0   :  { %v3068_v6 = vpop.xlane.xlu0 %3067  ;;  %3091 = vadd.xlane.f32.xlu1 %v3090_v30  ;;  %4146 = vmatpush3.bf16.msra.mxu1 %v4197_v12  ;;  %v3543_v30 = vld [vmem:[%s5913_s9 + $0x1] ss:$0 sm:$0xff] }
0x10a1   :  { %v3075_v2 = vmul.f32 0.03125, %v3068_v6  ;;  %v3084_v39 = vmul.f32 %v3079_v40, %v3079_v40  ;;  %4147 = vmatprep.subr.bf16.mxu1 %v4417_v1 }
0x10a3   :  { %v3080_v47 = vsub.f32 %v3055_v53, %v3075_v2  ;;  %v3093_v16 = vsel %vm98_vm1, %v3084_v39, 0.0 }
0x10a4   :  { %3094 = vadd.xlane.f32.xlu0 %v3093_v16  ;;  %4148 = vmatpush3.bf16.msra.mxu1 %v4198_v33 }
0x10a5   :  { %v3085_v32 = vmul.f32 %v3080_v47, %v3080_v47  ;;  %4149 = vmatprep.subr.bf16.mxu1 %v4417_v1 }
0x10a7   :  { %v3096_v57 = vsel %vm98_vm1, %v3085_v32, 0.0 }
0x10a8   :  { %3097 = vadd.xlane.f32.xlu1 %v3096_v57 }
0x10b5   :  { %v3071_v0 = vpop.xlane.xlu1 %3070 }
0x10b6   :  { %v3076_v44 = vmul.f32 0.03125, %v3071_v0 }
0x10b8   :  { %v3081_v25 = vsub.f32 %v3056_v54, %v3076_v44 }
0x10ba   :  { %v3086_v17 = vmul.f32 %v3081_v25, %v3081_v25 }
0x10bc   :  { %v3099_v11 = vsel %vm98_vm1, %v3086_v17, 0.0 }
0x10bd   :  { %3100 = vadd.xlane.f32.xlu0 %v3099_v11 }
0x1125   :  { %v3089_v27 = vpop.xlane.xlu0 %3088 }
0x1126   :  { %v3102_v35 = vmul.f32 0.03125, %v3089_v27 }
0x1128   :  { %v3107_v8 = vadd.f32 1e-05, %v3102_v35 }
0x1129   :  { %v3092_v29 = vpop.xlane.xlu1 %3091 }
0x112a   :  { %4380 = vrsqrt.f32 %v3107_v8  ;;  %v3103_v13 = vmul.f32 0.03125, %v3092_v29 }
0x112c   :  { %v3108_v18 = vadd.f32 1e-05, %v3103_v13 }
0x112d   :  { %v3095_v9 = vpop.xlane.xlu0 %3094 }
0x112e   :  { %4382 = vrsqrt.f32 %v3108_v18  ;;  %v3104_v21 = vmul.f32 0.03125, %v3095_v9 }
0x1130   :  { %v3109_v42 = vadd.f32 1e-05, %v3104_v21 }
0x1131   :  { %v3098_v22 = vpop.xlane.xlu1 %3097 }
0x1132   :  { %4384 = vrsqrt.f32 %v3109_v42  ;;  %v3105_v56 = vmul.f32 0.03125, %v3098_v22 }
0x1134   :  { %v3110_v52 = vadd.f32 1e-05, %v3105_v56  ;;  %v3237_v56 = vrot.slane %v5779_v61, %v1554_v50 }
0x1136   :  { %4386 = vrsqrt.f32 %v3110_v52 }
0x1137   :  { %v4381_v63 = vpop.eup %4380 }
0x1138   :  { %v3117_v46 = vmul.f32 %v4381_v63, %v3077_v58 }
0x113a   :  { %v3126_v23 = vmul.f32 %v3125_v43, %v3117_v46 }
0x113b   :  { %v4383_v14 = vpop.eup %4382 }
0x113c   :  { %v3118_v31 = vmul.f32 %v4383_v14, %v3078_v59  ;;  %v5816_v10 = vadd.f32 %v3134_v19, %v3126_v23 }
0x113e   :  { %v3127_v62 = vmul.f32 %v3125_v43, %v3118_v31 }
0x113f   :  { %v4385_v53 = vpop.eup %4384 }
0x1140   :  { %v5818_v36 = vadd.f32 %v3134_v19, %v3127_v62  ;;  %v3119_v60 = vmul.f32 %v4385_v53, %v3079_v40  ;;  %v4199_v40 = vld [vmem:[%s5912_s7 + $0x20] sm:$0xff]  }
0x1141   :  { %4150 = vmatpush3.bf16.msra.mxu1 %v4199_v40 }
0x1142   :  { %v3140_v7 = vpack.c.bf16 %v5818_v36, %v5816_v10  ;;  %v3128_v28 = vmul.f32 %v3125_v43, %v3119_v60 }
0x1143   :  { %v4387_v54 = vpop.eup %4386 }
0x1144   :  { %v3120_v41 = vmul.f32 %v4387_v54, %v3080_v47  ;;  %4132 = vmatmul.mubr.msk.bf16.vlgmr.msra.gmra.mxu0 %vm98_vm1, %v3140_v7  ;;  %v5825_v37 = vadd.f32 %v3134_v19, %v3128_v28 }
0x1145   :  { %4135 = vmatprep.mubr.msk.bf16.mxu0 %vm4418_vm0, %v4417_v1 }
0x1146   :  { %v3101_v55 = vpop.xlane.xlu0 %3100  ;;  %v3129_v34 = vmul.f32 %v3125_v43, %v3120_v41 }
0x1147   :  { %v3106_v26 = vmul.f32 0.03125, %v3101_v55 }
0x1148   :  { %v5827_v45 = vadd.f32 %v3134_v19, %v3129_v34 }
0x1149   :  { %v3111_v58 = vadd.f32 1e-05, %v3106_v26 }
0x114a   :  { %v3141_v24 = vpack.c.bf16 %v5827_v45, %v5825_v37 }
0x114b   :  { %4388 = vrsqrt.f32 %v3111_v58 }
0x114c   :  { %4136 = vmatmul.mubr.msk.bf16.gmra.mxu0 %vm98_vm1, %v3141_v24 }
0x114d   :  { %4139 = vmatprep.mubr.msk.bf16.mxu0 %vm4418_vm0, %v4417_v1 }
0x1158   :  { %v4389_v3 = vpop.eup %4388 }
0x1159   :  { %v3121_v48 = vmul.f32 %v4389_v3, %v3081_v25 }
0x115b   :  { %v3130_v59 = vmul.f32 %v3125_v43, %v3121_v48 }
0x115d   :  { %v5834_v15 = vadd.f32 %v3134_v19, %v3130_v59 }
0x115f   :  { %v3142_v51 = vpack.c.bf16 %v5834_v15, %v5834_v15 }
0x1161   :  { %4140 = vmatmul.mubr.msk.bf16.gmra.mxu0 %vm98_vm1, %v3142_v51 }
0x1204   :  { %v3204_v6 = vpop.f32.mrf.mxu0 }
0x1205   :  { %v3205_v39 = vadd.f32 %v3543_v30, %v3204_v6 }
0x1206   :  { %v4133_v2 = vpop.f32.mrf.mxu0 }
0x1207   :  { %v3226_v57 = vmax.f32 %v3205_v39, 0.0 }
0x1208   :  { %v3207_v47 = vpop.f32.mrf.mxu0 }
0x1209   :  { %v3208_v16 = vadd.f32 %v3543_v30, %v3207_v47 }
0x120a   :  { %v4134_v32 = vpop.f32.mrf.mxu0 }
0x120b   :  { %v3227_v0 = vmax.f32 %v3208_v16, 0.0 }
0x120c   :  { %v3212_v44 = vpop.f32.mrf.mxu0 }
0x120d   :  { %v3231_v25 = vpack.c.bf16 %v3227_v0, %v3226_v57  ;;  %v3213_v11 = vadd.f32 %v3543_v30, %v3212_v44 }
0x120e   :  { %v4137_v17 = vpop.f32.mrf.mxu0 }
0x120f   :  { %4152 = vmatmul.mubr.msk.bf16.vlgmr.msra.gmra.mxu1 %vm1580_vm8, %v3231_v25  ;;  %v3228_v27 = vmax.f32 %v3213_v11, 0.0 }
0x1210   :  { %v3215_v5 = vpop.f32.mrf.mxu0  ;;  %4155 = vmatprep.mubr.msk.bf16.mxu1 %vm4418_vm0, %v4417_v1 }
0x1211   :  { %v3216_v38 = vadd.f32 %v3543_v30, %v3215_v5 }
0x1212   :  { %v4138_v20 = vpop.f32.mrf.mxu0 }
0x1213   :  { %v3229_v35 = vmax.f32 %v3216_v38, 0.0 }
0x1215   :  { %v3232_v8 = vpack.c.bf16 %v3229_v35, %v3228_v27 }
0x1217   :  { %4156 = vmatmul.mubr.msk.bf16.gmra.mxu1 %vm1580_vm8, %v3232_v8 }
0x1218   :  { %4159 = vmatprep.mubr.msk.bf16.mxu1 %vm4418_vm0, %v4417_v1 }
0x1221   :  { %v3220_v29 = vpop.f32.mrf.mxu0 }
0x1222   :  { %v3221_v13 = vadd.f32 %v3543_v30, %v3220_v29 }
0x1223   :  { %v4141_v18 = vpop.f32.mrf.mxu0 }
0x1224   :  { %v3230_v9 = vmax.f32 %v3221_v13, 0.0 }
0x1225   :  { %v3223_v21 = vpop.f32.mrf.mxu0 }
0x1226   :  { %v3233_v42 = vpack.c.bf16 %v3230_v9, %v3230_v9 }
0x1227   :  { %v4142_v22 = vpop.f32.mrf.mxu0 }
0x1228   :  { %4160 = vmatmul.mubr.msk.bf16.gmra.mxu1 %vm1580_vm8, %v3233_v42 }
0x12cf   :  { %v3305_v52 = vpop.f32.mrf.mxu1 }
0x12d0   :  { %v3306_v63 = vadd.f32 %v3305_v52, %v3237_v56 }
0x12d1   :  { %v4153_v43 = vpop.f32.mrf.mxu1 }
0x12d2   :  { %v3327_v46 = vadd.f32 %v3306_v63, %v5816_v10 }
0x12d3   :  { %v3308_v14 = vpop.f32.mrf.mxu1 }
0x12d4   :  { %v3309_v1 = vadd.f32 %v3308_v14, %v3237_v56  ;;  %v3332_v19 = vsel %vm98_vm1, %v3327_v46, 0.0 }
0x12d5   :  { %3333 = vadd.xlane.f32.xlu1 %v3332_v19  ;;  %v4154_v23 = vpop.f32.mrf.mxu1  ;;  %v3556_v19 = vld [vmem:[%s5907_s8 + $0x18] ss:$0 sm:$0xff] }
0x12d6   :  { %v3328_v31 = vadd.f32 %v3309_v1, %v5818_v36 }
0x12d7   :  { %v3313_v62 = vpop.f32.mrf.mxu1 }
0x12d8   :  { %v3314_v53 = vadd.f32 %v3313_v62, %v3237_v56  ;;  %v3335_v60 = vsel %vm98_vm1, %v3328_v31, 0.0 }
0x12d9   :  { %3336 = vadd.xlane.f32.xlu0 %v3335_v60  ;;  %v4157_v7 = vpop.f32.mrf.mxu1 }
0x12da   :  { %v3329_v50 = vadd.f32 %v3314_v53, %v5825_v37 }
0x12db   :  { %v3316_v54 = vpop.f32.mrf.mxu1 }
0x12dc   :  { %v3317_v41 = vadd.f32 %v3316_v54, %v3237_v56  ;;  %v3338_v10 = vsel %vm98_vm1, %v3329_v50, 0.0 }
0x12dd   :  { %3339 = vadd.xlane.f32.xlu1 %v3338_v10  ;;  %v4158_v28 = vpop.f32.mrf.mxu1 }
0x12de   :  { %v3330_v55 = vadd.f32 %v3317_v41, %v5827_v45 }
0x12e0   :  { %v3341_v34 = vsel %vm98_vm1, %v3330_v55, 0.0 }
0x12e1   :  { %3342 = vadd.xlane.f32.xlu0 %v3341_v34 }
0x12e8   :  { %v3321_v36 = vpop.f32.mrf.mxu1 }
0x12e9   :  { %v3322_v26 = vadd.f32 %v3321_v36, %v3237_v56 }
0x12ea   :  { %v4161_v58 = vpop.f32.mrf.mxu1 }
0x12eb   :  { %v3331_v24 = vadd.f32 %v3322_v26, %v5834_v15 }
0x12ec   :  { %v3324_v3 = vpop.f32.mrf.mxu1 }
0x12ed   :  { %v3344_v48 = vsel %vm98_vm1, %v3331_v24, 0.0 }
0x12ee   :  { %3345 = vadd.xlane.f32.xlu1 %v3344_v48  ;;  %v4162_v37 = vpop.f32.mrf.mxu1 }
0x135e   :  { %v3334_v59 = vpop.xlane.xlu1 %3333 }
0x135f   :  { %v3347_v51 = vmul.f32 0.03125, %v3334_v59 }
0x1361   :  { %v3352_v12 = vsub.f32 %v3327_v46, %v3347_v51  ;;  %v3400_v46 = vrot.slane %v5779_v61, %v1718_v49 }
0x1362   :  { %v3337_v33 = vpop.xlane.xlu0 %3336 }
0x1363   :  { %v3348_v40 = vmul.f32 0.03125, %v3337_v33  ;;  %v3357_v30 = vmul.f32 %v3352_v12, %v3352_v12 }
0x1365   :  { %v3353_v45 = vsub.f32 %v3328_v31, %v3348_v40  ;;  %v3362_v6 = vsel %vm98_vm1, %v3357_v30, 0.0 }
0x1366   :  { %v3340_v2 = vpop.xlane.xlu1 %3339  ;;  %3363 = vadd.xlane.f32.xlu0 %v3362_v6 }
0x1367   :  { %v3349_v39 = vmul.f32 0.03125, %v3340_v2  ;;  %v3358_v47 = vmul.f32 %v3353_v45, %v3353_v45 }
0x1369   :  { %v3354_v16 = vsub.f32 %v3329_v50, %v3349_v39  ;;  %v3365_v15 = vsel %vm98_vm1, %v3358_v47, 0.0 }
0x136a   :  { %v3343_v32 = vpop.xlane.xlu0 %3342  ;;  %3366 = vadd.xlane.f32.xlu1 %v3365_v15 }
0x136b   :  { %v3350_v57 = vmul.f32 0.03125, %v3343_v32  ;;  %v3359_v0 = vmul.f32 %v3354_v16, %v3354_v16 }
0x136d   :  { %v3355_v44 = vsub.f32 %v3330_v55, %v3350_v57  ;;  %v3368_v25 = vsel %vm98_vm1, %v3359_v0, 0.0 }
0x136e   :  { %3369 = vadd.xlane.f32.xlu0 %v3368_v25 }
0x136f   :  { %v3360_v17 = vmul.f32 %v3355_v44, %v3355_v44 }
0x1371   :  { %v3371_v11 = vsel %vm98_vm1, %v3360_v17, 0.0 }
0x1372   :  { %3372 = vadd.xlane.f32.xlu1 %v3371_v11 }
0x1377   :  { %v3346_v5 = vpop.xlane.xlu1 %3345 }
0x1378   :  { %v3351_v38 = vmul.f32 0.03125, %v3346_v5 }
0x137a   :  { %v3356_v20 = vsub.f32 %v3331_v24, %v3351_v38 }
0x137c   :  { %v3361_v27 = vmul.f32 %v3356_v20, %v3356_v20 }
0x137e   :  { %v3374_v35 = vsel %vm98_vm1, %v3361_v27, 0.0 }
0x137f   :  { %3375 = vadd.xlane.f32.xlu0 %v3374_v35 }
0x13ef   :  { %v3364_v8 = vpop.xlane.xlu0 %3363 }
0x13f0   :  { %v3377_v29 = vmul.f32 0.03125, %v3364_v8 }
0x13f2   :  { %v3382_v13 = vadd.f32 1e-05, %v3377_v29 }
0x13f3   :  { %v3367_v18 = vpop.xlane.xlu1 %3366 }
0x13f4   :  { %4390 = vrsqrt.f32 %v3382_v13  ;;  %v3378_v9 = vmul.f32 0.03125, %v3367_v18 }
0x13f6   :  { %v3383_v21 = vadd.f32 1e-05, %v3378_v9 }
0x13f7   :  { %v3370_v42 = vpop.xlane.xlu0 %3369 }
0x13f8   :  { %4392 = vrsqrt.f32 %v3383_v21  ;;  %v3379_v22 = vmul.f32 0.03125, %v3370_v42 }
0x13fa   :  { %v3384_v56 = vadd.f32 1e-05, %v3379_v22 }
0x13fb   :  { %v3373_v52 = vpop.xlane.xlu1 %3372 }
0x13fc   :  { %4394 = vrsqrt.f32 %v3384_v56  ;;  %v3380_v63 = vmul.f32 0.03125, %v3373_v52 }
0x13fe   :  { %v3385_v43 = vadd.f32 1e-05, %v3380_v63 }
0x1400   :  { %4396 = vrsqrt.f32 %v3385_v43 }
0x1401   :  { %v4391_v14 = vpop.eup %4390 }
0x1402   :  { %v3392_v1 = vmul.f32 %v4391_v14, %v3352_v12 }
0x1404   :  { %v3401_v23 = vmul.f32 %v3400_v46, %v3392_v1 }
0x1405   :  { %v4393_v31 = vpop.eup %4392 }
0x1406   :  { %v3410_v62 = vadd.f32 %v3556_v19, %v3401_v23  ;;  %v3393_v53 = vmul.f32 %v4393_v31, %v3353_v45 }
0x1408   :  { %3415 = vst.msk [vmem:[%s5914_s10] sm:$0xff] %vm98_vm1, %v3410_v62  ;;  %v3402_v60 = vmul.f32 %v3400_v46, %v3393_v53  ;;  %v3376_v4 = vpop.xlane.xlu0 %3375 }
0x1409   :  { %v4395_v7 = vpop.eup %4394  ;;  %v3381_v49 = vmul.f32 0.03125, %v3376_v4 }
0x140a   :  { %v3411_v61 = vadd.f32 %v3556_v19, %v3402_v60  ;;  %v3394_v50 = vmul.f32 %v4395_v7, %v3354_v16 }
0x140b   :  { %v3386_v54 = vadd.f32 1e-05, %v3381_v49 }
0x140c   :  { %3416 = vst.msk [vmem:[%s5914_s10 + $0x8] sm:$0xff] %vm98_vm1, %v3411_v61  ;;  %v3403_v41 = vmul.f32 %v3400_v46, %v3394_v50 }
0x140d   :  { %v4397_v10 = vpop.eup %4396  ;;  %4398 = vrsqrt.f32 %v3386_v54 }
0x140e   :  { %v3412_v28 = vadd.f32 %v3556_v19, %v3403_v41  ;;  %v3395_v55 = vmul.f32 %v4397_v10, %v3355_v44 }
0x1410   :  { %3417 = vst.msk [vmem:[%s5914_s10 + $0x10] sm:$0xff] %vm98_vm1, %v3412_v28  ;;  %v3404_v34 = vmul.f32 %v3400_v46, %v3395_v55 }
0x1412   :  { %v3413_v36 = vadd.f32 %v3556_v19, %v3404_v34 }
0x1414   :  { %3418 = vst.msk [vmem:[%s5914_s10 + $0x18] sm:$0xff] %vm98_vm1, %v3413_v36 }
0x141a   :  { %v4399_v26 = vpop.eup %4398 }
0x141b   :  { %v3396_v58 = vmul.f32 %v4399_v26, %v3356_v20 }
0x141d   :  { %v3405_v24 = vmul.f32 %v3400_v46, %v3396_v58 }
0x141f   :  { %v3414_v3 = vadd.f32 %v3556_v19, %v3405_v24 }
0x1421   :  { %3419 = vst.msk [vmem:[%s5914_s10 + $0x20] sm:$0xff] %vm98_vm1, %v3414_v3 }

</bundles_post_ra>
